<compile_context>
chip_gen: v7x
topology: tpu7x:2x2x1
jax: 0.10.0
libtpu: 0.0.40
codegen_flags: <defaults>
</compile_context>

<pallas_src>
import functools

import jax
import jax.numpy as jnp
from jax import lax
from jax.experimental import pallas as pl
from jax.experimental.pallas import tpu as pltpu

EPS = 1e-5    # nn.BatchNorm2d default eps
LANE = 128


def _round_up(x, m):
    return (x + m - 1) // m * m


def _pad_channels(c):
    # Dense K packing (perf review): pad channels only to a sublane-friendly
    # multiple of 8.  Large UNet widths are already lane-aligned; tiny widths
    # (4/8) no longer waste ~16x MXU K passes on zeros.
    return _round_up(c, 8)


# ------------------------------ Pallas kernels ------------------------------ #

def _conv3x3_grouped(x, w_ref, rows, ho, wo):
    """dw-grouped 3x3 'valid' conv: 3 accumulating matmuls with K = 3*C.

    x: (bt, h, w, C); w_ref: (3, 3*C, Co) laid out as (dw, (dh, ci), co).
    Returns f32 (rows, Co) with rows = bt*ho*wo.
    """
    acc = jnp.zeros((rows, w_ref.shape[-1]), jnp.float32)
    for dw in range(3):                       # dh offsets are free row offsets
        patch = jnp.concatenate(
            [x[:, dh:dh + ho, dw:dw + wo, :] for dh in range(3)], axis=-1)
        acc = acc + jnp.dot(patch.reshape(rows, -1), w_ref[dw],
                            preferred_element_type=jnp.float32)
    return acc


def _tile_stats(y, st_ref, inv_rows):
    """Per-tile mean and centered sum-of-squares (combined in the wrapper)."""
    mean = jnp.sum(y, axis=0, keepdims=True) * inv_rows
    d = y - mean
    st_ref[0:1, :] = mean
    st_ref[1:2, :] = jnp.sum(d * d, axis=0, keepdims=True)


def _conv_stats_kernel(x_ref, w_ref, y_ref, st_ref, *, ho, wo, inv_rows):
    """conv1 (pre-BN) + per-tile BN1 statistics."""
    bt = x_ref.shape[0]
    rows = bt * ho * wo
    y = _conv3x3_grouped(x_ref[...], w_ref, rows, ho, wo)
    _tile_stats(y, st_ref, inv_rows)
    y_ref[...] = y.reshape(bt, ho, wo, -1)


def _bn_relu_conv_stats_kernel(y1_ref, a1_ref, w_ref, y2_ref, st_ref, *,
                               ho, wo, inv_rows, cdt):
    """BN1 (folded scale/shift) + ReLU + conv2 (pre-BN) + BN2 statistics."""
    c = y1_ref.shape[-1]
    scale = a1_ref[0:1, :].reshape(1, 1, 1, c)
    shift = a1_ref[1:2, :].reshape(1, 1, 1, c)
    h = jnp.maximum(y1_ref[...] * scale + shift, 0.0).astype(cdt)
    bt = y1_ref.shape[0]
    rows = bt * ho * wo
    y = _conv3x3_grouped(h, w_ref, rows, ho, wo)
    _tile_stats(y, st_ref, inv_rows)
    y2_ref[...] = y.reshape(bt, ho, wo, -1)


def _bn_relu_kernel(y_ref, a_ref, o_ref):
    """BN2 (folded scale/shift) + ReLU -> final output."""
    c = y_ref.shape[-1]
    scale = a_ref[0:1, :].reshape(1, 1, 1, c)
    shift = a_ref[1:2, :].reshape(1, 1, 1, c)
    o_ref[...] = jnp.maximum(y_ref[...] * scale + shift, 0.0).astype(o_ref.dtype)


# --------------------------------- helpers ---------------------------------- #

def _pick_batch_tile(n, rows_per_sample, requested=None, target_rows=1024):
    """Batch tile so the matmul M dim is ~target_rows (must divide n)."""
    if requested is not None:
        bt = max(1, min(n, int(requested)))
    else:
        bt = max(1, min(n, target_rows // max(1, rows_per_sample)))
    while n % bt:
        bt -= 1
    return bt


def _vmem_limit_bytes():
    # Re-derive the VMEM budget per generation (v5e/v6e: 128 MiB, v7x: 64 MiB).
    try:
        cap = int(pltpu.get_tpu_info().vmem_capacity_bytes)
    except Exception:
        cap = 64 * 1024 * 1024
    return int(min(cap * 3 // 4, 100 * 1024 * 1024))


def _finalize_bn(stats, count_per_tile, total_count, gamma_p, beta_p):
    """Combine per-tile (mean, centered sumsq) -> fused (scale, shift), f32."""
    means = stats[:, 0, :]                                   # (T, C)
    m2s = stats[:, 1, :]
    mean = jnp.mean(means, axis=0)                           # equal-count tiles
    m2 = jnp.sum(m2s, axis=0) + count_per_tile * jnp.sum((means - mean) ** 2, axis=0)
    var = jnp.maximum(m2 / total_count, 0.0)                 # biased (training)
    scale = gamma_p * lax.rsqrt(var + EPS)
    shift = beta_p - mean * scale
    return jnp.stack([scale, shift], axis=0)                 # (2, C) f32


# --------------------------------- wrapper ----------------------------------- #

def double_convs(x_nchw, w1_oihw, g1, b1, w2_oihw, g2, b2, *,
                 compute_dtype=None, batch_tile=None):
    """PyTorch-layout wrapper (x NCHW, weights OIHW, 3x3 'valid', bias-free).

    Matches DoubleConvs.forward in training mode.  compute_dtype sets the
    matmul-operand dtype; bfloat16 is recommended on all TPU generations
    (v5e/v6e/v7x MXUs are bf16-native).  BN stats / normalization stay f32.
    """
    N, Cin, H, W = x_nchw.shape
    Chid, Cout = w1_oihw.shape[0], w2_oihw.shape[0]
    ho1, wo1 = H - 2, W - 2
    ho2, wo2 = H - 4, W - 4
    out_dtype = x_nchw.dtype
    cdt = jnp.dtype(compute_dtype) if compute_dtype is not None else jnp.dtype(out_dtype)

    cin_p, chid_p, cout_p = (_pad_channels(c) for c in (Cin, Chid, Cout))

    # NHWC + dense channel padding (only adapts the PyTorch NCHW interface).
    x_nhwc = jnp.transpose(x_nchw, (0, 2, 3, 1))
    x_p = jnp.pad(x_nhwc, ((0, 0), (0, 0), (0, 0), (0, cin_p - Cin))).astype(cdt)

    def prep_w(w_oihw, ci_p, co_p):
        # OIHW -> (dw, dh, ci, co) -> (3, 3*ci_p, co_p): one weight slab per
        # dw-grouped accumulating matmul.
        co, ci = w_oihw.shape[0], w_oihw.shape[1]
        w = jnp.transpose(w_oihw, (3, 2, 1, 0))
        w = jnp.pad(w, ((0, 0), (0, 0), (0, ci_p - ci), (0, co_p - co)))
        return w.reshape(3, 3 * ci_p, co_p).astype(cdt)

    def prep_gb(g, b, co_p):
        co = g.shape[0]
        gp = jnp.pad(g.astype(jnp.float32), (0, co_p - co), constant_values=1.0)
        bp = jnp.pad(b.astype(jnp.float32), (0, co_p - co))
        return gp, bp

    w1_p = prep_w(w1_oihw, cin_p, chid_p)
    w2_p = prep_w(w2_oihw, chid_p, cout_p)
    g1_p, b1_p = prep_gb(g1, b1, chid_p)
    g2_p, b2_p = prep_gb(g2, b2, cout_p)

    isz = jnp.dtype(cdt).itemsize
    cparams = pltpu.CompilerParams(
        dimension_semantics=("parallel",),      # batch tiles are independent
        vmem_limit_bytes=_vmem_limit_bytes())

    # ---- kernel 1: conv1 + per-tile BN1 stats -------------------------------
    bt1 = _pick_batch_tile(N, ho1 * wo1, batch_tile)
    t1 = N // bt1
    cost1 = pl.CostEstimate(
        flops=int(2 * N * ho1 * wo1 * 9 * cin_p * chid_p), transcendentals=0,
        bytes_accessed=int(N * H * W * cin_p * isz + 9 * cin_p * chid_p * isz
                           + N * ho1 * wo1 * chid_p * 4 + t1 * 2 * chid_p * 4))
    y1, st1 = pl.pallas_call(
        functools.partial(_conv_stats_kernel, ho=ho1, wo=wo1,
                          inv_rows=1.0 / float(bt1 * ho1 * wo1)),
        out_shape=(jax.ShapeDtypeStruct((N, ho1, wo1, chid_p), jnp.float32),
                   jax.ShapeDtypeStruct((t1, 2, chid_p), jnp.float32)),
        grid_spec=pltpu.PrefetchScalarGridSpec(
            num_scalar_prefetch=0, grid=(t1,),
            in_specs=[
                pl.BlockSpec((bt1, H, W, cin_p), lambda i: (i, 0, 0, 0)),
                pl.BlockSpec((3, 3 * cin_p, chid_p), lambda i: (0, 0, 0)),
            ],
            out_specs=[
                pl.BlockSpec((bt1, ho1, wo1, chid_p), lambda i: (i, 0, 0, 0)),
                pl.BlockSpec((None, 2, chid_p), lambda i: (i, 0, 0)),
            ]),
        compiler_params=cparams, cost_estimate=cost1,
    )(x_p, w1_p)

    a1 = _finalize_bn(st1, bt1 * ho1 * wo1, N * ho1 * wo1, g1_p, b1_p)

    # ---- kernel 2: BN1 + ReLU + conv2 + per-tile BN2 stats -------------------
    bt2 = _pick_batch_tile(N, ho2 * wo2, batch_tile)
    t2 = N // bt2
    cost2 = pl.CostEstimate(
        flops=int(2 * N * ho2 * wo2 * 9 * chid_p * cout_p), transcendentals=0,
        bytes_accessed=int(N * ho1 * wo1 * chid_p * 4 + 9 * chid_p * cout_p * isz
                           + N * ho2 * wo2 * cout_p * 4 + t2 * 2 * cout_p * 4))
    y2, st2 = pl.pallas_call(
        functools.partial(_bn_relu_conv_stats_kernel, ho=ho2, wo=wo2,
                          inv_rows=1.0 / float(bt2 * ho2 * wo2), cdt=cdt),
        out_shape=(jax.ShapeDtypeStruct((N, ho2, wo2, cout_p), jnp.float32),
                   jax.ShapeDtypeStruct((t2, 2, cout_p), jnp.float32)),
        grid_spec=pltpu.PrefetchScalarGridSpec(
            num_scalar_prefetch=0, grid=(t2,),
            in_specs=[
                pl.BlockSpec((bt2, ho1, wo1, chid_p), lambda i: (i, 0, 0, 0)),
                pl.BlockSpec((2, chid_p), lambda i: (0, 0)),
                pl.BlockSpec((3, 3 * chid_p, cout_p), lambda i: (0, 0, 0)),
            ],
            out_specs=[
                pl.BlockSpec((bt2, ho2, wo2, cout_p), lambda i: (i, 0, 0, 0)),
                pl.BlockSpec((None, 2, cout_p), lambda i: (i, 0, 0)),
            ]),
        compiler_params=cparams, cost_estimate=cost2,
    )(y1, a1, w2_p)

    a2 = _finalize_bn(st2, bt2 * ho2 * wo2, N * ho2 * wo2, g2_p, b2_p)

    # ---- kernel 3: BN2 + ReLU -> output --------------------------------------
    bt3 = _pick_batch_tile(N, ho2 * wo2, batch_tile)
    out = pl.pallas_call(
        _bn_relu_kernel,
        out_shape=jax.ShapeDtypeStruct((N, ho2, wo2, cout_p), out_dtype),
        grid_spec=pltpu.PrefetchScalarGridSpec(
            num_scalar_prefetch=0, grid=(N // bt3,),
            in_specs=[
                pl.BlockSpec((bt3, ho2, wo2, cout_p), lambda i: (i, 0, 0, 0)),
                pl.BlockSpec((2, cout_p), lambda i: (0, 0)),
            ],
            out_specs=pl.BlockSpec((bt3, ho2, wo2, cout_p),
                                   lambda i: (i, 0, 0, 0))),
        compiler_params=cparams,
    )(y2, a2)

    out_nhwc = out[..., :Cout]
    return jnp.transpose(out_nhwc, (0, 3, 1, 2)).astype(out_dtype)


# ---------------- pure-JAX reference (for verification) ---------------- #

def reference(x_nchw, w1, g1, b1, w2, g2, b2):
    def conv(x, w):
        return lax.conv_general_dilated(
            x, w, window_strides=(1, 1), padding='VALID',
            dimension_numbers=('NCHW', 'OIHW', 'NCHW'))

    def bn_relu(y, g, b):
        mean = jnp.mean(y, axis=(0, 2, 3), keepdims=True)
        var = jnp.mean((y - mean) ** 2, axis=(0, 2, 3), keepdims=True)
        yn = (y - mean) * lax.rsqrt(var + EPS)
        return jnp.maximum(yn * g.reshape(1, -1, 1, 1) + b.reshape(1, -1, 1, 1),
                           0.0)

    y = bn_relu(conv(x_nchw, w1), g1, b1)
    y = bn_relu(conv(y, w2), g2, b2)
    return y


# ---------------------------------- main ----------------------------------- #

if __name__ == "__main__":
    # Shapes consistent with the module: in_channel=4, out_channel=8
    # (hidden_channel defaults to out_channel), kernel_size=3, activation='relu'.
    N, Cin, H, W = 2, 4, 16, 16
    Chid = Cout = 8
    K = 3

    key = jax.random.PRNGKey(0)
    kx, kw1, kw2, kg1, kb1, kg2, kb2 = jax.random.split(key, 7)

    x = jax.random.normal(kx, (N, Cin, H, W), jnp.float32)
    w1 = jax.random.normal(kw1, (Chid, Cin, K, K), jnp.float32) * (2.0 / (Cin * K * K)) ** 0.5
    w2 = jax.random.normal(kw2, (Cout, Chid, K, K), jnp.float32) * (2.0 / (Chid * K * K)) ** 0.5
    g1 = 1.0 + 0.1 * jax.random.normal(kg1, (Chid,), jnp.float32)
    b1 = 0.1 * jax.random.normal(kb1, (Chid,), jnp.float32)
    g2 = 1.0 + 0.1 * jax.random.normal(kg2, (Cout,), jnp.float32)
    b2 = 0.1 * jax.random.normal(kb2, (Cout,), jnp.float32)

    ref = reference(x, w1, g1, b1, w2, g2, b2)

    # f32 path: matches the PyTorch module's f32 numerics tightly.
    out = jax.block_until_ready(double_convs(x, w1, g1, b1, w2, g2, b2))
    assert out.shape == (N, Cout, H - 4, W - 4), out.shape
    assert jnp.allclose(out, ref, rtol=1e-3, atol=1e-3), \
        float(jnp.max(jnp.abs(out - ref)))

    # bf16 matmul-operand path (recommended on v5e/v6e/v7x): conv operands in
    # bf16, accumulation + BN statistics in f32, hence the looser tolerance.
    out_bf16 = jax.block_until_ready(
        double_convs(x, w1, g1, b1, w2, g2, b2, compute_dtype=jnp.bfloat16))
    assert jnp.allclose(out_bf16, ref, rtol=2e-2, atol=2e-2), \
        float(jnp.max(jnp.abs(out_bf16 - ref)))

    print("KERNEL_OK")
</pallas_src>

<mosaic_0001>
module attributes {stable_mosaic.version = 11 : i64} {
  func.func @_conv_stats_kernel(%arg0: i32, %arg1: memref<2x16x16x8xf32, #tpu.memory_space<vmem>>, %arg2: memref<3x24x8xf32, #tpu.memory_space<vmem>>, %arg3: memref<2x14x14x8xf32, #tpu.memory_space<vmem>>, %arg4: memref<1x2x8xf32, #tpu.memory_space<vmem>>) attributes {dimension_semantics = [#tpu.dimension_semantics<parallel>], iteration_bounds = array<i64: 1>, scalar_prefetch = 0 : i64, scratch_operands = 0 : i64, tpu.core_type = #tpu.core_type<tc>, window_params = [{transform_indices = @transform_0, window_bounds = array<i64: 2, 16, 16, 8>}, {pipeline_mode = #tpu.pipeline_mode<synchronous>, transform_indices = @transform_1, window_bounds = array<i64: 3, 24, 8>}, {transform_indices = @transform_2, window_bounds = array<i64: 2, 14, 14, 8>}, {transform_indices = @transform_3, window_bounds = array<i64: 1, 2, 8>}]} {
    %c0 = arith.constant 0 : index
    %c0_0 = arith.constant 0 : index
    %c0_1 = arith.constant 0 : index
    %c0_2 = arith.constant 0 : index
    %0 = vector.load %arg1[%c0, %c0_0, %c0_1, %c0_2] : memref<2x16x16x8xf32, #tpu.memory_space<vmem>>, vector<2x16x16x8xf32>
    %cst = arith.constant 0.000000e+00 : f32
    %1 = vector.broadcast %cst : f32 to vector<392x8xf32>
    %2 = vector.extract_strided_slice %0 {offsets = [0, 0, 0, 0], sizes = [2, 14, 14, 8], strides = [1, 1, 1, 1]} : vector<2x16x16x8xf32> to vector<2x14x14x8xf32>
    %3 = vector.extract_strided_slice %0 {offsets = [0, 1, 0, 0], sizes = [2, 14, 14, 8], strides = [1, 1, 1, 1]} : vector<2x16x16x8xf32> to vector<2x14x14x8xf32>
    %4 = vector.extract_strided_slice %0 {offsets = [0, 2, 0, 0], sizes = [2, 14, 14, 8], strides = [1, 1, 1, 1]} : vector<2x16x16x8xf32> to vector<2x14x14x8xf32>
    %5 = tpu.concatenate %2, %3, %4 in 3 : vector<2x14x14x8xf32>, vector<2x14x14x8xf32>, vector<2x14x14x8xf32> -> vector<2x14x14x24xf32>
    %6 = vector.shape_cast %5 : vector<2x14x14x24xf32> to vector<392x24xf32>
    %c0_3 = arith.constant 0 : index
    %c0_4 = arith.constant 0 : index
    %c0_5 = arith.constant 0 : index
    %7 = vector.load %arg2[%c0_3, %c0_4, %c0_5] : memref<3x24x8xf32, #tpu.memory_space<vmem>>, vector<1x24x8xf32>
    %8 = vector.shape_cast %7 : vector<1x24x8xf32> to vector<24x8xf32>
    %cst_6 = arith.constant dense<0.000000e+00> : vector<392x8xf32>
    %9 = tpu.matmul %6, %8, %cst_6 {dimension_numbers = #tpu.dot_dimension_numbers<[1], [0], [0], [1], [0, 0, 1, 1], [], []>} : vector<392x24xf32>, vector<24x8xf32>, vector<392x8xf32> -> vector<392x8xf32>
    %10 = arith.addf %1, %9 : vector<392x8xf32>
    %11 = vector.extract_strided_slice %0 {offsets = [0, 0, 1, 0], sizes = [2, 14, 14, 8], strides = [1, 1, 1, 1]} : vector<2x16x16x8xf32> to vector<2x14x14x8xf32>
    %12 = vector.extract_strided_slice %0 {offsets = [0, 1, 1, 0], sizes = [2, 14, 14, 8], strides = [1, 1, 1, 1]} : vector<2x16x16x8xf32> to vector<2x14x14x8xf32>
    %13 = vector.extract_strided_slice %0 {offsets = [0, 2, 1, 0], sizes = [2, 14, 14, 8], strides = [1, 1, 1, 1]} : vector<2x16x16x8xf32> to vector<2x14x14x8xf32>
    %14 = tpu.concatenate %11, %12, %13 in 3 : vector<2x14x14x8xf32>, vector<2x14x14x8xf32>, vector<2x14x14x8xf32> -> vector<2x14x14x24xf32>
    %15 = vector.shape_cast %14 : vector<2x14x14x24xf32> to vector<392x24xf32>
    %c1 = arith.constant 1 : index
    %c0_7 = arith.constant 0 : index
    %c0_8 = arith.constant 0 : index
    %16 = vector.load %arg2[%c1, %c0_7, %c0_8] : memref<3x24x8xf32, #tpu.memory_space<vmem>>, vector<1x24x8xf32>
    %17 = vector.shape_cast %16 : vector<1x24x8xf32> to vector<24x8xf32>
    %cst_9 = arith.constant dense<0.000000e+00> : vector<392x8xf32>
    %18 = tpu.matmul %15, %17, %cst_9 {dimension_numbers = #tpu.dot_dimension_numbers<[1], [0], [0], [1], [0, 0, 1, 1], [], []>} : vector<392x24xf32>, vector<24x8xf32>, vector<392x8xf32> -> vector<392x8xf32>
    %19 = arith.addf %10, %18 : vector<392x8xf32>
    %20 = vector.extract_strided_slice %0 {offsets = [0, 0, 2, 0], sizes = [2, 14, 14, 8], strides = [1, 1, 1, 1]} : vector<2x16x16x8xf32> to vector<2x14x14x8xf32>
    %21 = vector.extract_strided_slice %0 {offsets = [0, 1, 2, 0], sizes = [2, 14, 14, 8], strides = [1, 1, 1, 1]} : vector<2x16x16x8xf32> to vector<2x14x14x8xf32>
    %22 = vector.extract_strided_slice %0 {offsets = [0, 2, 2, 0], sizes = [2, 14, 14, 8], strides = [1, 1, 1, 1]} : vector<2x16x16x8xf32> to vector<2x14x14x8xf32>
    %23 = tpu.concatenate %20, %21, %22 in 3 : vector<2x14x14x8xf32>, vector<2x14x14x8xf32>, vector<2x14x14x8xf32> -> vector<2x14x14x24xf32>
    %24 = vector.shape_cast %23 : vector<2x14x14x24xf32> to vector<392x24xf32>
    %c2 = arith.constant 2 : index
    %c0_10 = arith.constant 0 : index
    %c0_11 = arith.constant 0 : index
    %25 = vector.load %arg2[%c2, %c0_10, %c0_11] : memref<3x24x8xf32, #tpu.memory_space<vmem>>, vector<1x24x8xf32>
    %26 = vector.shape_cast %25 : vector<1x24x8xf32> to vector<24x8xf32>
    %cst_12 = arith.constant dense<0.000000e+00> : vector<392x8xf32>
    %27 = tpu.matmul %24, %26, %cst_12 {dimension_numbers = #tpu.dot_dimension_numbers<[1], [0], [0], [1], [0, 0, 1, 1], [], []>} : vector<392x24xf32>, vector<24x8xf32>, vector<392x8xf32> -> vector<392x8xf32>
    %28 = arith.addf %19, %27 : vector<392x8xf32>
    %cst_13 = arith.constant dense<0.000000e+00> : vector<8xf32>
    %29 = vector.multi_reduction <add>, %28, %cst_13 [0] : vector<392x8xf32> to vector<8xf32>
    %30 = vector.shape_cast %29 : vector<8xf32> to vector<1x8xf32>
    %cst_14 = arith.constant 0.00255102036 : f32
    %31 = vector.broadcast %cst_14 : f32 to vector<1x8xf32>
    %32 = arith.mulf %30, %31 : vector<1x8xf32>
    %33 = vector.broadcast %32 : vector<1x8xf32> to vector<392x8xf32>
    %34 = arith.subf %28, %33 : vector<392x8xf32>
    %c0_15 = arith.constant 0 : index
    %c0_16 = arith.constant 0 : index
    %c0_17 = arith.constant 0 : index
    %35 = vector.load %arg4[%c0_15, %c0_16, %c0_17] : memref<1x2x8xf32, #tpu.memory_space<vmem>>, vector<1x1x8xf32>
    %36 = vector.shape_cast %35 : vector<1x1x8xf32> to vector<1x8xf32>
    %37 = vector.shape_cast %32 : vector<1x8xf32> to vector<1x1x8xf32>
    tpu.vector_store %arg4[%c0_15, %c0_16, %c0_17], %37 {strides = array<i32>} : memref<1x2x8xf32, #tpu.memory_space<vmem>>, vector<1x1x8xf32>,
    %38 = arith.mulf %34, %34 : vector<392x8xf32>
    %cst_18 = arith.constant dense<0.000000e+00> : vector<8xf32>
    %39 = vector.multi_reduction <add>, %38, %cst_18 [0] : vector<392x8xf32> to vector<8xf32>
    %40 = vector.shape_cast %39 : vector<8xf32> to vector<1x8xf32>
    %c0_19 = arith.constant 0 : index
    %c1_20 = arith.constant 1 : index
    %c0_21 = arith.constant 0 : index
    %41 = vector.load %arg4[%c0_19, %c1_20, %c0_21] : memref<1x2x8xf32, #tpu.memory_space<vmem>>, vector<1x1x8xf32>
    %42 = vector.shape_cast %41 : vector<1x1x8xf32> to vector<1x8xf32>
    %43 = vector.shape_cast %40 : vector<1x8xf32> to vector<1x1x8xf32>
    tpu.vector_store %arg4[%c0_19, %c1_20, %c0_21], %43 {strides = array<i32>} : memref<1x2x8xf32, #tpu.memory_space<vmem>>, vector<1x1x8xf32>,
    %44 = vector.shape_cast %28 : vector<392x8xf32> to vector<2x14x14x8xf32>
    %c0_22 = arith.constant 0 : index
    %c0_23 = arith.constant 0 : index
    %c0_24 = arith.constant 0 : index
    %c0_25 = arith.constant 0 : index
    %45 = vector.load %arg3[%c0_22, %c0_23, %c0_24, %c0_25] : memref<2x14x14x8xf32, #tpu.memory_space<vmem>>, vector<2x14x14x8xf32>
    tpu.vector_store %arg3[%c0_22, %c0_23, %c0_24, %c0_25], %44 {strides = array<i32>} : memref<2x14x14x8xf32, #tpu.memory_space<vmem>>, vector<2x14x14x8xf32>,
    return
  }
  func.func @transform_0(%arg0: i32) -> (i32, i32, i32, i32) {
    %c0_i32 = arith.constant 0 : i32
    %c0_i32_0 = arith.constant 0 : i32
    %c0_i32_1 = arith.constant 0 : i32
    %c0_i32_2 = arith.constant 0 : i32
    return %arg0, %c0_i32, %c0_i32_0, %c0_i32_1 : i32, i32, i32, i32
  }
  func.func @transform_1(%arg0: i32) -> (i32, i32, i32) {
    %c0_i32 = arith.constant 0 : i32
    %c0_i32_0 = arith.constant 0 : i32
    %c0_i32_1 = arith.constant 0 : i32
    %c0_i32_2 = arith.constant 0 : i32
    return %c0_i32, %c0_i32_0, %c0_i32_1 : i32, i32, i32
  }
  func.func @transform_2(%arg0: i32) -> (i32, i32, i32, i32) {
    %c0_i32 = arith.constant 0 : i32
    %c0_i32_0 = arith.constant 0 : i32
    %c0_i32_1 = arith.constant 0 : i32
    %c0_i32_2 = arith.constant 0 : i32
    return %arg0, %c0_i32, %c0_i32_0, %c0_i32_1 : i32, i32, i32, i32
  }
  func.func @transform_3(%arg0: i32) -> (i32, i32, i32) {
    %c0_i32 = arith.constant 0 : i32
    %c0_i32_0 = arith.constant 0 : i32
    %c0_i32_1 = arith.constant 0 : i32
    return %arg0, %c0_i32, %c0_i32_0 : i32, i32, i32
  }
}

</mosaic_0001>

<bundles_post_ra>
// kernel: tpu_custom_call.1
= control target key start
LH: loop header
LB: loop body
LE: loop exit
PB: predicated region body
PF: predicated region fallthrough
CT: control target
= control target key end

     0   :  { %s9289_s16 = smov 8   ;;  %v9290_v4 = vmov 0.0|0.0   ;;  %s9291_s21 = smov 16   ;;  %vm9292_vm0 = vmmov 0   ;;  %v14285_v7 = vmov 0.0   ;;  %s14278_s0 = inlined_call_operand.vmem [shape: f32[2,16,16,8], index: 0, kind: input, shape index: {}]   ;;  %s14279_s1 = inlined_call_operand.vmem [shape: f32[3,24,8], index: 1, kind: input, shape index: {}]   ;;  %s14280_s2 = inlined_call_operand.vmem [shape: f32[2,14,14,8], index: 2, kind: output, shape index: {0}]   ;;  %s14281_s3 = inlined_call_operand.hbm [shape: f32[1,2,8], index: 3, kind: output, shape index: {1}]  }
   0x1   :  { %v9319_v0 = vld [vmem:[%s14278_s0 + $0x18] sm:$0xff]  ;;  %v9324_v1 = vld [vmem:[%s14278_s0 + $0x10] sm:$0xff]  ;;  %v9333_v2 = vld [vmem:[%s14278_s0 + $0x28] sm:$0xff]  ;;  %9061 = vmatprep.subr.bf16.mxu0 %v9290_v4  ;;  %9058 = vmatprep.subr.bf16.mxu1 %v9290_v4 }
   0x2   :  { %136 = vrot.lane.b32.xlu1 %v9319_v0, %s9289_s16  ;;  %134 = vrot.lane.b32.xlu0 %v9324_v1, %s9289_s16  ;;  %v9338_v3 = vld [vmem:[%s14278_s0 + $0x20] sm:$0xff]  ;;  %v9347_v5 = vld [vmem:[%s14278_s0 + $0x30] sm:$0xff] }
   0x3   :  { %v9356_v6 = vld [vmem:[%s14278_s0 + $0x38] sm:$0xff]  ;;  %8758 = vmatprep.mubr.msk.f32.mxu0 %vm9292_vm0, %v14285_v7  ;;  %8605 = vmatprep.mubr.msk.f32.mxu1 %vm9292_vm0, %v14285_v7  ;;  %v9369_v8 = vld [vmem:[%s14278_s0 + $0x40] sm:$0xff]  ;;  %v1569_v10 = vld [vmem:[%s14279_s1 + $0x8] sm:$0xff] }
   0x4   :  { %v1568_v9 = vld [vmem:[%s14279_s1] sm:$0xff]  ;;  %v8276_v12 = vld [vmem:[%s14279_s1 + $0x18] sm:$0xff] }
   0x5   :  { %v9377_v11 = vpack.c.bf16 %v1569_v10, %v1568_v9  ;;  %v8277_v13 = vld [vmem:[%s14279_s1 + $0x20] sm:$0xff] }
   0x6   :  { %308 = vrot.lane.b32.xlu1 %v9333_v2, %s9291_s21  ;;  %306 = vrot.lane.b32.xlu0 %v9338_v3, %s9291_s21  ;;  %v9059_v14 = vpack.c.bf16 %v8277_v13, %v8276_v12 }
   0xa   :  { %138 = vrot.lane.b32.xlu0 %v9338_v3, %s9289_s16  ;;  %310 = vrot.lane.b32.xlu1 %v9347_v5, %s9291_s21 }
   0xe   :  { %140 = vrot.lane.b32.xlu0 %v9333_v2, %s9289_s16  ;;  %312 = vrot.lane.b32.xlu1 %v9356_v6, %s9291_s21 }
   0xf   :  { %9 = vsyncpa [#allocation3], 0  ;;  %v9392_v15 = vld [vmem:[%s14278_s0 + $0x48] sm:$0xff]  ;;  %9063 = vmatpush3.bf16.msra.mxu0 %v9377_v11  ;;  %9060 = vmatpush3.bf16.msra.mxu1 %v9059_v14  ;;  %v9399_v16 = vld [vmem:[%s14279_s1 + $0x10] sm:$0xff]  ;;  %v9294_v40 = vmov 1983009808   ;;  %v648_v42 = vlaneseq }
  0x10   :  { %8756 = vmatprep.subr.mxu0 %v14285_v7  ;;  %8603 = vmatprep.subr.mxu1 %v14285_v7  ;;  %v8278_v17 = vld [vmem:[%s14279_s1 + $0x28] sm:$0xff]  ;;  %v9412_v18 = vld [vmem:[%s14278_s0 + $0x50] sm:$0xff]  ;;  %v9422_v19 = vld [vmem:[%s14278_s0 + $0x58] sm:$0xff]  ;;  %v646_v41 = vunpack.c.l.s4 %v9294_v40  ;;  %vm474_vm1 = vcmask 64512   ;;  %vm531_vm2 = vcmask 130048   ;;  %vm1599_vm3 = vcmask 1040384  }
  0x11   :  { %v9431_v20 = vld [vmem:[%s14278_s0 + $0x60] sm:$0xff]  ;;  %v9440_v21 = vld [vmem:[%s14278_s0 + $0x68] sm:$0xff]  ;;  %v28_v22 = vld [vmem:[%s14278_s0 + $0x70] sm:$0xff]  ;;  %v649_v46 = vshrl.u32 %v648_v42, 7  ;;  %vm1600_vm4 = vcmask 1042434   ;;  %vm1602_vm5 = vcmask 1044484  }
  0x12   :  { %142 = vrot.lane.b32.xlu0 %v9347_v5, %s9289_s16  ;;  %314 = vrot.lane.b32.xlu1 %v9369_v8, %s9291_s21  ;;  %v29_v23 = vld [vmem:[%s14278_s0 + $0x78] sm:$0xff]  ;;  %v30_v24 = vld [vmem:[%s14278_s0 + $0x80] sm:$0xff]  ;;  %v647_v45 = vunpack.c.0.s8 %v646_v41  ;;  %vm1604_vm6 = vcmask 1046534   ;;  %vm3059_vm7 = vcmask 195584   ;;  %vm1601_vm8 = vmor %vm1599_vm3, %vm1600_vm4  ;;  %vm8174_vm11 = vcmask 62464  }
  0x13   :  { %8757 = vmatpush3.msra.mxu0 %v9399_v16  ;;  %8604 = vmatpush3.msra.mxu1 %v8278_v17  ;;  %v31_v25 = vld [vmem:[%s14278_s0 + $0x88] sm:$0xff]  ;;  %v32_v26 = vld [vmem:[%s14278_s0 + $0x90] sm:$0xff]  ;;  %v33_v27 = vld [vmem:[%s14278_s0 + $0x98] sm:$0xff]  ;;  %vm6156_vm12 = vcmask 57344  }
  0x14   :  { %9064 = vmatprep.subr.bf16.mxu0 %v9290_v4  ;;  %9067 = vmatprep.subr.bf16.mxu1 %v9290_v4  ;;  %v34_v28 = vld [vmem:[%s14278_s0 + $0xa0] sm:$0xff]  ;;  %v35_v29 = vld [vmem:[%s14278_s0 + $0xa8] sm:$0xff]  ;;  %v36_v30 = vld [vmem:[%s14278_s0 + $0xb0] sm:$0xff]  ;;  %v9557_v52 = vsub.s32 %v647_v45, %v649_v46 }
  0x15   :  { %v37_v31 = vld [vmem:[%s14278_s0 + $0xb8] sm:$0xff]  ;;  %v38_v32 = vld [vmem:[%s14278_s0 + $0xc0] sm:$0xff]  ;;  %v39_v33 = vld [vmem:[%s14278_s0 + $0xc8] sm:$0xff] }
  0x16   :  { %144 = vrot.lane.b32.xlu0 %v9356_v6, %s9289_s16  ;;  %316 = vrot.lane.b32.xlu1 %v9392_v15, %s9291_s21  ;;  %v40_v34 = vld [vmem:[%s14278_s0 + $0xd0] sm:$0xff]  ;;  %v41_v35 = vld [vmem:[%s14278_s0 + $0xd8] sm:$0xff]  ;;  %vm9669_vm9 = vmor %vm1601_vm8, %vm1602_vm5 }
  0x17   :  { %v42_v36 = vld [vmem:[%s14278_s0 + $0xe0] sm:$0xff]  ;;  %v43_v37 = vld [vmem:[%s14278_s0 + $0xe8] sm:$0xff]  ;;  %v44_v38 = vld [vmem:[%s14278_s0 + $0xf0] sm:$0xff] }
  0x18   :  { %v45_v39 = vld [vmem:[%s14278_s0 + $0xf8] sm:$0xff]  ;;  %v48_v43 = vld [vmem:[%s14278_s0 + $0x110] sm:$0xff]  ;;  %v50_v44 = vld [vmem:[%s14278_s0 + $0x120] sm:$0xff] }
  0x19   :  { %v49_v47 = vld [vmem:[%s14278_s0 + $0x118] sm:$0xff]  ;;  %v51_v48 = vld [vmem:[%s14278_s0 + $0x128] sm:$0xff]  ;;  %v14_v51 = vld [vmem:[%s14278_s0] sm:$0xff] }
  0x1a   :  { %146 = vrot.lane.b32.xlu0 %v9369_v8, %s9289_s16  ;;  %318 = vrot.lane.b32.xlu1 %v9412_v18, %s9291_s21  ;;  %v52_v56 = vld [vmem:[%s14278_s0 + $0x130] sm:$0xff]  ;;  %v15_v57 = vld [vmem:[%s14278_s0 + $0x8] sm:$0xff]  ;;  %vm9703_vm10 = vmor %vm9669_vm9, %vm1604_vm6 }
  0x1b   :  { %v53_v9 = vld [vmem:[%s14278_s0 + $0x138] sm:$0xff]  ;;  %v8377_v40 = vld [vmem:[%s14279_s1 + $0x30] sm:$0xff] }
  0x1c   :  { %v8378_v41 = vld [vmem:[%s14279_s1 + $0x38] sm:$0xff] }
  0x1e   :  { %148 = vrot.lane.b32.xlu0 %v9392_v15, %s9289_s16  ;;  %320 = vrot.lane.b32.xlu1 %v9422_v19, %s9291_s21 }
  0x22   :  { %150 = vrot.lane.b32.xlu0 %v9412_v18, %s9289_s16  ;;  %322 = vrot.lane.b32.xlu1 %v9431_v20, %s9291_s21 }
  0x26   :  { %152 = vrot.lane.b32.xlu0 %v9422_v19, %s9289_s16  ;;  %324 = vrot.lane.b32.xlu1 %v9440_v21, %s9291_s21 }
  0x2a   :  { %154 = vrot.lane.b32.xlu0 %v9431_v20, %s9289_s16  ;;  %326 = vrot.lane.b32.xlu1 %v28_v22, %s9291_s21 }
  0x2e   :  { %156 = vrot.lane.b32.xlu0 %v9440_v21, %s9289_s16  ;;  %328 = vrot.lane.b32.xlu1 %v29_v23, %s9291_s21 }
  0x32   :  { %158 = vrot.lane.b32.xlu0 %v28_v22, %s9289_s16  ;;  %330 = vrot.lane.b32.xlu1 %v30_v24, %s9291_s21 }
  0x36   :  { %160 = vrot.lane.b32.xlu0 %v29_v23, %s9289_s16  ;;  %332 = vrot.lane.b32.xlu1 %v31_v25, %s9291_s21 }
  0x3a   :  { %162 = vrot.lane.b32.xlu0 %v30_v24, %s9289_s16  ;;  %334 = vrot.lane.b32.xlu1 %v32_v26, %s9291_s21 }
  0x3e   :  { %164 = vrot.lane.b32.xlu0 %v31_v25, %s9289_s16  ;;  %336 = vrot.lane.b32.xlu1 %v33_v27, %s9291_s21  ;;  %v54_v25 = vld [vmem:[%s14278_s0 + $0x140] sm:$0xff] }
  0x42   :  { %166 = vrot.lane.b32.xlu0 %v32_v26, %s9289_s16  ;;  %338 = vrot.lane.b32.xlu1 %v34_v28, %s9291_s21 }
  0x46   :  { %168 = vrot.lane.b32.xlu0 %v33_v27, %s9289_s16  ;;  %340 = vrot.lane.b32.xlu1 %v35_v29, %s9291_s21 }
  0x4a   :  { %170 = vrot.lane.b32.xlu0 %v34_v28, %s9289_s16  ;;  %342 = vrot.lane.b32.xlu1 %v36_v30, %s9291_s21 }
  0x4e   :  { %172 = vrot.lane.b32.xlu0 %v35_v29, %s9289_s16  ;;  %344 = vrot.lane.b32.xlu1 %v37_v31, %s9291_s21 }
  0x52   :  { %174 = vrot.lane.b32.xlu0 %v36_v30, %s9289_s16  ;;  %346 = vrot.lane.b32.xlu1 %v38_v32, %s9291_s21 }
  0x56   :  { %176 = vrot.lane.b32.xlu0 %v37_v31, %s9289_s16  ;;  %348 = vrot.lane.b32.xlu1 %v39_v33, %s9291_s21 }
  0x5a   :  { %178 = vrot.lane.b32.xlu0 %v38_v32, %s9289_s16  ;;  %350 = vrot.lane.b32.xlu1 %v40_v34, %s9291_s21 }
  0x5e   :  { %180 = vrot.lane.b32.xlu0 %v39_v33, %s9289_s16  ;;  %352 = vrot.lane.b32.xlu1 %v41_v35, %s9291_s21 }
  0x62   :  { %182 = vrot.lane.b32.xlu0 %v40_v34, %s9289_s16  ;;  %354 = vrot.lane.b32.xlu1 %v42_v36, %s9291_s21 }
  0x66   :  { %184 = vrot.lane.b32.xlu0 %v41_v35, %s9289_s16  ;;  %356 = vrot.lane.b32.xlu1 %v43_v37, %s9291_s21  ;;  %v55_v35 = vld [vmem:[%s14278_s0 + $0x148] sm:$0xff] }
  0x6a   :  { %186 = vrot.lane.b32.xlu0 %v42_v36, %s9289_s16  ;;  %358 = vrot.lane.b32.xlu1 %v44_v38, %s9291_s21 }
  0x6e   :  { %188 = vrot.lane.b32.xlu0 %v43_v37, %s9289_s16  ;;  %360 = vrot.lane.b32.xlu1 %v45_v39, %s9291_s21 }
  0x72   :  { %190 = vrot.lane.b32.xlu0 %v48_v43, %s9289_s16  ;;  %362 = vrot.lane.b32.xlu1 %v50_v44, %s9291_s21 }
  0x74   :  { %v137_v49 = vpop.permute.xlu1 %136  ;;  %v135_v50 = vpop.permute.xlu0 %134 }
  0x75   :  { %v475_v53 = vsel %vm474_vm1, %v14_v51, %v135_v50  ;;  %v476_v61 = vsel %vm474_vm1, %v15_v57, %v137_v49  ;;  %v56_v51 = vld [vmem:[%s14278_s0 + $0x150] sm:$0xff] }
  0x76   :  { %192 = vrot.lane.b32.xlu0 %v49_v47, %s9289_s16  ;;  %364 = vrot.lane.b32.xlu1 %v51_v48, %s9291_s21 }
  0x78   :  { %v309_v54 = vpop.permute.xlu1 %308  ;;  %v307_v55 = vpop.permute.xlu0 %306 }
  0x79   :  { %v532_v58 = vsel %vm531_vm2, %v475_v53, %v307_v55  ;;  %v533_v10 = vsel %vm531_vm2, %v476_v61, %v309_v54  ;;  %v9065_v53 = vpack.c.bf16 %v8378_v41, %v8377_v40 }
  0x7a   :  { %v644_v59 = vcombine.high %v532_v58, %v532_v58  ;;  %v9568_v60 = vrot.slane %v532_v58, %v9557_v52  ;;  %194 = vrot.lane.b32.xlu0 %v50_v44, %s9289_s16  ;;  %366 = vrot.lane.b32.xlu1 %v52_v56, %s9291_s21  ;;  %v9593_v17 = vrot.slane %v533_v10, %v9557_v52 }
  0x7b   :  { %v661_v26 = vcombine.high %v533_v10, %v533_v10 }
  0x7c   :  { %v9574_v62 = vrot.slane %v644_v59, %v9557_v52  ;;  %v139_v63 = vpop.permute.xlu0 %138  ;;  %v311_v4 = vpop.permute.xlu1 %310  ;;  %v9582_v12 = vcombine.high %v9568_v60, %v9568_v60  ;;  %v9611_v30 = vcombine.high %v9593_v17, %v9593_v17 }
  0x7d   :  { %v477_v14 = vsel %vm474_vm1, %v9324_v1, %v139_v63  ;;  %v9625_v36 = vrot.slane %v661_v26, %v9557_v52 }
  0x7e   :  { %196 = vrot.lane.b32.xlu0 %v51_v48, %s9289_s16  ;;  %v9587_v13 = vcombine.high %v9574_v62, %v9574_v62  ;;  %368 = vrot.lane.b32.xlu1 %v53_v9, %s9291_s21  ;;  %v4713_v22 = vcombine.low %v9582_v12, %v9574_v62  ;;  %v534_v27 = vsel %vm531_vm2, %v477_v14, %v311_v4  ;;  %v1608_v42 = vrot.slane %v9582_v12, 7 }
  0x7f   :  { %v3468_v31 = vcombine.low %v9568_v60, %v9582_v12  ;;  %v677_v37 = vcombine.high %v534_v27, %v534_v27  ;;  %v9640_v44 = vrot.slane %v534_v27, %v9557_v52  ;;  %v3485_v48 = vcombine.low %v9593_v17, %v9611_v30  ;;  %v57_v27 = vld [vmem:[%s14278_s0 + $0x158] sm:$0xff] }
  0x80   :  { %v141_v23 = vpop.permute.xlu0 %140  ;;  %v313_v24 = vpop.permute.xlu1 %312  ;;  %v4714_v1 = vcombine.low %v9587_v13, %v9593_v17  ;;  %v3469_v29 = vcombine.low %v9574_v62, %v9587_v13  ;;  %v9616_v32 = vrot.slane %v4713_v22, %v9557_v52  ;;  %v1571_v54 = vcombine.high %v9625_v36, %v9625_v36 }
  0x81   :  { %v478_v28 = vsel %vm474_vm1, %v9319_v0, %v141_v23  ;;  %v3476_v49 = vrot.slane %v3468_v31, %v9557_v52  ;;  %v1611_v55 = vrot.slane %v9574_v62, 7  ;;  %v1610_v59 = vrot.slane %v1608_v42, 2 }
  0x82   :  { %198 = vrot.lane.b32.xlu0 %v52_v56, %s9289_s16  ;;  %370 = vrot.lane.b32.xlu1 %v54_v25, %s9291_s21  ;;  %v9619_v33 = vrot.slane %v4714_v1, %v9557_v52  ;;  %v535_v38 = vsel %vm531_vm2, %v478_v28, %v313_v24  ;;  %v3483_v47 = vrot.slane %v3469_v29, %v9557_v52  ;;  %v1620_v10 = vrot.slane %v9611_v30, 7 }
  0x83   :  { %v9647_v45 = vrot.slane %v535_v38, %v9557_v52  ;;  %v9662_v56 = vrot.slane %v677_v37, %v9557_v52  ;;  %v9677_v61 = vcombine.high %v9640_v44, %v9640_v44  ;;  %v3486_v14 = vcombine.low %v9625_v36, %v9640_v44 }
  0x84   :  { %v143_v34 = vpop.permute.xlu0 %142  ;;  %v315_v0 = vpop.permute.xlu1 %314  ;;  %v3484_v63 = vcombine.low %v3476_v49, %v3483_v47  ;;  %v694_v22 = vcombine.high %v535_v38, %v535_v38  ;;  %v1614_v1 = vrot.slane %v9587_v13, 7  ;;  %v8248_v29 = vrot.slane %v9568_v60, 9 }
  0x85   :  { %v479_v39 = vsel %vm474_vm1, %v9338_v3, %v143_v34  ;;  %v1617_v3 = vrot.slane %v9593_v17, 7  ;;  %v9666_v57 = vcombine.high %v9647_v45, %v9647_v45  ;;  %v9710_v31 = vcombine.high %v9662_v56, %v9662_v56 }
  0x86   :  { %200 = vrot.lane.b32.xlu0 %v53_v9, %s9289_s16  ;;  %v536_v46 = vsel %vm531_vm2, %v479_v39, %v315_v0  ;;  %372 = vrot.lane.b32.xlu1 %v55_v35, %s9291_s21  ;;  %v1613_v0 = vrot.slane %v1611_v55, 2  ;;  %v1630_v37 = vrot.slane %v9677_v61, 7  ;;  %v1612_v38 = vsel %vm9703_vm10, %v1610_v59, %v1611_v55 }
  0x87   :  { %v710_v50 = vcombine.high %v536_v46, %v536_v46  ;;  %v1619_v9 = vrot.slane %v1617_v3, 2  ;;  %v9692_v26 = vrot.slane %v536_v46, %v9557_v52  ;;  %8759 = vmatmul.mubr.msk.f32.vlgmr.msra.gmra.mrb[0].mxu0 %vm3059_vm7, %v3484_v63  ;;  %v1633_v39 = vrot.slane %v9662_v56, 7 }
  0x88   :  { %v145_v4 = vpop.permute.xlu0 %144  ;;  %v317_v23 = vpop.permute.xlu1 %316  ;;  %8761 = vmatprep.mubr.msk.f32.mxu0 %vm9292_vm0, %v14285_v7  ;;  %9066 = vmatpush3.bf16.msra.mxu0 %v9065_v53  ;;  %v3500_v41 = vrot.slane %v3486_v14, %v9557_v52  ;;  %v1639_v46 = vrot.slane %v9647_v45, 7  ;;  %v1616_v47 = vrot.slane %v1614_v1, 2  ;;  %v8379_v53 = vld [vmem:[%s14279_s1 + $0x40] sm:$0xff]  ;;  %v1609_v55 = vsel %vm9703_vm10, %v8248_v29, %v1608_v42 }
  0x89   :  { %v9680_v62 = vrot.slane %v710_v50, %v9557_v52  ;;  %v480_v34 = vsel %vm474_vm1, %v9333_v2, %v145_v4  ;;  %8909 = vmatprep.subr.mxu0 %v14285_v7  ;;  %v9730_v2 = vrot.slane %v694_v22, %v9557_v52  ;;  %v9745_v49 = vsel %vm9703_vm10, %v1619_v9, %v1620_v10  ;;  %v58_v50 = vld [vmem:[%s14278_s0 + $0x160] sm:$0xff] }
  0x8a   :  { %202 = vrot.lane.b32.xlu0 %v54_v25, %s9289_s16  ;;  %374 = vrot.lane.b32.xlu1 %v56_v51, %s9291_s21  ;;  %v3493_v25 = vrot.slane %v3485_v48, %v9557_v52  ;;  %v9722_v60 = vsel %vm531_vm2, %v480_v34, %v317_v23  ;;  %v8249_v58 = vrot.slane %v9640_v44, 9  ;;  %v3503_v59 = vcombine.low %v9710_v31, %v9647_v45 }
  0x8b   :  { %v9714_v13 = vcombine.high %v9680_v62, %v9680_v62  ;;  %v9734_v40 = vrot.slane %v9722_v60, %v9557_v52  ;;  %v9764_v4 = vrot.slane %v1630_v37, 2  ;;  %v1618_v12 = vsel %vm9703_vm10, %v1616_v47, %v1617_v3 }
  0x8c   :  { %v147_v48 = vpop.permute.xlu0 %146  ;;  %8910 = vmatpush3.msra.mxu0 %v8379_v53  ;;  %v3501_v9 = vcombine.low %v3493_v25, %v3500_v41  ;;  %v2226_v42 = vcombine.low %v1609_v55, %v1612_v38  ;;  %v319_v14 = vpop.permute.xlu1 %318  ;;  %v1635_v22 = vrot.slane %v1633_v39, 2  ;;  %v9775_v23 = vcombine.high %v9730_v2, %v9730_v2  ;;  %v59_v38 = vld [vmem:[%s14278_s0 + $0x168] sm:$0xff] }
  0x8d   :  { %14518 = vst [vmem:[#allocation5_spill] sm:$0xff] %v9714_v13  ;;  %14519 = vst [vmem:[#allocation6_spill] sm:$0xff] %v9734_v40  ;;  %v1615_v25 = vsel %vm9703_vm10, %v1613_v0, %v1614_v1  ;;  %v1641_v17 = vrot.slane %v1639_v46, 2  ;;  %v3502_v34 = vcombine.low %v9677_v61, %v9662_v56  ;;  %v481_v1 = vsel %vm474_vm1, %v9347_v5, %v147_v48  ;;  %v60_v61 = vld [vmem:[%s14278_s0 + $0x170] sm:$0xff] }
  0x8e   :  { %204 = vrot.lane.b32.xlu0 %v55_v35, %s9289_s16  ;;  %376 = vrot.lane.b32.xlu1 %v57_v27, %s9291_s21  ;;  %v9741_v35 = vcombine.high %v9692_v26, %v9692_v26  ;;  %v3517_v0 = vrot.slane %v3503_v59, %v9557_v52  ;;  %v1622_v41 = vrot.slane %v1620_v10, 2  ;;  %v1623_v47 = vrot.slane %v9625_v36, 7 }
  0x8f   :  { %8762 = vmatmul.mubr.msk.f32.gmra.mrb[2].mxu0 %vm3059_vm7, %v3501_v9  ;;  %v1642_v53 = vrot.slane %v9666_v57, 7  ;;  %v9800_v55 = vcombine.high %v9734_v40, %v9734_v40  ;;  %v2234_v9 = vrot.slane %v2226_v42, %v9557_v52  ;;  %v1645_v5 = vrot.slane %v9730_v2, 7 }
  0x90   :  { %v3520_v3 = vcombine.low %v9692_v26, %v9741_v35  ;;  %8764 = vmatprep.mubr.msk.f32.mxu0 %vm9292_vm0, %v14285_v7  ;;  %v3510_v48 = vrot.slane %v3502_v34, %v9557_v52  ;;  %v1624_v10 = vsel %vm9703_vm10, %v1622_v41, %v1623_v47  ;;  %v1626_v59 = vrot.slane %v1571_v54, 7  ;;  %v321_v24 = vpop.permute.xlu1 %320 }
  0x91   :  { %14520 = vst [vmem:[#allocation7_spill] sm:$0xff] %v9800_v55  ;;  %v1625_v34 = vrot.slane %v1623_v47, 2  ;;  %v1631_v41 = vsel %vm9703_vm10, %v8249_v58, %v1630_v37  ;;  %v2243_v54 = vcombine.low %v9745_v49, %v1624_v10  ;;  %v1652_v29 = vrot.slane %v9741_v35, 7 }
  0x92   :  { %206 = vrot.lane.b32.xlu0 %v56_v51, %s9289_s16  ;;  %378 = vrot.lane.b32.xlu1 %v58_v50, %s9291_s21  ;;  %v2227_v51 = vcombine.low %v1615_v25, %v1618_v12  ;;  %v149_v25 = vpop.permute.xlu0 %148  ;;  %v3534_v42 = vrot.slane %v3520_v3, %v9557_v52  ;;  %v3518_v43 = vcombine.low %v3510_v48, %v3517_v0  ;;  %v1636_v58 = vrot.slane %v9710_v31, 7 }
  0x93   :  { %v3537_v3 = vcombine.low %v9734_v40, %v9800_v55  ;;  %v1627_v49 = vsel %vm9703_vm10, %v1625_v34, %v1626_v59 }
  0x94   :  { %v2241_v12 = vrot.slane %v2227_v51, %v9557_v52  ;;  %v727_v51 = vcombine.high %v9722_v60, %v9722_v60  ;;  %v482_v60 = vsel %vm474_vm1, %v9356_v6, %v149_v25  ;;  %8765 = vmatmul.mubr.msk.f32.gmra.mrb[4].mxu0 %vm3059_vm7, %v3518_v43  ;;  %v1647_v25 = vrot.slane %v1645_v5, 2 }
  0x95   :  { %v9840_v6 = vsel %vm531_vm2, %v482_v60, %v321_v24  ;;  %8767 = vmatprep.mubr.msk.f32.mxu0 %vm9292_vm0, %v14285_v7  ;;  %v1634_v24 = vsel %vm9703_vm10, %v9764_v4, %v1633_v39  ;;  %v1643_v39 = vsel %vm9703_vm10, %v1641_v17, %v1642_v53  ;;  %v323_v4 = vpop.permute.xlu1 %322  ;;  %v14523_v17 = vrot.slane %v9692_v26, 9 }
  0x96   :  { %208 = vrot.lane.b32.xlu0 %v57_v27, %s9289_s16  ;;  %380 = vrot.lane.b32.xlu1 %v59_v38, %s9291_s21  ;;  %v2242_v63 = vcombine.low %v2234_v9, %v2241_v12  ;;  %v538_v27 = vsel %vm531_vm2, %v481_v1, %v319_v14  ;;  %v3519_v14 = vcombine.low %v9666_v57, %v9730_v2  ;;  %v151_v43 = vpop.permute.xlu0 %150  ;;  %v1638_v12 = vrot.slane %v1636_v58, 2 }
  0x97   :  { %v743_v37 = vcombine.high %v538_v27, %v538_v27  ;;  %v2251_v1 = vrot.slane %v2243_v54, %v9557_v52  ;;  %v9849_v0 = vrot.slane %v9840_v6, %v9557_v52  ;;  %v1637_v9 = vsel %vm9703_vm10, %v1635_v22, %v1636_v58 }
  0x98   :  { %8606 = vmatmul.mubr.msk.f32.vlgmr.msra.gmra.mrb[0].mxu1 %vm3059_vm7, %v2242_v63  ;;  %v2244_v63 = vcombine.low %v1627_v49, %v1631_v41  ;;  %v3527_v47 = vrot.slane %v3519_v14, %v9557_v52  ;;  %v1648_v22 = vrot.slane %v9775_v23, 7  ;;  %v2260_v34 = vcombine.low %v1634_v24, %v1637_v9 }
  0x99   :  { %8608 = vmatprep.mubr.msk.f32.mxu1 %vm9292_vm0, %v14285_v7  ;;  %14521 = vst [vmem:[#allocation8_spill] sm:$0xff] %v9849_v0  ;;  %9069 = vmatpush3.bf16.msra.mxu1 %v9377_v11  ;;  %v9868_v10 = vcombine.high %v9849_v0, %v9849_v0  ;;  %v9878_v11 = vld [vmem:[%s14278_s0 + $0x178] sm:$0xff]  ;;  %v9891_v41 = vrot.slane %v727_v51, %v9557_v52  ;;  %v1654_v14 = vrot.slane %v1652_v29, 2  ;;  %v1655_v51 = vrot.slane %v9680_v62, 7 }
  0x9a   :  { %210 = vrot.lane.b32.xlu0 %v58_v50, %s9289_s16  ;;  %v9844_v50 = vrot.slane %v538_v27, %v9557_v52  ;;  %382 = vrot.lane.b32.xlu1 %v60_v61, %s9291_s21  ;;  %v2258_v48 = vrot.slane %v2244_v63, %v9557_v52  ;;  %v3535_v59 = vcombine.low %v3527_v47, %v3534_v42  ;;  %v153_v58 = vpop.permute.xlu0 %152  ;;  %v9917_v63 = vld [vmem:[%s14278_s0 + $0x180] sm:$0xff]  ;;  %v1644_v47 = vrot.slane %v1642_v53, 2 }
  0x9b   :  { %14522 = vst [vmem:[#allocation9_spill] sm:$0xff] %v9868_v10  ;;  %9068 = vmatprep.subr.mxu1 %v14285_v7  ;;  %v1640_v27 = vsel %vm9703_vm10, %v1638_v12, %v1639_v46  ;;  %v9894_v54 = vrot.slane %v743_v37, %v9557_v52  ;;  %v3536_v37 = vcombine.low %v9680_v62, %v9714_v13  ;;  %v1667_v46 = vrot.slane %v9891_v41, 7 }
  0x9c   :  { %v2259_v60 = vcombine.low %v2251_v1, %v2258_v48  ;;  %v9898_v42 = vcombine.high %v9844_v50, %v9844_v50  ;;  %8768 = vmatmul.mubr.msk.f32.gmra.mrb[6].mxu0 %vm3059_vm7, %v3535_v59  ;;  %v2261_v26 = vcombine.low %v1640_v27, %v1643_v39  ;;  %v3551_v49 = vrot.slane %v3537_v3, %v9557_v52  ;;  %v325_v48 = vpop.permute.xlu1 %324 }
  0x9d   :  { %14524 = vst [vmem:[#allocation10_spill] sm:$0xff] %v9894_v54  ;;  %8770 = vmatprep.mubr.msk.f32.mxu0 %vm9292_vm0, %v14285_v7  ;;  %v2268_v1 = vrot.slane %v2260_v34, %v9557_v52  ;;  %v760_v3 = vcombine.high %v9840_v6, %v9840_v6  ;;  %v3544_v9 = vrot.slane %v3536_v37, %v9557_v52  ;;  %v63_v34 = vld [vmem:[%s14278_s0 + $0x188] sm:$0xff] }
  0x9e   :  { %212 = vrot.lane.b32.xlu0 %v59_v38, %s9289_s16  ;;  %v1653_v38 = vsel %vm9703_vm10, %v14523_v17, %v1652_v29  ;;  %384 = vrot.lane.b32.xlu1 %v9878_v11, %s9291_s21  ;;  %v483_v29 = vsel %vm474_vm1, %v9369_v8, %v151_v43  ;;  %v2275_v8 = vrot.slane %v2261_v26, %v9557_v52  ;;  %v14284_v17 = vrot.slane %v9898_v42, 7 }
  0x9f   :  { %8609 = vmatmul.mubr.msk.f32.gmra.mrb[2].mxu1 %vm3059_vm7, %v2259_v60  ;;  %v540_v43 = vsel %vm531_vm2, %v483_v29, %v323_v4  ;;  %v1649_v12 = vsel %vm9703_vm10, %v1647_v25, %v1648_v22  ;;  %v1646_v53 = vsel %vm9703_vm10, %v1644_v47, %v1645_v5  ;;  %v484_v6 = vsel %vm474_vm1, %v9392_v15, %v153_v58 }
  0xa0   :  { %8611 = vmatprep.mubr.msk.f32.mxu1 %vm9292_vm0, %v14285_v7  ;;  %v776_v24 = vcombine.high %v540_v43, %v540_v43  ;;  %9070 = vmatpush3.msra.mxu1 %v9399_v16  ;;  %v2276_v39 = vcombine.low %v2268_v1, %v2275_v8  ;;  %v1661_v25 = vrot.slane %v9734_v40, 7  ;;  %v3553_v16 = vcombine.low %v9891_v41, %v9844_v50 }
  0xa1   :  { %v3552_v22 = vcombine.low %v3544_v9, %v3551_v49  ;;  %v9951_v5 = vcombine.high %v9894_v54, %v9894_v54  ;;  %v2277_v59 = vcombine.low %v1646_v53, %v1649_v12  ;;  %v9955_v27 = vsel %vm531_vm2, %v484_v6, %v325_v48 }
  0xa2   :  { %214 = vrot.lane.b32.xlu0 %v60_v61, %s9289_s16  ;;  %v1656_v61 = vsel %vm9703_vm10, %v1654_v14, %v1655_v51  ;;  %386 = vrot.lane.b32.xlu1 %v9917_v63, %s9291_s21  ;;  %v9947_v4 = vrot.slane %v776_v24, %v9557_v52  ;;  %v14283_v60 = vrot.slane %v9894_v54, 7  ;;  %v9972_v26 = vrot.slane %v760_v3, %v9557_v52 }
  0xa3   :  { %14526 = vst [vmem:[#allocation12_spill] sm:$0xff] %v9951_v5  ;;  %8612 = vmatmul.mubr.msk.f32.gmra.mrb[4].mxu1 %vm3059_vm7, %v2276_v39  ;;  %v2278_v15 = vcombine.low %v1653_v38, %v1656_v61  ;;  %8771 = vmatmul.mubr.msk.f32.gmra.mrb[8].mxu0 %vm3059_vm7, %v3552_v22  ;;  %v3554_v38 = vcombine.low %v9898_v42, %v9894_v54  ;;  %v1657_v58 = vrot.slane %v1655_v51, 2  ;;  %v1663_v8 = vrot.slane %v1661_v25, 2  ;;  %v64_v61 = vld [vmem:[%s14278_s0 + $0x190] sm:$0xff] }
  0xa4   :  { %14525 = vst [vmem:[#allocation11_spill] sm:$0xff] %v9947_v4  ;;  %v9964_v14 = vcombine.high %v9947_v4, %v9947_v4  ;;  %8614 = vmatprep.mubr.msk.f32.mxu1 %vm9292_vm0, %v14285_v7  ;;  %14528 = vst [vmem:[#allocation14_spill] sm:$0xff] %v9972_v26  ;;  %v2285_v29 = vrot.slane %v2277_v59, %v9557_v52  ;;  %v9978_v49 = vrot.slane %v9955_v27, %v9557_v52 }
  0xa5   :  { %v2292_v37 = vrot.slane %v2278_v15, %v9557_v52  ;;  %8773 = vmatprep.mubr.msk.f32.mxu0 %vm9292_vm0, %v14285_v7  ;;  %v1573_v1 = vcombine.high %v9891_v41, %v9891_v41  ;;  %v14282_v47 = vrot.slane %v9849_v0, 7  ;;  %v1664_v3 = vrot.slane %v9800_v55, 7 }
  0xa6   :  { %14527 = vst [vmem:[#allocation13_spill] sm:$0xff] %v9964_v14  ;;  %14529 = vst [vmem:[#allocation15_spill] sm:$0xff] %v9978_v49  ;;  %216 = vrot.lane.b32.xlu0 %v9878_v11, %s9289_s16  ;;  %388 = vrot.lane.b32.xlu1 %v63_v34, %s9291_s21  ;;  %v8251_v24 = vrot.slane %v9844_v50, 9  ;;  %v9991_v9 = vrot.slane %v540_v43, %v9557_v52  ;;  %v3561_v48 = vrot.slane %v3553_v16, %v9557_v52  ;;  %v155_v11 = vpop.permute.xlu0 %154 }
  0xa7   :  { %v2293_v12 = vcombine.low %v2285_v29, %v2292_v37  ;;  %v3568_v39 = vrot.slane %v3554_v38, %v9557_v52  ;;  %v1658_v53 = vrot.slane %v9714_v13, 7  ;;  %v1676_v6 = vrot.slane %v14284_v17, 2  ;;  %v327_v37 = vpop.permute.xlu1 %326 }
  0xa8   :  { %v10005_v43 = vrot.slane %v14283_v60, 2  ;;  %v10009_v22 = vcombine.high %v9972_v26, %v9972_v26  ;;  %v3570_v16 = vcombine.low %v9951_v5, %v9849_v0  ;;  %v10016_v59 = vrot.slane %v14282_v47, 2 }
  0xa9   :  { %8615 = vmatmul.mubr.msk.f32.gmra.mrb[6].mxu1 %vm3059_vm7, %v2293_v12  ;;  %v3569_v38 = vcombine.low %v3561_v48, %v3568_v39  ;;  %v1660_v29 = vrot.slane %v1658_v53, 2  ;;  %v1666_v51 = vrot.slane %v1664_v3, 2  ;;  %v485_v12 = vsel %vm474_vm1, %v9412_v18, %v155_v11  ;;  %v65_v39 = vld [vmem:[%s14278_s0 + $0x198] sm:$0xff] }
  0xaa   :  { %14530 = vst [vmem:[#allocation16_spill] sm:$0xff] %v10009_v22  ;;  %8617 = vmatprep.mubr.msk.f32.mxu1 %vm9292_vm0, %v14285_v7  ;;  %218 = vrot.lane.b32.xlu0 %v9917_v63, %s9289_s16  ;;  %v3571_v47 = vcombine.low %v9868_v10, %v9972_v26  ;;  %v10031_v60 = vcombine.high %v9991_v9, %v9991_v9 }
  0xab   :  { %390 = vrot.lane.b32.xlu1 %v64_v61, %s9291_s21  ;;  %8774 = vmatmul.mubr.msk.f32.gmra.mrb[10].mxu0 %vm3059_vm7, %v3569_v38  ;;  %v1659_v63 = vsel %vm9703_vm10, %v1657_v58, %v1658_v53  ;;  %v1662_v48 = vsel %vm9703_vm10, %v1660_v29, %v1661_v25  ;;  %v1665_v18 = vsel %vm9703_vm10, %v1663_v8, %v1664_v3  ;;  %v1669_v38 = vrot.slane %v1667_v46, 2  ;;  %v157_v3 = vpop.permute.xlu0 %156 }
  0xac   :  { %14531 = vst [vmem:[#allocation17_spill] sm:$0xff] %v10031_v60  ;;  %v1668_v11 = vsel %vm9703_vm10, %v1666_v51, %v1667_v46  ;;  %v2294_v17 = vcombine.low %v1659_v63, %v1662_v48  ;;  %v542_v15 = vsel %vm531_vm2, %v485_v12, %v327_v37  ;;  %8776 = vmatprep.mubr.msk.f32.mxu0 %vm9292_vm0, %v14285_v7  ;;  %v1670_v8 = vrot.slane %v1573_v1, 7  ;;  %v66_v48 = vld [vmem:[%s14278_s0 + $0x1a0] sm:$0xff] }
  0xad   :  { %v3578_v58 = vrot.slane %v3570_v16, %v9557_v52  ;;  %v2295_v53 = vcombine.low %v1665_v18, %v1668_v11  ;;  %v3585_v25 = vrot.slane %v3571_v47, %v9557_v52  ;;  %v1686_v29 = vrot.slane %v9868_v10, 7 }
  0xae   :  { %220 = vrot.lane.b32.xlu0 %v63_v34, %s9289_s16  ;;  %v14532_v51 = vrot.slane %v9972_v26, 7  ;;  %v1692_v37 = vrot.slane %v10009_v22, 7  ;;  %v2302_v16 = vrot.slane %v2294_v17, %v9557_v52  ;;  %v14533_v1 = vrot.slane %v9898_v42, 7 }
  0xaf   :  { %392 = vrot.lane.b32.xlu1 %v65_v39, %s9291_s21  ;;  %v2309_v47 = vrot.slane %v2295_v53, %v9557_v52  ;;  %v3586_v46 = vcombine.low %v3578_v58, %v3585_v25  ;;  %v14287_v18 = vrot.slane %v10031_v60, 7  ;;  %v3587_v11 = vcombine.low %v9991_v9, %v10031_v60  ;;  %v329_v53 = vpop.permute.xlu1 %328 }
  0xb0   :  { %v1691_v63 = vrot.slane %v14532_v51, 2  ;;  %v1675_v34 = vsel %vm9703_vm10, %v8251_v24, %v14533_v1  ;;  %v793_v17 = vcombine.high %v9955_v27, %v9955_v27  ;;  %v809_v51 = vcombine.high %v542_v15, %v542_v15 }
  0xb1   :  { %v2310_v58 = vcombine.low %v2302_v16, %v2309_v47  ;;  %8777 = vmatmul.mubr.msk.f32.gmra.mrb[12].mxu0 %vm3059_vm7, %v3586_v46  ;;  %v1671_v42 = vsel %vm9703_vm10, %v1669_v38, %v1670_v8  ;;  %v14534_v24 = vrot.slane %v9894_v54, 7  ;;  %v1680_v1 = vrot.slane %v9951_v5, 7  ;;  %v159_v46 = vpop.permute.xlu0 %158 }
  0xb2   :  { %222 = vrot.lane.b32.xlu0 %v64_v61, %s9289_s16  ;;  %v1699_v12 = vrot.slane %v9947_v4, 7  ;;  %v10083_v27 = vcombine.high %v9978_v49, %v9978_v49  ;;  %v2311_v16 = vcombine.low %v1671_v42, %v1675_v34  ;;  %v486_v47 = vsel %vm474_vm1, %v9422_v19, %v157_v3  ;;  %8779 = vmatprep.mubr.msk.f32.mxu0 %vm9292_vm0, %v14285_v7  ;;  %v67_v19 = vld [vmem:[%s14278_s0 + $0x1a8] sm:$0xff] }
  0xb3   :  { %v1678_v25 = vsel %vm9703_vm10, %v1676_v6, %v14534_v24  ;;  %394 = vrot.lane.b32.xlu1 %v66_v48, %s9291_s21  ;;  %8618 = vmatmul.mubr.msk.f32.gmra.mrb[8].mxu1 %vm3059_vm7, %v2310_v58  ;;  %v10092_v6 = vrot.slane %v542_v15, %v9557_v52  ;;  %v1681_v61 = vsel %vm9703_vm10, %v10005_v43, %v1680_v1  ;;  %v1682_v8 = vrot.slane %v1680_v1, 2 }
  0xb4   :  { %14535 = vst [vmem:[#allocation18_spill] sm:$0xff] %v10083_v27  ;;  %v10098_v38 = vsel %vm531_vm2, %v486_v47, %v329_v53  ;;  %8620 = vmatprep.mubr.msk.f32.mxu1 %vm9292_vm0, %v14285_v7  ;;  %v2312_v3 = vcombine.low %v1678_v25, %v1681_v61  ;;  %v1687_v43 = vsel %vm9703_vm10, %v10016_v59, %v1686_v29  ;;  %v1688_v34 = vrot.slane %v1686_v29, 2 }
  0xb5   :  { %v10107_v15 = vrot.slane %v10098_v38, %v9557_v52  ;;  %v10113_v53 = vrot.slane %v793_v17, %v9557_v52  ;;  %v10116_v58 = vrot.slane %v809_v51, %v9557_v52  ;;  %v14538_v42 = vrot.slane %v9849_v0, 7  ;;  %v331_v51 = vpop.permute.xlu1 %330 }
  0xb6   :  { %v3588_v25 = vcombine.low %v9947_v4, %v9964_v14  ;;  %224 = vrot.lane.b32.xlu0 %v65_v39, %s9289_s16  ;;  %v2319_v1 = vrot.slane %v2311_v16, %v9557_v52  ;;  %v2326_v59 = vrot.slane %v2312_v3, %v9557_v52  ;;  %v1693_v17 = vsel %vm9703_vm10, %v1691_v63, %v1692_v37  ;;  %v68_v3 = vld [vmem:[%s14278_s0 + $0x1b0] sm:$0xff] }
  0xb7   :  { %14536 = vst [vmem:[#allocation19_spill] sm:$0xff] %v10107_v15  ;;  %14537 = vst [vmem:[#allocation20_spill] sm:$0xff] %v10116_v58  ;;  %v1684_v24 = vsel %vm9703_vm10, %v1682_v8, %v14538_v42  ;;  %v10129_v29 = vcombine.high %v10107_v15, %v10107_v15  ;;  %396 = vrot.lane.b32.xlu1 %v67_v19, %s9291_s21  ;;  %v14540_v47 = vrot.slane %v9972_v26, 7 }
  0xb8   :  { %v2328_v39 = vcombine.low %v1684_v24, %v1687_v43  ;;  %v3602_v16 = vrot.slane %v3588_v25, %v9557_v52  ;;  %v487_v8 = vsel %vm474_vm1, %v9431_v20, %v159_v46  ;;  %v3595_v63 = vrot.slane %v3587_v11, %v9557_v52  ;;  %v161_v24 = vpop.permute.xlu0 %160 }
  0xb9   :  { %14539 = vst [vmem:[#allocation21_spill] sm:$0xff] %v10129_v29  ;;  %v1690_v61 = vsel %vm9703_vm10, %v1688_v34, %v14540_v47  ;;  %v3604_v37 = vcombine.low %v9978_v49, %v10083_v27  ;;  %v3605_v42 = vcombine.low %v10113_v53, %v10092_v6  ;;  %v2327_v7 = vcombine.low %v2319_v1, %v2326_v59 }
  0xba   :  { %v1698_v43 = vrot.slane %v14287_v18, 2  ;;  %v10153_v34 = vcombine.high %v10092_v6, %v10092_v6  ;;  %v2329_v46 = vcombine.low %v1690_v61, %v1693_v17  ;;  %226 = vrot.lane.b32.xlu0 %v66_v48, %s9289_s16  ;;  %v1701_v11 = vrot.slane %v1699_v12, 2 }
  0xbb   :  { %v10162_v25 = vcombine.high %v10116_v58, %v10116_v58  ;;  %8621 = vmatmul.mubr.msk.f32.gmra.mrb[10].mxu1 %vm3059_vm7, %v2327_v7  ;;  %v3603_v1 = vcombine.low %v3595_v63, %v3602_v16  ;;  %v544_v59 = vsel %vm531_vm2, %v487_v8, %v331_v51  ;;  %398 = vrot.lane.b32.xlu1 %v68_v3, %s9291_s21  ;;  %v14542_v47 = vmov 0.0   ;;  %v69_v7 = vld [vmem:[%s14278_s0 + $0x1b8] sm:$0xff]  ;;  %v333_v63 = vpop.permute.xlu1 %332 }
  0xbc   :  { %v826_v17 = vcombine.high %v10098_v38, %v10098_v38  ;;  %8623 = vmatprep.mubr.msk.f32.mxu1 %vm9292_vm0, %v14542_v47  ;;  %v2336_v48 = vrot.slane %v2328_v39, %v9557_v52  ;;  %v2343_v61 = vrot.slane %v2329_v46, %v9557_v52  ;;  %v842_v20 = vcombine.high %v544_v59, %v544_v59 }
  0xbd   :  { %14541 = vst [vmem:[#allocation22_spill] sm:$0xff] %v10162_v25  ;;  %8780 = vmatmul.mubr.msk.f32.gmra.mrb[14].mxu0 %vm3059_vm7, %v3603_v1  ;;  %v3612_v51 = vrot.slane %v3604_v37, %v9557_v52  ;;  %v3619_v16 = vrot.slane %v3605_v42, %v9557_v52  ;;  %v488_v38 = vsel %vm474_vm1, %v9440_v21, %v161_v24  ;;  %v1702_v8 = vrot.slane %v9964_v14, 7 }
  0xbe   :  { %v1708_v39 = vrot.slane %v10083_v27, 7  ;;  %v2344_v46 = vcombine.low %v2336_v48, %v2343_v61  ;;  %v10184_v18 = vrot.slane %v842_v20, %v9557_v52  ;;  %8782 = vmatprep.mubr.msk.f32.mxu0 %vm9292_vm0, %v14542_v47  ;;  %v1700_v37 = vsel %vm9703_vm10, %v1698_v43, %v1699_v12  ;;  %228 = vrot.lane.b32.xlu0 %v67_v19, %s9289_s16  ;;  %v163_v43 = vpop.permute.xlu0 %162 }
  0xbf   :  { %v1705_v21 = vrot.slane %v9978_v49, 7  ;;  %v3620_v42 = vcombine.low %v3612_v51, %v3619_v16  ;;  %v1704_v24 = vrot.slane %v1702_v8, 2  ;;  %400 = vrot.lane.b32.xlu1 %v69_v7, %s9291_s21  ;;  %v14544_v1 = vrot.slane %v10031_v60, 7  ;;  %v10210_v51 = vld [vmem:[%s14278_s0 + $0x1c0] sm:$0xff] }
  0xc0   :  { %14543 = vst [vmem:[#allocation23_spill] sm:$0xff] %v10184_v18  ;;  %v14545_v20 = vrot.slane %v9991_v9, 9  ;;  %v1575_v61 = vcombine.high %v10113_v53, %v10113_v53  ;;  %v1718_v12 = vrot.slane %v10153_v34, 7  ;;  %v3622_v19 = vcombine.low %v10162_v25, %v10107_v15  ;;  %8624 = vmatmul.mubr.msk.f32.gmra.mrb[12].mxu1 %vm3059_vm7, %v2344_v46 }
  0xc1   :  { %v1721_v9 = vrot.slane %v10116_v58, 7  ;;  %8626 = vmatprep.mubr.msk.f32.mxu1 %vm9292_vm0, %v14542_v47  ;;  %8783 = vmatmul.mubr.msk.f32.gmra.mrb[16].mxu0 %vm3059_vm7, %v3620_v42  ;;  %v1706_v16 = vsel %vm9703_vm10, %v1704_v24, %v1705_v21  ;;  %v10222_v46 = vrot.slane %v826_v17, %v9557_v52  ;;  %v10226_v27 = vcombine.high %v10184_v18, %v10184_v18  ;;  %v335_v24 = vpop.permute.xlu1 %334 }
  0xc2   :  { %v1697_v48 = vsel %vm9703_vm10, %v14545_v20, %v14544_v1  ;;  %v10219_v20 = vsel %vm531_vm2, %v488_v38, %v333_v63  ;;  %v1703_v49 = vsel %vm9703_vm10, %v1701_v11, %v1702_v8  ;;  %8785 = vmatprep.mubr.msk.f32.mxu0 %vm9292_vm0, %v14542_v47  ;;  %v1710_v42 = vrot.slane %v1708_v39, 2  ;;  %230 = vrot.lane.b32.xlu0 %v68_v3, %s9289_s16  ;;  %v165_v4 = vpop.permute.xlu0 %164 }
  0xc3   :  { %v2345_v1 = vcombine.low %v1697_v48, %v1700_v37  ;;  %14546 = vst [vmem:[#allocation24_spill] sm:$0xff] %v10222_v46  ;;  %14547 = vst [vmem:[#allocation25_spill] sm:$0xff] %v10226_v27  ;;  %v10234_v37 = vrot.slane %v544_v59, %v9557_v52  ;;  %v2346_v38 = vcombine.low %v1703_v49, %v1706_v16  ;;  %402 = vrot.lane.b32.xlu1 %v10210_v51, %s9291_s21  ;;  %v10250_v49 = vld [vmem:[%s14278_s0 + $0x1c8] sm:$0xff] }
  0xc4   :  { %v10238_v17 = vrot.slane %v10219_v20, %v9557_v52  ;;  %v3621_v63 = vcombine.low %v10153_v34, %v10116_v58  ;;  %v1707_v11 = vrot.slane %v1705_v21, 2  ;;  %v8253_v8 = vrot.slane %v10092_v6, 9 }
  0xc5   :  { %v3636_v3 = vrot.slane %v3622_v19, %v9557_v52  ;;  %v1711_v59 = vrot.slane %v10113_v53, 7  ;;  %v1720_v48 = vrot.slane %v1718_v12, 2  ;;  %v1727_v16 = vrot.slane %v10107_v15, 7 }
  0xc6   :  { %14548 = vst [vmem:[#allocation26_spill] sm:$0xff] %v10238_v17  ;;  %v2353_v34 = vrot.slane %v2345_v1, %v9557_v52  ;;  %v2360_v58 = vrot.slane %v2346_v38, %v9557_v52  ;;  %v3629_v14 = vrot.slane %v3621_v63, %v9557_v52  ;;  %232 = vrot.lane.b32.xlu0 %v69_v7, %s9289_s16  ;;  %v1723_v10 = vrot.slane %v1721_v9, 2 }
  0xc7   :  { %v1712_v19 = vsel %vm9703_vm10, %v1710_v42, %v1711_v59  ;;  %v1713_v60 = vrot.slane %v1711_v59, 2  ;;  %v10263_v15 = vcombine.high %v10222_v46, %v10222_v46  ;;  %v10267_v1 = vcombine.high %v10234_v37, %v10234_v37  ;;  %404 = vrot.lane.b32.xlu1 %v10250_v49, %s9291_s21 }
  0xc8   :  { %v2361_v38 = vcombine.low %v2353_v34, %v2360_v58  ;;  %v3637_v63 = vcombine.low %v3629_v14, %v3636_v3  ;;  %v1709_v42 = vsel %vm9703_vm10, %v1707_v11, %v1708_v39  ;;  %v1714_v59 = vrot.slane %v1575_v61, 7  ;;  %v9225_v58 = vld [vmem:[%s14278_s0 + $0x78] sm:$0xff]  ;;  %v337_v14 = vpop.permute.xlu1 %336  ;;  %v72_v39 = vld [vmem:[%s14278_s0 + $0x1d0] sm:$0xff] }
  0xc9   :  { %14549 = vst [vmem:[#allocation27_spill] sm:$0xff] %v10263_v15  ;;  %14550 = vst [vmem:[#allocation28_spill] sm:$0xff] %v10267_v1  ;;  %v1719_v7 = vsel %vm9703_vm10, %v8253_v8, %v1718_v12  ;;  %v1729_v21 = vrot.slane %v1727_v16, 2  ;;  %v14299_v0 = vrot.slane %v10129_v29, 7  ;;  %v2362_v26 = vcombine.low %v1709_v42, %v1712_v19  ;;  %v9226_v8 = vld [vmem:[%s14278_s0 + $0x70] sm:$0xff] }
  0xca   :  { %8627 = vmatmul.mubr.msk.f32.gmra.mrb[14].mxu1 %vm3059_vm7, %v2361_v38  ;;  %v490_v34 = vsel %vm474_vm1, %v9225_v58, %v165_v4  ;;  %v14298_v61 = vrot.slane %v10222_v46, 7  ;;  %8786 = vmatmul.mubr.msk.f32.gmra.mrb[18].mxu0 %vm3059_vm7, %v3637_v63  ;;  %v1715_v12 = vsel %vm9703_vm10, %v1713_v60, %v1714_v59  ;;  %v1724_v11 = vrot.slane %v10162_v25, 7 }
  0xcb   :  { %8629 = vmatprep.mubr.msk.f32.mxu1 %vm9292_vm0, %v14542_v47  ;;  %v3639_v4 = vcombine.low %v10234_v37, %v10267_v1  ;;  %v489_v3 = vsel %vm474_vm1, %v9226_v8, %v163_v43  ;;  %v2363_v19 = vcombine.low %v1715_v12, %v1719_v7  ;;  %v1722_v38 = vsel %vm9703_vm10, %v1720_v48, %v1721_v9  ;;  %v167_v8 = vpop.permute.xlu0 %166 }
  0xcc   :  { %8788 = vmatprep.mubr.msk.f32.mxu0 %vm9292_vm0, %v14542_v47  ;;  %v10304_v63 = vcombine.high %v10238_v17, %v10238_v17  ;;  %v2370_v42 = vrot.slane %v2362_v26, %v9557_v52  ;;  %v10308_v59 = vsel %vm531_vm2, %v490_v34, %v337_v14  ;;  %234 = vrot.lane.b32.xlu0 %v10210_v51, %s9289_s16  ;;  %v1726_v48 = vrot.slane %v1724_v11, 2  ;;  %v10323_v26 = vld [vmem:[%s14278_s0 + $0x1d8] sm:$0xff] }
  0xcd   :  { %406 = vrot.lane.b32.xlu1 %v72_v39, %s9291_s21  ;;  %v2377_v43 = vrot.slane %v2363_v19, %v9557_v52  ;;  %v1725_v9 = vsel %vm9703_vm10, %v1723_v10, %v1724_v11  ;;  %v1731_v7 = vsel %vm9703_vm10, %v1729_v21, %v14299_v0  ;;  %v1735_v51 = vrot.slane %v14298_v61, 2 }
  0xce   :  { %14551 = vst [vmem:[#allocation29_spill] sm:$0xff] %v10304_v63  ;;  %v1740_v58 = vrot.slane %v10267_v1, 7  ;;  %v546_v34 = vsel %vm531_vm2, %v489_v3, %v335_v24  ;;  %v2379_v14 = vcombine.low %v1722_v38, %v1725_v9  ;;  %v859_v10 = vcombine.high %v10219_v20, %v10219_v20  ;;  %v339_v38 = vpop.permute.xlu1 %338 }
  0xcf   :  { %v2378_v12 = vcombine.low %v2370_v42, %v2377_v43  ;;  %v1728_v21 = vsel %vm9703_vm10, %v1726_v48, %v1727_v16  ;;  %v10335_v11 = vrot.slane %v10308_v59, %v9557_v52  ;;  %v8254_v19 = vrot.slane %v10234_v37, 9  ;;  %v9227_v43 = vld [vmem:[%s14278_s0 + $0x80] sm:$0xff] }
  0xd0   :  { %v3653_v61 = vrot.slane %v3639_v4, %v9557_v52  ;;  %v3656_v24 = vcombine.low %v10238_v17, %v10304_v63  ;;  %v2380_v3 = vcombine.low %v1728_v21, %v1731_v7  ;;  %236 = vrot.lane.b32.xlu0 %v10250_v49, %s9289_s16  ;;  %v875_v20 = vcombine.high %v546_v34, %v546_v34  ;;  %v74_v7 = vld [vmem:[%s14278_s0 + $0x1e0] sm:$0xff] }
  0xd1   :  { %14552 = vst [vmem:[#allocation30_spill] sm:$0xff] %v10335_v11  ;;  %408 = vrot.lane.b32.xlu1 %v10323_v26, %s9291_s21  ;;  %8630 = vmatmul.mubr.msk.f32.gmra.mrb[16].mxu1 %vm3059_vm7, %v2378_v12  ;;  %v10347_v16 = vrot.slane %v546_v34, %v9557_v52  ;;  %v2387_v37 = vrot.slane %v2379_v14, %v9557_v52  ;;  %v1742_v14 = vrot.slane %v1740_v58, 2  ;;  %v1743_v12 = vrot.slane %v10184_v18, 7 }
  0xd2   :  { %v10352_v4 = vcombine.high %v10335_v11, %v10335_v11  ;;  %8632 = vmatprep.mubr.msk.f32.mxu1 %vm9292_vm0, %v14542_v47  ;;  %v2394_v49 = vrot.slane %v2380_v3, %v9557_v52  ;;  %v3638_v42 = vcombine.low %v10129_v29, %v10222_v46  ;;  %v491_v9 = vsel %vm474_vm1, %v9227_v43, %v167_v8 }
  0xd3   :  { %v3655_v48 = vcombine.low %v10184_v18, %v10226_v27  ;;  %v1741_v34 = vsel %vm9703_vm10, %v8254_v19, %v1740_v58  ;;  %v10372_v21 = vrot.slane %v859_v10, %v9557_v52  ;;  %v548_v60 = vsel %vm531_vm2, %v491_v9, %v339_v38 }
  0xd4   :  { %14553 = vst [vmem:[#allocation31_spill] sm:$0xff] %v10352_v4  ;;  %v2395_v3 = vcombine.low %v2387_v37, %v2394_v49  ;;  %v3646_v43 = vrot.slane %v3638_v42, %v9557_v52  ;;  %238 = vrot.lane.b32.xlu0 %v72_v39, %s9289_s16  ;;  %v10381_v19 = vrot.slane %v875_v20, %v9557_v52  ;;  %v169_v37 = vpop.permute.xlu0 %168  ;;  %v14555_v42 = vrot.slane %v10129_v29, 7 }
  0xd5   :  { %v10385_v58 = vcombine.high %v10347_v16, %v10347_v16  ;;  %v908_v10 = vcombine.high %v548_v60, %v548_v60  ;;  %410 = vrot.lane.b32.xlu1 %v74_v7, %s9291_s21  ;;  %v3663_v38 = vrot.slane %v3655_v48, %v9557_v52  ;;  %v3670_v39 = vrot.slane %v3656_v24, %v9557_v52  ;;  %v341_v48 = vpop.permute.xlu1 %340  ;;  %v10407_v24 = vld [vmem:[%s14278_s0 + $0x1e8] sm:$0xff] }
  0xd6   :  { %14554 = vst [vmem:[#allocation32_spill] sm:$0xff] %v10381_v19  ;;  %8633 = vmatmul.mubr.msk.f32.gmra.mrb[18].mxu1 %vm3059_vm7, %v2395_v3  ;;  %v3654_v49 = vcombine.low %v3646_v43, %v3653_v61  ;;  %v1732_v9 = vrot.slane %v14555_v42, 2  ;;  %v1745_v20 = vrot.slane %v1743_v12, 2  ;;  %v892_v8 = vcombine.high %v10308_v59, %v10308_v59 }
  0xd7   :  { %v10396_v0 = vrot.slane %v908_v10, %v9557_v52  ;;  %8635 = vmatprep.mubr.msk.f32.mxu1 %vm9292_vm0, %v14542_v47  ;;  %v14557_v3 = vrot.slane %v10263_v15, 7  ;;  %v3671_v59 = vcombine.low %v3663_v38, %v3670_v39  ;;  %v14558_v43 = vrot.slane %v10222_v46, 7 }
  0xd8   :  { %8789 = vmatmul.mubr.msk.f32.gmra.mrb[20].mxu0 %vm3059_vm7, %v3654_v49  ;;  %v1744_v42 = vsel %vm9703_vm10, %v1742_v14, %v1743_v12  ;;  %v14559_v49 = vrot.slane %v10238_v17, 7  ;;  %240 = vrot.lane.b32.xlu0 %v10323_v26, %s9289_s16  ;;  %v1746_v39 = vrot.slane %v10226_v27, 7  ;;  %v171_v46 = vpop.permute.xlu0 %170  ;;  %v14565_v15 = vrot.slane %v10381_v19, 7 }
  0xd9   :  { %14556 = vst [vmem:[#allocation33_spill] sm:$0xff] %v10396_v0  ;;  %v1737_v61 = vsel %vm9703_vm10, %v1735_v51, %v14557_v3  ;;  %v1734_v10 = vsel %vm9703_vm10, %v1732_v9, %v14558_v43  ;;  %v9228_v51 = vld [vmem:[%s14278_s0 + $0x88] sm:$0xff]  ;;  %v3672_v9 = vcombine.low %v10372_v21, %v10347_v16  ;;  %8791 = vmatprep.mubr.msk.f32.mxu0 %vm9292_vm0, %v14542_v47  ;;  %v14572_v22 = vrot.slane %v10385_v58, 7 }
  0xda   :  { %v492_v3 = vsel %vm474_vm1, %v9228_v51, %v169_v37  ;;  %v1751_v38 = vrot.slane %v14559_v49, 2  ;;  %v2396_v14 = vcombine.low %v1734_v10, %v1737_v61  ;;  %v2397_v12 = vcombine.low %v1741_v34, %v1744_v42  ;;  %412 = vrot.lane.b32.xlu1 %v10407_v24, %s9291_s21  ;;  %v76_v34 = vld [vmem:[%s14278_s0 + $0x1f0] sm:$0xff] }
  0xdb   :  { %v10432_v37 = vsel %vm531_vm2, %v492_v3, %v341_v48  ;;  %v3673_v43 = vcombine.low %v10385_v58, %v10381_v19  ;;  %v1752_v51 = vrot.slane %v10304_v63, 7  ;;  %v10441_v49 = vcombine.high %v10381_v19, %v10381_v19 }
  0xdc   :  { %v10446_v26 = vcombine.high %v10396_v0, %v10396_v0  ;;  %v10452_v61 = vrot.slane %v892_v8, %v9557_v52  ;;  %8792 = vmatmul.mubr.msk.f32.gmra.mrb[22].mxu0 %vm3059_vm7, %v3671_v59  ;;  %v2404_v48 = vrot.slane %v2396_v14, %v9557_v52  ;;  %v2411_v10 = vrot.slane %v2397_v12, %v9557_v52  ;;  %v173_v25 = vpop.permute.xlu0 %172 }
  0xdd   :  { %14560 = vst [vmem:[#allocation34_spill] sm:$0xff] %v10441_v49  ;;  %v10459_v42 = vrot.slane %v10432_v37, %v9557_v52  ;;  %v8255_v3 = vrot.slane %v10347_v16, 9  ;;  %8794 = vmatprep.mubr.msk.f32.mxu0 %vm9292_vm0, %v14542_v47  ;;  %v3680_v1 = vrot.slane %v3672_v9, %v9557_v52  ;;  %v3687_v8 = vrot.slane %v3673_v43, %v9557_v52 }
  0xde   :  { %14561 = vst [vmem:[#allocation35_spill] sm:$0xff] %v10446_v26  ;;  %14562 = vst [vmem:[#allocation36_spill] sm:$0xff] %v10452_v61  ;;  %242 = vrot.lane.b32.xlu0 %v74_v7, %s9289_s16  ;;  %v14564_v59 = vrot.slane %v10385_v58, 7  ;;  %v10472_v63 = vrot.slane %v548_v60, %v9557_v52  ;;  %v2412_v18 = vcombine.low %v2404_v48, %v2411_v10  ;;  %414 = vrot.lane.b32.xlu1 %v76_v34, %s9291_s21  ;;  %v343_v48 = vpop.permute.xlu1 %342 }
  0xdf   :  { %14563 = vst [vmem:[#allocation37_spill] sm:$0xff] %v10459_v42  ;;  %v3689_v9 = vcombine.low %v10441_v49, %v10335_v11  ;;  %v3688_v27 = vcombine.low %v3680_v1, %v3687_v8  ;;  %v1748_v7 = vrot.slane %v1746_v39, 2  ;;  %v10483_v12 = vcombine.high %v10452_v61, %v10452_v61  ;;  %v77_v1 = vld [vmem:[%s14278_s0 + $0x1f8] sm:$0xff] }
  0xe0   :  { %v1764_v14 = vrot.slane %v14564_v59, 2  ;;  %v1767_v59 = vrot.slane %v14565_v15, 2  ;;  %8636 = vmatmul.mubr.msk.f32.gmra.mrb[20].mxu1 %vm3059_vm7, %v2412_v18  ;;  %v1747_v34 = vsel %vm9703_vm10, %v1745_v20, %v1746_v39  ;;  %v14567_v15 = vrot.slane %v10238_v17, 7  ;;  %v9229_v20 = vld [vmem:[%s14278_s0 + $0x90] sm:$0xff] }
  0xe1   :  { %14566 = vst [vmem:[#allocation38_spill] sm:$0xff] %v10483_v12  ;;  %8638 = vmatprep.mubr.msk.f32.mxu1 %vm9292_vm0, %v14542_v47  ;;  %8795 = vmatmul.mubr.msk.f32.gmra.mrb[24].mxu0 %vm3059_vm7, %v3688_v27  ;;  %v1754_v8 = vrot.slane %v1752_v51, 2  ;;  %v1755_v18 = vrot.slane %v10372_v21, 7  ;;  %v493_v39 = vsel %vm474_vm1, %v9229_v20, %v171_v46  ;;  %v10506_v43 = vcombine.high %v10472_v63, %v10472_v63 }
  0xe2   :  { %v1750_v10 = vsel %vm9703_vm10, %v1748_v7, %v14567_v15  ;;  %v1753_v27 = vsel %vm9703_vm10, %v1751_v38, %v1752_v51  ;;  %8797 = vmatprep.mubr.msk.f32.mxu0 %vm9292_vm0, %v14542_v47  ;;  %v3690_v7 = vcombine.low %v10352_v4, %v10452_v61  ;;  %v14569_v15 = vrot.slane %v10335_v11, 7  ;;  %244 = vrot.lane.b32.xlu0 %v10407_v24, %s9289_s16 }
  0xe3   :  { %14568 = vst [vmem:[#allocation39_spill] sm:$0xff] %v10506_v43  ;;  %v2413_v60 = vcombine.low %v1747_v34, %v1750_v10  ;;  %v1756_v46 = vsel %vm9703_vm10, %v1754_v8, %v1755_v18  ;;  %v550_v20 = vsel %vm531_vm2, %v493_v39, %v343_v48  ;;  %v3697_v29 = vrot.slane %v3689_v9, %v9557_v52 }
  0xe4   :  { %v1773_v17 = vrot.slane %v14569_v15, 2  ;;  %416 = vrot.lane.b32.xlu1 %v77_v1, %s9291_s21  ;;  %v2414_v38 = vcombine.low %v1753_v27, %v1756_v46  ;;  %v3704_v51 = vrot.slane %v3690_v7, %v9557_v52  ;;  %v1757_v34 = vrot.slane %v1755_v18, 2 }
  0xe5   :  { %v14570_v10 = vcombine.high %v10372_v21, %v10372_v21  ;;  %v1774_v8 = vrot.slane %v10352_v4, 7  ;;  %v14571_v48 = vrot.slane %v10452_v61, 7  ;;  %v1780_v9 = vrot.slane %v10483_v12, 7  ;;  %v345_v12 = vpop.permute.xlu1 %344 }
  0xe6   :  { %v14312_v1 = vrot.slane %v10506_v43, 7  ;;  %v2421_v27 = vrot.slane %v2413_v60, %v9557_v52  ;;  %v2428_v18 = vrot.slane %v2414_v38, %v9557_v52  ;;  %v3705_v7 = vcombine.low %v3697_v29, %v3704_v51  ;;  %v9230_v51 = vld [vmem:[%s14278_s0 + $0x98] sm:$0xff] }
  0xe7   :  { %v1758_v15 = vrot.slane %v14570_v10, 7  ;;  %v1779_v39 = vrot.slane %v14571_v48, 2  ;;  %v925_v10 = vcombine.high %v10432_v37, %v10432_v37  ;;  %v941_v4 = vcombine.high %v550_v20, %v550_v20 }
  0xe8   :  { %v1763_v48 = vsel %vm9703_vm10, %v8255_v3, %v14572_v22  ;;  %v2429_v24 = vcombine.low %v2421_v27, %v2428_v18  ;;  %8798 = vmatmul.mubr.msk.f32.gmra.mrb[26].mxu0 %vm3059_vm7, %v3705_v7  ;;  %v14573_v29 = vrot.slane %v10381_v19, 7  ;;  %v1768_v37 = vrot.slane %v10441_v49, 7  ;;  %v175_v7 = vpop.permute.xlu0 %174 }
  0xe9   :  { %v1759_v60 = vsel %vm9703_vm10, %v1757_v34, %v1758_v15  ;;  %v3706_v58 = vcombine.low %v10472_v63, %v10506_v43  ;;  %v10554_v22 = vcombine.high %v10459_v42, %v10459_v42  ;;  %v494_v34 = vsel %vm474_vm1, %v9230_v51, %v173_v25  ;;  %8800 = vmatprep.mubr.msk.f32.mxu0 %vm9292_vm0, %v14542_v47 }
  0xea   :  { %v1766_v38 = vsel %vm9703_vm10, %v1764_v14, %v14573_v29  ;;  %v2430_v3 = vcombine.low %v1759_v60, %v1763_v48  ;;  %8639 = vmatmul.mubr.msk.f32.gmra.mrb[22].mxu1 %vm3059_vm7, %v2429_v24  ;;  %v10564_v14 = vrot.slane %v550_v20, %v9557_v52  ;;  %v1769_v15 = vsel %vm9703_vm10, %v1767_v59, %v1768_v37 }
  0xeb   :  { %14574 = vst [vmem:[#allocation40_spill] sm:$0xff] %v10554_v22  ;;  %v10569_v27 = vsel %vm531_vm2, %v494_v34, %v345_v12  ;;  %v1770_v18 = vrot.slane %v1768_v37, 2  ;;  %8641 = vmatprep.mubr.msk.f32.mxu1 %vm9292_vm0, %v14542_v47  ;;  %v2431_v25 = vcombine.low %v1766_v38, %v1769_v15  ;;  %v1775_v20 = vsel %vm9703_vm10, %v1773_v17, %v1774_v8 }
  0xec   :  { %v10575_v48 = vrot.slane %v10569_v27, %v9557_v52  ;;  %v1776_v24 = vrot.slane %v1774_v8, 2  ;;  %v10580_v60 = vrot.slane %v925_v10, %v9557_v52  ;;  %v10583_v12 = vrot.slane %v941_v4, %v9557_v52  ;;  %v347_v8 = vpop.permute.xlu1 %346 }
  0xed   :  { %v14577_v59 = vrot.slane %v10335_v11, 7  ;;  %v3707_v38 = vcombine.low %v10396_v0, %v10446_v26  ;;  %v2438_v37 = vrot.slane %v2430_v3, %v9557_v52  ;;  %v2445_v51 = vrot.slane %v2431_v25, %v9557_v52  ;;  %v9231_v3 = vld [vmem:[%s14278_s0 + $0xa0] sm:$0xff] }
  0xee   :  { %14575 = vst [vmem:[#allocation41_spill] sm:$0xff] %v10575_v48  ;;  %14576 = vst [vmem:[#allocation42_spill] sm:$0xff] %v10583_v12  ;;  %v10595_v17 = vcombine.high %v10575_v48, %v10575_v48  ;;  %v1781_v4 = vsel %vm9703_vm10, %v1779_v39, %v1780_v9  ;;  %v14579_v10 = vrot.slane %v10452_v61, 7  ;;  %v495_v25 = vsel %vm474_vm1, %v9231_v3, %v175_v7  ;;  %v177_v7 = vpop.permute.xlu0 %176 }
  0xef   :  { %v1772_v29 = vsel %vm9703_vm10, %v1770_v18, %v14577_v59  ;;  %v3721_v18 = vrot.slane %v3707_v38, %v9557_v52  ;;  %v3714_v59 = vrot.slane %v3706_v58, %v9557_v52  ;;  %v3723_v39 = vcombine.low %v10459_v42, %v10554_v22 }
  0xf0   :  { %14578 = vst [vmem:[#allocation43_spill] sm:$0xff] %v10595_v17  ;;  %v1778_v34 = vsel %vm9703_vm10, %v1776_v24, %v14579_v10  ;;  %v2447_v15 = vcombine.low %v1772_v29, %v1775_v20  ;;  %v3724_v9 = vcombine.low %v10580_v60, %v10564_v14  ;;  %v2446_v46 = vcombine.low %v2438_v37, %v2445_v51 }
  0xf1   :  { %v1786_v20 = vrot.slane %v14312_v1, 2  ;;  %v14580_v24 = vrot.slane %v10396_v0, 7  ;;  %v2448_v10 = vcombine.low %v1778_v34, %v1781_v4  ;;  %v10622_v3 = vcombine.high %v10564_v14, %v10564_v14 }
  0xf2   :  { %8642 = vmatmul.mubr.msk.f32.gmra.mrb[24].mxu1 %vm3059_vm7, %v2446_v46  ;;  %v3722_v37 = vcombine.low %v3714_v59, %v3721_v18  ;;  %v552_v51 = vsel %vm531_vm2, %v495_v25, %v347_v8  ;;  %v10628_v1 = vcombine.high %v10583_v12, %v10583_v12  ;;  %v2455_v4 = vrot.slane %v2447_v15, %v9557_v52  ;;  %v349_v25 = vpop.permute.xlu1 %348 }
  0xf3   :  { %v1789_v29 = vrot.slane %v14580_v24, 2  ;;  %8644 = vmatprep.mubr.msk.f32.mxu1 %vm9292_vm0, %v14542_v47  ;;  %v2462_v34 = vrot.slane %v2448_v10, %v9557_v52  ;;  %v974_v24 = vcombine.high %v552_v51, %v552_v51  ;;  %v958_v38 = vcombine.high %v10569_v27, %v10569_v27  ;;  %v9232_v27 = vld [vmem:[%s14278_s0 + $0xa8] sm:$0xff] }
  0xf4   :  { %14581 = vst [vmem:[#allocation44_spill] sm:$0xff] %v10628_v1  ;;  %8801 = vmatmul.mubr.msk.f32.gmra.mrb[28].mxu0 %vm3059_vm7, %v3722_v37  ;;  %v3731_v46 = vrot.slane %v3723_v39, %v9557_v52  ;;  %v3738_v8 = vrot.slane %v3724_v9, %v9557_v52  ;;  %v1790_v18 = vrot.slane %v10446_v26, 7  ;;  %v496_v15 = vsel %vm474_vm1, %v9232_v27, %v177_v7 }
  0xf5   :  { %v2463_v59 = vcombine.low %v2455_v4, %v2462_v34  ;;  %v10641_v58 = vrot.slane %v974_v24, %v9557_v52  ;;  %8803 = vmatprep.mubr.msk.f32.mxu0 %vm9292_vm0, %v14542_v47  ;;  %v14583_v39 = vrot.slane %v10396_v0, 7  ;;  %v1793_v10 = vrot.slane %v10459_v42, 7 }
  0xf6   :  { %v3739_v37 = vcombine.low %v3731_v46, %v3738_v8  ;;  %v1792_v4 = vrot.slane %v1790_v18, 2  ;;  %v14584_v34 = vrot.slane %v10506_v43, 7  ;;  %v14585_v24 = vrot.slane %v10472_v63, 9 }
  0xf7   :  { %14582 = vst [vmem:[#allocation45_spill] sm:$0xff] %v10641_v58  ;;  %v1788_v9 = vsel %vm9703_vm10, %v1786_v20, %v14583_v39  ;;  %v1579_v11 = vcombine.high %v10580_v60, %v10580_v60  ;;  %v1806_v7 = vrot.slane %v10622_v3, 7  ;;  %v3741_v27 = vcombine.low %v10628_v1, %v10575_v48  ;;  %8645 = vmatmul.mubr.msk.f32.gmra.mrb[26].mxu1 %vm3059_vm7, %v2463_v59  ;;  %v179_v20 = vpop.permute.xlu0 %178 }
  0xf8   :  { %v1785_v26 = vsel %vm9703_vm10, %v14585_v24, %v14584_v34  ;;  %v1809_v46 = vrot.slane %v10583_v12, 7  ;;  %8647 = vmatprep.mubr.msk.f32.mxu1 %vm9292_vm0, %v14542_v47  ;;  %8804 = vmatmul.mubr.msk.f32.gmra.mrb[30].mxu0 %vm3059_vm7, %v3739_v37  ;;  %v1794_v63 = vsel %vm9703_vm10, %v1792_v4, %v1793_v10  ;;  %v10673_v39 = vsel %vm531_vm2, %v496_v15, %v349_v25 }
  0xf9   :  { %v2464_v8 = vcombine.low %v1785_v26, %v1788_v9  ;;  %v10676_v34 = vrot.slane %v958_v38, %v9557_v52  ;;  %v10680_v59 = vcombine.high %v10641_v58, %v10641_v58  ;;  %v1791_v24 = vsel %vm9703_vm10, %v1789_v29, %v1790_v18  ;;  %8806 = vmatprep.mubr.msk.f32.mxu0 %vm9292_vm0, %v14542_v47  ;;  %v351_v9 = vpop.permute.xlu1 %350 }
  0xfa   :  { %v14588_v37 = vrot.slane %v10554_v22, 7  ;;  %v10689_v26 = vrot.slane %v552_v51, %v9557_v52  ;;  %v2465_v25 = vcombine.low %v1791_v24, %v1794_v63  ;;  %v10693_v38 = vrot.slane %v10673_v39, %v9557_v52 }
  0xfb   :  { %14586 = vst [vmem:[#allocation46_spill] sm:$0xff] %v10676_v34  ;;  %14587 = vst [vmem:[#allocation47_spill] sm:$0xff] %v10680_v59  ;;  %v3740_v15 = vcombine.low %v10622_v3, %v10583_v12  ;;  %v1795_v42 = vrot.slane %v1793_v10, 2  ;;  %v8257_v29 = vrot.slane %v10564_v14, 9  ;;  %v3755_v18 = vrot.slane %v3741_v27, %v9557_v52  ;;  %v181_v61 = vpop.permute.xlu0 %180 }
  0xfc   :  { %v1798_v4 = vrot.slane %v14588_v37, 2  ;;  %14589 = vst [vmem:[#allocation48_spill] sm:$0xff] %v10693_v38  ;;  %v1799_v43 = vrot.slane %v10580_v60, 7  ;;  %v1808_v37 = vrot.slane %v1806_v7, 2  ;;  %v1815_v51 = vrot.slane %v10575_v48, 7 }
  0xfd   :  { %v2472_v63 = vrot.slane %v2464_v8, %v9557_v52  ;;  %v2479_v24 = vrot.slane %v2465_v25, %v9557_v52  ;;  %v3748_v3 = vrot.slane %v3740_v15, %v9557_v52  ;;  %v1811_v27 = vrot.slane %v1809_v46, 2 }
  0xfe   :  { %v1800_v10 = vsel %vm9703_vm10, %v1798_v4, %v1799_v43  ;;  %v1801_v12 = vrot.slane %v1799_v43, 2  ;;  %v10710_v19 = vcombine.high %v10676_v34, %v10676_v34  ;;  %v10714_v8 = vcombine.high %v10689_v26, %v10689_v26 }
  0xff   :  { %v2480_v25 = vcombine.low %v2472_v63, %v2479_v24  ;;  %v3756_v48 = vcombine.low %v3748_v3, %v3755_v18  ;;  %v14592_v0 = vrot.slane %v10554_v22, 7  ;;  %v1802_v49 = vrot.slane %v1579_v11, 7  ;;  %v9233_v63 = vld [vmem:[%s14278_s0 + $0xb8] sm:$0xff]  ;;  %v353_v24 = vpop.permute.xlu1 %352 }
 0x100   :  { %14590 = vst [vmem:[#allocation49_spill] sm:$0xff] %v10710_v19  ;;  %14591 = vst [vmem:[#allocation50_spill] sm:$0xff] %v10714_v8  ;;  %v1807_v43 = vsel %vm9703_vm10, %v8257_v29, %v1806_v7  ;;  %v1817_v4 = vrot.slane %v1815_v51, 2  ;;  %v14326_v54 = vrot.slane %v10595_v17, 7  ;;  %v498_v18 = vsel %vm474_vm1, %v9233_v63, %v181_v61  ;;  %v9234_v7 = vld [vmem:[%s14278_s0 + $0xb0] sm:$0xff] }
 0x101   :  { %v1797_v15 = vsel %vm9703_vm10, %v1795_v42, %v14592_v0  ;;  %8648 = vmatmul.mubr.msk.f32.gmra.mrb[28].mxu1 %vm3059_vm7, %v2480_v25  ;;  %v14325_v3 = vrot.slane %v10676_v34, 7  ;;  %8807 = vmatmul.mubr.msk.f32.gmra.mrb[32].mxu0 %vm3059_vm7, %v3756_v48  ;;  %v1803_v0 = vsel %vm9703_vm10, %v1801_v12, %v1802_v49  ;;  %v1812_v11 = vrot.slane %v10628_v1, 7 }
 0x102   :  { %v2481_v5 = vcombine.low %v1797_v15, %v1800_v10  ;;  %8650 = vmatprep.mubr.msk.f32.mxu1 %vm9292_vm0, %v14542_v47  ;;  %v1824_v42 = vrot.slane %v10710_v19, 7  ;;  %v497_v61 = vsel %vm474_vm1, %v9234_v7, %v179_v20  ;;  %v2482_v29 = vcombine.low %v1803_v0, %v1807_v43  ;;  %8809 = vmatprep.mubr.msk.f32.mxu0 %vm9292_vm0, %v14542_v47 }
 0x103   :  { %v1810_v10 = vsel %vm9703_vm10, %v1808_v37, %v1809_v46  ;;  %v3758_v49 = vcombine.low %v10689_v26, %v10714_v8  ;;  %v10748_v48 = vcombine.high %v10693_v38, %v10693_v38  ;;  %v10752_v25 = vsel %vm531_vm2, %v498_v18, %v353_v24 }
 0x104   :  { %v2489_v12 = vrot.slane %v2481_v5, %v9557_v52  ;;  %v2496_v20 = vrot.slane %v2482_v29, %v9557_v52  ;;  %v1813_v46 = vsel %vm9703_vm10, %v1811_v27, %v1812_v11  ;;  %v1814_v37 = vrot.slane %v1812_v11, 2 }
 0x105   :  { %14593 = vst [vmem:[#allocation51_spill] sm:$0xff] %v10748_v48  ;;  %v1819_v15 = vsel %vm9703_vm10, %v1817_v4, %v14326_v54  ;;  %v1823_v43 = vrot.slane %v14325_v3, 2  ;;  %v1828_v63 = vrot.slane %v10714_v8, 7  ;;  %v554_v5 = vsel %vm531_vm2, %v497_v61, %v351_v9  ;;  %v183_v4 = vpop.permute.xlu0 %182 }
 0x106   :  { %v2498_v18 = vcombine.low %v1810_v10, %v1813_v46  ;;  %v991_v24 = vcombine.high %v10673_v39, %v10673_v39  ;;  %v2497_v0 = vcombine.low %v2489_v12, %v2496_v20  ;;  %v1816_v27 = vsel %vm9703_vm10, %v1814_v37, %v1815_v51  ;;  %v355_v20 = vpop.permute.xlu1 %354  ;;  %v9235_v46 = vld [vmem:[%s14278_s0 + $0xc0] sm:$0xff] }
 0x107   :  { %v10771_v11 = vrot.slane %v10752_v25, %v9557_v52  ;;  %v8258_v7 = vrot.slane %v10689_v26, 9  ;;  %v3772_v29 = vrot.slane %v3758_v49, %v9557_v52  ;;  %v3775_v9 = vcombine.low %v10693_v38, %v10748_v48 }
 0x108   :  { %v2499_v61 = vcombine.low %v1816_v27, %v1819_v15  ;;  %8651 = vmatmul.mubr.msk.f32.gmra.mrb[30].mxu1 %vm3059_vm7, %v2497_v0  ;;  %v1007_v39 = vcombine.high %v554_v5, %v554_v5  ;;  %v10779_v10 = vrot.slane %v554_v5, %v9557_v52  ;;  %v2506_v51 = vrot.slane %v2498_v18, %v9557_v52 }
 0x109   :  { %14594 = vst [vmem:[#allocation52_spill] sm:$0xff] %v10771_v11  ;;  %v10784_v12 = vcombine.high %v10771_v11, %v10771_v11  ;;  %8653 = vmatprep.mubr.msk.f32.mxu1 %vm9292_vm0, %v14542_v47  ;;  %v3757_v49 = vcombine.low %v10595_v17, %v10676_v34  ;;  %v499_v37 = vsel %vm474_vm1, %v9235_v46, %v183_v4  ;;  %v1830_v18 = vrot.slane %v1828_v63, 2 }
 0x10a   :  { %v2513_v26 = vrot.slane %v2499_v61, %v9557_v52  ;;  %v3774_v15 = vcombine.low %v10641_v58, %v10680_v59  ;;  %v1829_v5 = vsel %vm9703_vm10, %v8258_v7, %v1828_v63  ;;  %v1831_v0 = vrot.slane %v10641_v58, 7 }
 0x10b   :  { %14595 = vst [vmem:[#allocation53_spill] sm:$0xff] %v10784_v12  ;;  %v10801_v27 = vrot.slane %v991_v24, %v9557_v52  ;;  %v3765_v54 = vrot.slane %v3757_v49, %v9557_v52  ;;  %v556_v4 = vsel %vm531_vm2, %v499_v37, %v355_v20  ;;  %v10809_v8 = vrot.slane %v1007_v39, %v9557_v52  ;;  %v185_v24 = vpop.permute.xlu0 %184 }
 0x10c   :  { %v2514_v61 = vcombine.low %v2506_v51, %v2513_v26  ;;  %v10813_v63 = vcombine.high %v10779_v10, %v10779_v10  ;;  %v1040_v7 = vcombine.high %v556_v4, %v556_v4  ;;  %v3782_v26 = vrot.slane %v3774_v15, %v9557_v52 }
 0x10d   :  { %14596 = vst [vmem:[#allocation54_spill] sm:$0xff] %v10801_v27  ;;  %14597 = vst [vmem:[#allocation55_spill] sm:$0xff] %v10809_v8  ;;  %v3773_v51 = vcombine.low %v3765_v54, %v3772_v29  ;;  %v3789_v49 = vrot.slane %v3775_v9, %v9557_v52  ;;  %v14598_v20 = vrot.slane %v10595_v17, 7  ;;  %v1833_v3 = vrot.slane %v1831_v0, 2  ;;  %v357_v29 = vpop.permute.xlu1 %356 }
 0x10e   :  { %8654 = vmatmul.mubr.msk.f32.gmra.mrb[32].mxu1 %vm3059_vm7, %v2514_v61  ;;  %v1024_v39 = vcombine.high %v10752_v25, %v10752_v25  ;;  %v10823_v46 = vrot.slane %v1040_v7, %v9557_v52  ;;  %v1825_v54 = vsel %vm9703_vm10, %v1823_v43, %v1824_v42  ;;  %v14600_v15 = vrot.slane %v10676_v34, 7  ;;  %v9236_v7 = vld [vmem:[%s14278_s0 + $0xc8] sm:$0xff] }
 0x10f   :  { %v1820_v37 = vrot.slane %v14598_v20, 2  ;;  %8656 = vmatprep.mubr.msk.f32.mxu1 %vm9292_vm0, %v14542_v47  ;;  %8810 = vmatmul.mubr.msk.f32.gmra.mrb[34].mxu0 %vm3059_vm7, %v3773_v51  ;;  %v3790_v9 = vcombine.low %v3782_v26, %v3789_v49  ;;  %v1832_v25 = vsel %vm9703_vm10, %v1830_v18, %v1831_v0  ;;  %v500_v20 = vsel %vm474_vm1, %v9236_v7, %v185_v24  ;;  %v187_v34 = vpop.permute.xlu0 %186 }
 0x110   :  { %14599 = vst [vmem:[#allocation56_spill] sm:$0xff] %v10823_v46  ;;  %v1581_v42 = vcombine.high %v10801_v27, %v10801_v27  ;;  %v14601_v43 = vrot.slane %v10693_v38, 7  ;;  %v3791_v49 = vcombine.low %v10801_v27, %v10779_v10  ;;  %8812 = vmatprep.mubr.msk.f32.mxu0 %vm9292_vm0, %v14542_v47  ;;  %v2516_v0 = vcombine.low %v1829_v5, %v1832_v25 }
 0x111   :  { %v1822_v61 = vsel %vm9703_vm10, %v1820_v37, %v14600_v15  ;;  %v10850_v37 = vsel %vm531_vm2, %v500_v20, %v357_v29  ;;  %v3792_v24 = vcombine.low %v10813_v63, %v10809_v8  ;;  %v1840_v15 = vrot.slane %v10748_v48, 7 }
 0x112   :  { %v1839_v51 = vrot.slane %v14601_v43, 2  ;;  %v2515_v18 = vcombine.low %v1822_v61, %v1825_v54  ;;  %v10857_v7 = vcombine.high %v10809_v8, %v10809_v8  ;;  %v10860_v43 = vrot.slane %v1024_v39, %v9557_v52 }
 0x113   :  { %v10864_v26 = vcombine.high %v10823_v46, %v10823_v46  ;;  %v10867_v5 = vrot.slane %v556_v4, %v9557_v52  ;;  %8813 = vmatmul.mubr.msk.f32.gmra.mrb[36].mxu0 %vm3059_vm7, %v3790_v9  ;;  %v2530_v29 = vrot.slane %v2516_v0, %v9557_v52  ;;  %v10874_v61 = vrot.slane %v10850_v37, %v9557_v52 }
 0x114   :  { %14602 = vst [vmem:[#allocation57_spill] sm:$0xff] %v10860_v43  ;;  %v2523_v54 = vrot.slane %v2515_v18, %v9557_v52  ;;  %v8259_v39 = vrot.slane %v10779_v10, 9  ;;  %8815 = vmatprep.mubr.msk.f32.mxu0 %vm9292_vm0, %v14542_v47  ;;  %v3799_v25 = vrot.slane %v3791_v49, %v9557_v52  ;;  %v3806_v4 = vrot.slane %v3792_v24, %v9557_v52 }
 0x115   :  { %14603 = vst [vmem:[#allocation58_spill] sm:$0xff] %v10864_v26  ;;  %14604 = vst [vmem:[#allocation59_spill] sm:$0xff] %v10874_v61  ;;  %v1834_v20 = vrot.slane %v10680_v59, 7  ;;  %v14605_v9 = vrot.slane %v10813_v63, 7  ;;  %v1853_v0 = vrot.slane %v10809_v8, 7  ;;  %v14338_v48 = vrot.slane %v10771_v11, 7 }
 0x116   :  { %v2531_v58 = vcombine.low %v2523_v54, %v2530_v29  ;;  %v3808_v19 = vcombine.low %v10857_v7, %v10771_v11  ;;  %v3807_v49 = vcombine.low %v3799_v25, %v3806_v4  ;;  %v10892_v24 = vcombine.high %v10860_v43, %v10860_v43  ;;  %v359_v29 = vpop.permute.xlu1 %358 }
 0x117   :  { %v1852_v18 = vrot.slane %v14605_v9, 2  ;;  %v1836_v1 = vrot.slane %v1834_v20, 2  ;;  %v10897_v8 = vcombine.high %v10867_v5, %v10867_v5  ;;  %v1835_v54 = vsel %vm9703_vm10, %v1833_v3, %v1834_v20 }
 0x118   :  { %8657 = vmatmul.mubr.msk.f32.gmra.mrb[34].mxu1 %vm3059_vm7, %v2531_v58  ;;  %8816 = vmatmul.mubr.msk.f32.gmra.mrb[38].mxu0 %vm3059_vm7, %v3807_v49  ;;  %v14607_v25 = vrot.slane %v10693_v38, 7  ;;  %v1842_v17 = vrot.slane %v1840_v15, 2  ;;  %v1843_v9 = vrot.slane %v10801_v27, 7  ;;  %v9237_v58 = vld [vmem:[%s14278_s0 + $0xd0] sm:$0xff]  ;;  %v1855_v20 = vrot.slane %v1853_v0, 2 }
 0x119   :  { %14606 = vst [vmem:[#allocation60_spill] sm:$0xff] %v10897_v8  ;;  %8659 = vmatprep.mubr.msk.f32.mxu1 %vm9292_vm0, %v14542_v47  ;;  %v501_v3 = vsel %vm474_vm1, %v9237_v58, %v187_v34  ;;  %v1861_v59 = vrot.slane %v14338_v48, 2  ;;  %8818 = vmatprep.mubr.msk.f32.mxu0 %vm9292_vm0, %v14542_v47  ;;  %v1841_v49 = vsel %vm9703_vm10, %v1839_v51, %v1840_v15  ;;  %v1862_v40 = vrot.slane %v10784_v12, 7  ;;  %v189_v15 = vpop.permute.xlu0 %188 }
 0x11a   :  { %v1838_v4 = vsel %vm9703_vm10, %v1836_v1, %v14607_v25  ;;  %v3809_v1 = vcombine.low %v10784_v12, %v10860_v43  ;;  %v1844_v25 = vsel %vm9703_vm10, %v1842_v17, %v1843_v9  ;;  %v558_v38 = vsel %vm531_vm2, %v501_v3, %v359_v29 }
 0x11b   :  { %v2532_v22 = vcombine.low %v1835_v54, %v1838_v4  ;;  %v3816_v34 = vrot.slane %v3808_v19, %v9557_v52  ;;  %v2533_v58 = vcombine.low %v1841_v49, %v1844_v25  ;;  %v1845_v54 = vrot.slane %v1843_v9, 2  ;;  %v361_v25 = vpop.permute.xlu1 %360 }
 0x11c   :  { %v3823_v48 = vrot.slane %v3809_v1, %v9557_v52  ;;  %v1846_v4 = vrot.slane %v1581_v42, 7  ;;  %v14608_v13 = vrot.slane %v10860_v43, 7  ;;  %v1868_v27 = vrot.slane %v10892_v24, 7 }
 0x11d   :  { %v2540_v29 = vrot.slane %v2532_v22, %v9557_v52  ;;  %v2547_v19 = vrot.slane %v2533_v58, %v9557_v52  ;;  %v3825_v42 = vcombine.low %v10867_v5, %v10897_v8  ;;  %v1057_v9 = vcombine.high %v10850_v37, %v10850_v37 }
 0x11e   :  { %v1867_v55 = vrot.slane %v14608_v13, 2  ;;  %v3824_v3 = vcombine.low %v3816_v34, %v3823_v48  ;;  %v1073_v1 = vcombine.high %v558_v38, %v558_v38  ;;  %v14609_v13 = vrot.slane %v10813_v63, 7 }
 0x11f   :  { %v2548_v51 = vcombine.low %v2540_v29, %v2547_v19  ;;  %v1847_v22 = vsel %vm9703_vm10, %v1845_v54, %v1846_v4  ;;  %v1854_v48 = vsel %vm9703_vm10, %v1852_v18, %v1853_v0  ;;  %v1856_v34 = vrot.slane %v10857_v7, 7  ;;  %v9238_v29 = vld [vmem:[%s14278_s0 + $0xd8] sm:$0xff] }
 0x120   :  { %v1851_v49 = vsel %vm9703_vm10, %v8259_v39, %v14609_v13  ;;  %8819 = vmatmul.mubr.msk.f32.gmra.mrb[40].mxu0 %vm3059_vm7, %v3824_v3  ;;  %v14610_v37 = vrot.slane %v10897_v8, 7  ;;  %v10953_v63 = vcombine.high %v10874_v61, %v10874_v61  ;;  %v502_v19 = vsel %vm474_vm1, %v9238_v29, %v189_v15  ;;  %v191_v13 = vpop.permute.xlu0 %190 }
 0x121   :  { %v2549_v39 = vcombine.low %v1847_v22, %v1851_v49  ;;  %8821 = vmatprep.mubr.msk.f32.mxu0 %vm9292_vm0, %v14542_v47  ;;  %8660 = vmatmul.mubr.msk.f32.gmra.mrb[36].mxu1 %vm3059_vm7, %v2548_v51  ;;  %v10963_v18 = vrot.slane %v558_v38, %v9557_v52  ;;  %v1857_v0 = vsel %vm9703_vm10, %v1855_v20, %v1856_v34  ;;  %v1858_v4 = vrot.slane %v1856_v34, 2  ;;  %v46_v20 = vld [vmem:[%s14278_s0 + $0x100] sm:$0xff] }
 0x122   :  { %v1874_v58 = vrot.slane %v14610_v37, 2  ;;  %14611 = vst [vmem:[#allocation61_spill] sm:$0xff] %v10953_v63  ;;  %v10968_v54 = vsel %vm531_vm2, %v502_v19, %v361_v25  ;;  %8662 = vmatprep.mubr.msk.f32.mxu1 %vm9292_vm0, %v14542_v47  ;;  %v2550_v3 = vcombine.low %v1854_v48, %v1857_v0  ;;  %v1863_v51 = vsel %vm9703_vm10, %v1861_v59, %v1862_v40 }
 0x123   :  { %v10974_v15 = vrot.slane %v10968_v54, %v9557_v52  ;;  %v1864_v38 = vrot.slane %v1862_v40, 2  ;;  %v10982_v49 = vrot.slane %v1057_v9, %v9557_v52  ;;  %v10985_v25 = vrot.slane %v1073_v1, %v9557_v52 }
 0x124   :  { %v14614_v22 = vrot.slane %v10771_v11, 7  ;;  %v3826_v59 = vcombine.low %v10823_v46, %v10864_v26  ;;  %v2557_v40 = vrot.slane %v2549_v39, %v9557_v52  ;;  %v2564_v34 = vrot.slane %v2550_v3, %v9557_v52  ;;  %v363_v39 = vpop.permute.xlu1 %362 }
 0x125   :  { %14612 = vst [vmem:[#allocation62_spill] sm:$0xff] %v10974_v15  ;;  %14613 = vst [vmem:[#allocation63_spill] sm:$0xff] %v10985_v25  ;;  %v10997_v37 = vcombine.high %v10974_v15, %v10974_v15  ;;  %v1869_v9 = vsel %vm9703_vm10, %v1867_v55, %v1868_v27  ;;  %v14615_v1 = vrot.slane %v10860_v43, 7  ;;  %v3833_v3 = vrot.slane %v3825_v42, %v9557_v52 }
 0x126   :  { %v1860_v48 = vsel %vm9703_vm10, %v1858_v4, %v14614_v22  ;;  %v3840_v0 = vrot.slane %v3826_v59, %v9557_v52  ;;  %v503_v4 = vsel %vm474_vm1, %v46_v20, %v191_v13  ;;  %v3842_v22 = vcombine.low %v10874_v61, %v10953_v63 }
 0x127   :  { %v1866_v29 = vsel %vm9703_vm10, %v1864_v38, %v14615_v1  ;;  %v2566_v19 = vcombine.low %v1860_v48, %v1863_v51  ;;  %v3843_v17 = vcombine.low %v10982_v49, %v10963_v18  ;;  %v2565_v55 = vcombine.low %v2557_v40, %v2564_v34  ;;  %v193_v34 = vpop.permute.xlu0 %192 }
 0x128   :  { %v8260_v27 = vrot.slane %v10867_v5, 9  ;;  %v11015_v38 = vcombine.high %v10963_v18, %v10963_v18  ;;  %v2567_v20 = vcombine.low %v1866_v29, %v1869_v9  ;;  %v14616_v13 = vrot.slane %v10823_v46, 7  ;;  %v47_v5 = vld [vmem:[%s14278_s0 + $0x108] sm:$0xff] }
 0x129   :  { %v1881_v48 = vrot.slane %v10874_v61, 7  ;;  %8663 = vmatmul.mubr.msk.f32.gmra.mrb[38].mxu1 %vm3059_vm7, %v2565_v55  ;;  %v3841_v59 = vcombine.low %v3833_v3, %v3840_v0  ;;  %v560_v40 = vsel %vm531_vm2, %v503_v4, %v363_v39  ;;  %v11029_v1 = vcombine.high %v10985_v25, %v10985_v25 }
 0x12a   :  { %v1877_v42 = vrot.slane %v14616_v13, 2  ;;  %8665 = vmatprep.mubr.msk.f32.mxu1 %vm9292_vm0, %v14542_v47  ;;  %v2574_v9 = vrot.slane %v2566_v19, %v9557_v52  ;;  %v2581_v29 = vrot.slane %v2567_v20, %v9557_v52  ;;  %v1106_v55 = vcombine.high %v560_v40, %v560_v40  ;;  %v365_v20 = vpop.permute.xlu1 %364 }
 0x12b   :  { %8822 = vmatmul.mubr.msk.f32.gmra.mrb[42].mxu0 %vm3059_vm7, %v3841_v59  ;;  %v3850_v0 = vrot.slane %v3842_v22, %v9557_v52  ;;  %v3857_v4 = vrot.slane %v3843_v17, %v9557_v52  ;;  %v14617_v39 = vmov %v14616_v13  ;;  %v1878_v13 = vrot.slane %v10864_v26, 7 }
 0x12c   :  { %v1876_v3 = vsel %vm9703_vm10, %v1874_v58, %v14617_v39  ;;  %v1894_v51 = vrot.slane %v11015_v38, 7  ;;  %v2582_v61 = vcombine.low %v2574_v9, %v2581_v29  ;;  %v11045_v19 = vrot.slane %v1106_v55, %v9557_v52  ;;  %8824 = vmatprep.mubr.msk.f32.mxu0 %vm9292_vm0, %v14542_v47 }
 0x12d   :  { %v504_v22 = vsel %vm474_vm1, %v47_v5, %v193_v34  ;;  %v14618_v17 = vrot.slane %v10897_v8, 7  ;;  %v1897_v58 = vrot.slane %v10985_v25, 7  ;;  %v3858_v39 = vcombine.low %v3850_v0, %v3857_v4 }
 0x12e   :  { %v1880_v26 = vrot.slane %v1878_v13, 2  ;;  %v1583_v9 = vcombine.high %v10982_v49, %v10982_v49  ;;  %v1884_v29 = vrot.slane %v10953_v63, 7  ;;  %v3860_v55 = vcombine.low %v11029_v1, %v10974_v15  ;;  %8666 = vmatmul.mubr.msk.f32.gmra.mrb[40].mxu1 %vm3059_vm7, %v2582_v61 }
 0x12f   :  { %v1873_v59 = vsel %vm9703_vm10, %v8260_v27, %v14618_v17  ;;  %v11063_v34 = vcombine.high %v11045_v19, %v11045_v19  ;;  %8668 = vmatprep.mubr.msk.f32.mxu1 %vm9292_vm0, %v14542_v47  ;;  %8825 = vmatmul.mubr.msk.f32.gmra.mrb[44].mxu0 %vm3059_vm7, %v3858_v39  ;;  %v11071_v0 = vsel %vm531_vm2, %v504_v22, %v365_v20  ;;  %v1883_v4 = vrot.slane %v1881_v48, 2 }
 0x130   :  { %v2583_v5 = vcombine.low %v1873_v59, %v1876_v3  ;;  %v1882_v27 = vsel %vm9703_vm10, %v1880_v26, %v1881_v48  ;;  %v8261_v17 = vrot.slane %v10963_v18, 9  ;;  %v1896_v61 = vrot.slane %v1894_v51, 2  ;;  %8827 = vmatprep.mubr.msk.f32.mxu0 %vm9292_vm0, %v14542_v47 }
 0x131   :  { %v1879_v3 = vsel %vm9703_vm10, %v1877_v42, %v1878_v13  ;;  %v1899_v59 = vrot.slane %v1897_v58, 2  ;;  %v1903_v63 = vrot.slane %v10974_v15, 7  ;;  %v11081_v26 = vrot.slane %v11071_v0, %v9557_v52 }
 0x132   :  { %v2584_v39 = vcombine.low %v1879_v3, %v1882_v27  ;;  %v1090_v48 = vcombine.high %v10968_v54, %v10968_v54  ;;  %v3859_v22 = vcombine.low %v11015_v38, %v10985_v25  ;;  %v3874_v20 = vrot.slane %v3860_v55, %v9557_v52 }
 0x133   :  { %v1886_v42 = vrot.slane %v1884_v29, 2  ;;  %v3893_v13 = vcombine.low %v11045_v19, %v11063_v34  ;;  %v2591_v8 = vrot.slane %v2583_v5, %v9557_v52  ;;  %v11094_v3 = vcombine.high %v11081_v26, %v11081_v26 }
 0x134   :  { %v2598_v27 = vrot.slane %v2584_v39, %v9557_v52  ;;  %v11097_v15 = vrot.slane %v560_v40, %v9557_v52  ;;  %v3867_v38 = vrot.slane %v3859_v22, %v9557_v52  ;;  %v1887_v55 = vrot.slane %v10982_v49, 7 }
 0x135   :  { %v1905_v25 = vrot.slane %v1903_v63, 2  ;;  %v1906_v46 = vrot.slane %v10997_v37, 7  ;;  %v3894_v39 = vcombine.low %v11081_v26, %v11094_v3  ;;  %v1885_v11 = vsel %vm9703_vm10, %v1883_v4, %v1884_v29 }
 0x136   :  { %v2599_v5 = vcombine.low %v2591_v8, %v2598_v27  ;;  %v3875_v12 = vcombine.low %v3867_v38, %v3874_v20  ;;  %v1888_v40 = vsel %vm9703_vm10, %v1886_v42, %v1887_v55  ;;  %v1889_v43 = vrot.slane %v1887_v55, 2  ;;  %v195_v55 = vpop.permute.xlu0 %194 }
 0x137   :  { %v11111_v54 = vrot.slane %v3893_v13, %v9557_v52  ;;  %v11115_v22 = vrot.slane %v3894_v39, %v9557_v52  ;;  %v1890_v8 = vrot.slane %v1583_v9, 7  ;;  %v1895_v27 = vsel %vm9703_vm10, %v8261_v17, %v1894_v51 }
 0x138   :  { %8669 = vmatmul.mubr.msk.f32.gmra.mrb[42].mxu1 %vm3059_vm7, %v2599_v5  ;;  %v11121_v20 = vcombine.high %v11097_v15, %v11097_v15  ;;  %8828 = vmatmul.mubr.msk.f32.gmra.mrb[46].mxu0 %vm3059_vm7, %v3875_v12  ;;  %v2600_v29 = vcombine.low %v1885_v11, %v1888_v40  ;;  %v1900_v4 = vrot.slane %v11029_v1, 7  ;;  %v11128_v42 = vrot.slane %v1090_v48, %v9557_v52 }
 0x139   :  { %14619 = vst [vmem:[#allocation64_spill] sm:$0xff] %v11111_v54  ;;  %14620 = vst [vmem:[#allocation65_spill] sm:$0xff] %v11115_v22  ;;  %8671 = vmatprep.mubr.msk.f32.mxu1 %vm9292_vm0, %v14542_v47  ;;  %v1891_v51 = vsel %vm9703_vm10, %v1889_v43, %v1890_v8  ;;  %v1898_v17 = vsel %vm9703_vm10, %v1896_v61, %v1897_v58  ;;  %8830 = vmatprep.mubr.msk.f32.mxu0 %vm9292_vm0, %v14542_v47 }
 0x13a   :  { %v2601_v13 = vcombine.low %v1891_v51, %v1895_v27  ;;  %v1901_v11 = vsel %vm9703_vm10, %v1899_v59, %v1900_v4  ;;  %v1902_v12 = vrot.slane %v1900_v4, 2  ;;  %v1907_v48 = vsel %vm9703_vm10, %v1905_v25, %v1906_v46  ;;  %v9239_v27 = vld [vmem:[%s14278_s0 + $0x110] sm:$0xff]  ;;  %v367_v4 = vpop.permute.xlu1 %366 }
 0x13b   :  { %v3877_v38 = vcombine.low %v11097_v15, %v11121_v20  ;;  %v2608_v43 = vrot.slane %v2600_v29, %v9557_v52  ;;  %v2617_v58 = vcombine.low %v1898_v17, %v1901_v11  ;;  %v11148_v61 = vcombine.high %v11128_v42, %v11128_v42 }
 0x13c   :  { %v2615_v5 = vrot.slane %v2601_v13, %v9557_v52  ;;  %v1909_v39 = vrot.slane %v11128_v42, 7  ;;  %v1916_v59 = vrot.slane %v11121_v20, 7  ;;  %v1904_v25 = vsel %vm9703_vm10, %v1902_v12, %v1903_v63 }
 0x13d   :  { %v2618_v8 = vcombine.low %v1904_v25, %v1907_v48  ;;  %v505_v29 = vsel %vm474_vm1, %v9239_v27, %v195_v55  ;;  %v3876_v51 = vcombine.low %v10997_v37, %v11128_v42  ;;  %v3891_v17 = vrot.slane %v3877_v38, %v9557_v52 }
 0x13e   :  { %v2616_v40 = vcombine.low %v2608_v43, %v2615_v5  ;;  %v2625_v13 = vrot.slane %v2617_v58, %v9557_v52  ;;  %v1908_v11 = vrot.slane %v1906_v46, 2  ;;  %v1911_v12 = vrot.slane %v1909_v39, 2  ;;  %v197_v5 = vpop.permute.xlu0 %196 }
 0x13f   :  { %v2632_v63 = vrot.slane %v2618_v8, %v9557_v52  ;;  %v1912_v48 = vrot.slane %v11148_v61, 7  ;;  %v1918_v43 = vrot.slane %v1916_v59, 2  ;;  %v562_v55 = vsel %vm531_vm2, %v505_v29, %v367_v4 }
 0x140   :  { %8672 = vmatmul.mubr.msk.f32.gmra.mrb[44].mxu1 %vm3059_vm7, %v2616_v40  ;;  %v3884_v38 = vrot.slane %v3876_v51, %v9557_v52  ;;  %v1919_v40 = vrot.slane %v11045_v19, 7  ;;  %v1910_v58 = vsel %vm9703_vm10, %v1908_v11, %v1909_v39  ;;  %v8380_v46 = vcombine.high %v9625_v36, %v9640_v44  ;;  %v9240_v51 = vld [vmem:[%s14278_s0 + $0x118] sm:$0xff] }
 0x141   :  { %8674 = vmatprep.mubr.msk.f32.mxu1 %vm9292_vm0, %v14542_v47  ;;  %v2633_v25 = vcombine.low %v2625_v13, %v2632_v63  ;;  %v8262_v8 = vrot.slane %v11097_v15, 9  ;;  %v1123_v27 = vcombine.high %v11071_v0, %v11071_v0  ;;  %v11179_v4 = vrot.slane %v562_v55, %v9557_v52  ;;  %v369_v13 = vpop.permute.xlu1 %368 }
 0x142   :  { %v3892_v29 = vcombine.low %v3884_v38, %v3891_v17  ;;  %v506_v39 = vsel %vm474_vm1, %v9240_v51, %v197_v5  ;;  %v1913_v44 = vsel %vm9703_vm10, %v1911_v12, %v1912_v48  ;;  %v1920_v15 = vsel %vm9703_vm10, %v1918_v43, %v1919_v40  ;;  %v199_v43 = vpop.permute.xlu0 %198 }
 0x143   :  { %v1917_v0 = vsel %vm9703_vm10, %v8262_v8, %v1916_v59  ;;  %v1139_v17 = vcombine.high %v562_v55, %v562_v55  ;;  %v2634_v63 = vcombine.low %v1910_v58, %v1913_v44  ;;  %v1925_v11 = vrot.slane %v11081_v26, 7 }
 0x144   :  { %8675 = vmatmul.mubr.msk.f32.gmra.mrb[46].mxu1 %vm3059_vm7, %v2633_v25  ;;  %8831 = vmatmul.mubr.msk.f32.gmra.mrb[48].mxu0 %vm3059_vm7, %v3892_v29  ;;  %v2635_v5 = vcombine.low %v1917_v0, %v1920_v15  ;;  %v4730_v25 = vcombine.low %v9611_v30, %v9625_v36  ;;  %v11200_v12 = vrot.slane %v1123_v27, %v9557_v52  ;;  %v1928_v48 = vrot.slane %v11094_v3, 7 }
 0x145   :  { %8677 = vmatprep.mubr.msk.f32.mxu1 %vm9292_vm0, %v14542_v47  ;;  %8911 = vmatprep.mubr.msk.f32.mxu0 %vm9292_vm0, %v14542_v47  ;;  %v563_v59 = vsel %vm531_vm2, %v506_v39, %v369_v13  ;;  %v4745_v55 = vrot.slane %v8380_v46, %v9557_v52  ;;  %v11207_v38 = vcombine.high %v11179_v4, %v11179_v4  ;;  %v1921_v29 = vrot.slane %v1919_v40, 2  ;;  %v9241_v39 = vld [vmem:[%s14278_s0 + $0x120] sm:$0xff]  ;;  %v371_v44 = vpop.permute.xlu1 %370 }
 0x146   :  { %v2642_v58 = vrot.slane %v2634_v63, %v9557_v52  ;;  %v2649_v8 = vrot.slane %v2635_v5, %v9557_v52  ;;  %v11212_v30 = vrot.slane %v1139_v17, %v9557_v52  ;;  %v14622_v36 = vcombine.low %v9616_v32, %v9619_v33 }
 0x147   :  { %14621 = vst [vmem:[#allocation66_spill] sm:$0xff] %v11207_v38  ;;  %v4738_v27 = vrot.slane %v4730_v25, %v9557_v52  ;;  %v1927_v46 = vrot.slane %v1925_v11, 2  ;;  %v1156_v51 = vcombine.high %v563_v59, %v563_v59  ;;  %v507_v13 = vsel %vm474_vm1, %v9241_v39, %v199_v43 }
 0x148   :  { %8912 = vmatmul.mubr.msk.f32.vlgmr.msra.gmra.mrb[0].mxu0 %vm3059_vm7, %v14622_v36  ;;  %v2650_v40 = vcombine.low %v2642_v58, %v2649_v8  ;;  %v1922_v32 = vrot.slane %v11063_v34, 7  ;;  %v1930_v33 = vrot.slane %v1928_v48, 2  ;;  %v1931_v0 = vrot.slane %v11200_v12, 7 }
 0x149   :  { %8914 = vmatprep.mubr.msk.f32.mxu0 %vm9292_vm0, %v14542_v47  ;;  %v4746_v15 = vcombine.low %v4738_v27, %v4745_v55  ;;  %v1585_v5 = vcombine.high %v11200_v12, %v11200_v12  ;;  %v1938_v25 = vrot.slane %v11207_v38, 7  ;;  %v11237_v43 = vcombine.high %v11212_v30, %v11212_v30 }
 0x14a   :  { %8678 = vmatmul.mubr.msk.f32.gmra.mrb[48].mxu1 %vm3059_vm7, %v2650_v40  ;;  %v564_v55 = vsel %vm531_vm2, %v507_v13, %v371_v44  ;;  %v1924_v58 = vrot.slane %v1922_v32, 2  ;;  %v1932_v8 = vsel %vm9703_vm10, %v1930_v33, %v1931_v0  ;;  %v1941_v36 = vrot.slane %v11212_v30, 7  ;;  %v201_v44 = vpop.permute.xlu0 %200 }
 0x14b   :  { %8680 = vmatprep.mubr.msk.f32.mxu1 %vm9292_vm0, %v14542_v47  ;;  %v11247_v27 = vrot.slane %v563_v59, %v9557_v52  ;;  %v11250_v39 = vrot.slane %v1156_v51, %v9557_v52  ;;  %v1929_v13 = vsel %vm9703_vm10, %v1927_v46, %v1928_v48  ;;  %v1923_v40 = vsel %vm9703_vm10, %v1921_v29, %v1922_v32 }
 0x14c   :  { %8915 = vmatmul.mubr.msk.f32.gmra.mrb[2].mxu0 %vm3059_vm7, %v4746_v15  ;;  %v1926_v15 = vsel %vm9703_vm10, %v1924_v58, %v1925_v11  ;;  %v2652_v33 = vcombine.low %v1929_v13, %v1932_v8  ;;  %v4747_v59 = vcombine.low %v9662_v56, %v9710_v31  ;;  %v1940_v9 = vrot.slane %v1938_v25, 2  ;;  %v373_v31 = vpop.permute.xlu1 %372 }
 0x14d   :  { %14623 = vst [vmem:[#allocation67_spill] sm:$0xff] %v11250_v39  ;;  %8917 = vmatprep.mubr.msk.f32.mxu0 %vm9292_vm0, %v14542_v47  ;;  %v11263_v51 = vrot.slane %v564_v55, %v9557_v52  ;;  %v2651_v63 = vcombine.low %v1923_v40, %v1926_v15  ;;  %v14625_v48 = vcombine.low %v9647_v45, %v9666_v57  ;;  %v1933_v32 = vrot.slane %v1931_v0, 2 }
 0x14e   :  { %v2666_v17 = vrot.slane %v2652_v33, %v9557_v52  ;;  %v4755_v29 = vrot.slane %v4747_v59, %v9557_v52  ;;  %v1934_v11 = vrot.slane %v1585_v5, 7  ;;  %v8263_v58 = vrot.slane %v11179_v4, 9 }
 0x14f   :  { %14624 = vst [vmem:[#allocation68_spill] sm:$0xff] %v11263_v51  ;;  %v4762_v46 = vrot.slane %v14625_v48, %v9557_v52  ;;  %v1943_v8 = vrot.slane %v1941_v36, 2  ;;  %v1947_v56 = vrot.slane %v11247_v27, 7  ;;  %v2659_v13 = vrot.slane %v2651_v63, %v9557_v52  ;;  %v9242_v63 = vld [vmem:[%s14278_s0 + $0x128] sm:$0xff]  ;;  %v203_v48 = vpop.permute.xlu0 %202 }
 0x150   :  { %v11276_v40 = vcombine.high %v11247_v27, %v11247_v27  ;;  %v11280_v45 = vcombine.high %v11250_v39, %v11250_v39  ;;  %v1172_v57 = vcombine.high %v564_v55, %v564_v55  ;;  %v1953_v0 = vrot.slane %v11250_v39, 7 }
 0x151   :  { %v4763_v15 = vcombine.low %v4755_v29, %v4762_v46  ;;  %v11285_v5 = vcombine.high %v11263_v51, %v11263_v51  ;;  %v508_v33 = vsel %vm474_vm1, %v9242_v63, %v201_v44  ;;  %v2667_v59 = vcombine.low %v2659_v13, %v2666_v17 }
 0x152   :  { %14626 = vst [vmem:[#allocation69_spill] sm:$0xff] %v11276_v40  ;;  %v1935_v55 = vsel %vm9703_vm10, %v1933_v32, %v1934_v11  ;;  %v1939_v46 = vsel %vm9703_vm10, %v8263_v58, %v1938_v25  ;;  %v1942_v29 = vsel %vm9703_vm10, %v1940_v9, %v1941_v36  ;;  %v1944_v22 = vrot.slane %v11237_v43, 7  ;;  %v375_v58 = vpop.permute.xlu1 %374 }
 0x153   :  { %14627 = vst [vmem:[#allocation70_spill] sm:$0xff] %v11285_v5  ;;  %8918 = vmatmul.mubr.msk.f32.gmra.mrb[4].mxu0 %vm3059_vm7, %v4763_v15  ;;  %v1949_v44 = vrot.slane %v1947_v56, 2  ;;  %8681 = vmatmul.mubr.msk.f32.gmra.mrb[50].mxu1 %vm3059_vm7, %v2667_v59  ;;  %v2668_v13 = vcombine.low %v1935_v55, %v1939_v46  ;;  %v1950_v25 = vrot.slane %v11276_v40, 7  ;;  %v11308_v32 = vrot.slane %v1172_v57, %v9557_v52 }
 0x154   :  { %8920 = vmatprep.mubr.msk.f32.mxu0 %vm9292_vm0, %v14542_v47  ;;  %8683 = vmatprep.mubr.msk.f32.mxu1 %vm9292_vm0, %v14542_v47  ;;  %v1945_v9 = vsel %vm9703_vm10, %v1943_v8, %v1944_v22  ;;  %v4764_v36 = vcombine.low %v9730_v2, %v9775_v23  ;;  %v565_v11 = vsel %vm531_vm2, %v508_v33, %v373_v31  ;;  %v1946_v59 = vrot.slane %v1944_v22, 2  ;;  %v9243_v8 = vld [vmem:[%s14278_s0 + $0x130] sm:$0xff] }
 0x155   :  { %14628 = vst [vmem:[#allocation71_spill] sm:$0xff] %v11308_v32  ;;  %v2669_v15 = vcombine.low %v1942_v29, %v1945_v9  ;;  %v4765_v63 = vcombine.low %v9741_v35, %v9680_v62  ;;  %v1955_v55 = vrot.slane %v1953_v0, 2  ;;  %v1956_v57 = vrot.slane %v11280_v45, 7  ;;  %v205_v29 = vpop.permute.xlu0 %204 }
 0x156   :  { %v1960_v46 = vrot.slane %v11285_v5, 7  ;;  %v509_v17 = vsel %vm474_vm1, %v9243_v8, %v203_v48  ;;  %v2676_v2 = vrot.slane %v2668_v13, %v9557_v52  ;;  %v4772_v31 = vrot.slane %v4764_v36, %v9557_v52  ;;  %v377_v39 = vpop.permute.xlu1 %376 }
 0x157   :  { %v2683_v23 = vrot.slane %v2669_v15, %v9557_v52  ;;  %v4779_v62 = vrot.slane %v4765_v63, %v9557_v52  ;;  %v11331_v35 = vcombine.high %v11308_v32, %v11308_v32  ;;  %v1963_v22 = vrot.slane %v11308_v32, 7  ;;  %v14631_v63 = vld [vmem:[#allocation54_spill] sm:$0xff] }
 0x158   :  { %v11335_v33 = vrot.slane %v565_v11, %v9557_v52  ;;  %v1948_v48 = vsel %vm9703_vm10, %v1946_v59, %v1947_v56  ;;  %v566_v13 = vsel %vm531_vm2, %v509_v17, %v375_v58  ;;  %v1951_v36 = vsel %vm9703_vm10, %v1949_v44, %v1950_v25  ;;  %v14632_v17 = vld [vmem:[#allocation7_spill] sm:$0xff] }
 0x159   :  { %14629 = vst [vmem:[#allocation72_spill] sm:$0xff] %v11331_v35  ;;  %v2684_v9 = vcombine.low %v2676_v2, %v2683_v23  ;;  %v4780_v15 = vcombine.low %v4772_v31, %v4779_v62  ;;  %v1962_v54 = vrot.slane %v1960_v46, 2  ;;  %v1952_v38 = vrot.slane %v1950_v25, 2  ;;  %v9244_v31 = vld [vmem:[%s14278_s0 + $0x138] sm:$0xff] }
 0x15a   :  { %14630 = vst [vmem:[#allocation73_spill] sm:$0xff] %v11335_v33  ;;  %v1957_v5 = vsel %vm9703_vm10, %v1955_v55, %v1956_v57  ;;  %v1189_v32 = vcombine.high %v565_v11, %v565_v11  ;;  %v2685_v56 = vcombine.low %v1948_v48, %v1951_v36  ;;  %v4782_v58 = vcombine.low %v14632_v17, %v9891_v41  ;;  %v207_v48 = vpop.permute.xlu0 %206 }
 0x15b   :  { %8684 = vmatmul.mubr.msk.f32.gmra.mrb[52].mxu1 %vm3059_vm7, %v2684_v9  ;;  %8921 = vmatmul.mubr.msk.f32.gmra.mrb[6].mxu0 %vm3059_vm7, %v4780_v15  ;;  %v8264_v44 = vrot.slane %v11263_v51, 9  ;;  %v11352_v59 = vrot.slane %v566_v13, %v9557_v52  ;;  %v1954_v25 = vsel %vm9703_vm10, %v1952_v38, %v1953_v0  ;;  %v1966_v11 = vrot.slane %v11331_v35, 7  ;;  %v14635_v38 = vld [vmem:[#allocation5_spill] sm:$0xff]  ;;  %v14636_v0 = vld [vmem:[#allocation6_spill] sm:$0xff] }
 0x15c   :  { %8686 = vmatprep.mubr.msk.f32.mxu1 %vm9292_vm0, %v14542_v47  ;;  %8923 = vmatprep.mubr.msk.f32.mxu0 %vm9292_vm0, %v14542_v47  ;;  %v1965_v55 = vrot.slane %v1963_v22, 2  ;;  %v11363_v57 = vcombine.high %v11335_v33, %v11335_v33  ;;  %v1205_v2 = vcombine.high %v566_v13, %v566_v13  ;;  %v2686_v23 = vcombine.low %v1954_v25, %v1957_v5 }
 0x15d   :  { %14633 = vst [vmem:[#allocation54_spill] sm:$0xff] %v11352_v59  ;;  %v510_v62 = vsel %vm474_vm1, %v9244_v31, %v205_v29  ;;  %v14637_v9 = vcombine.low %v14635_v38, %v14636_v0  ;;  %v4796_v36 = vrot.slane %v4782_v58, %v9557_v52  ;;  %v1964_v17 = vsel %vm9703_vm10, %v1962_v54, %v1963_v22 }
 0x15e   :  { %14634 = vst [vmem:[#allocation7_spill] sm:$0xff] %v11363_v57  ;;  %v1961_v5 = vsel %vm9703_vm10, %v8264_v44, %v1960_v46  ;;  %v11379_v13 = vrot.slane %v1189_v32, %v9557_v52  ;;  %v2693_v25 = vrot.slane %v2685_v56, %v9557_v52  ;;  %v2700_v29 = vrot.slane %v2686_v23, %v9557_v52  ;;  %v379_v44 = vpop.permute.xlu1 %378  ;;  %v9245_v56 = vld [vmem:[%s14278_s0 + $0x140] sm:$0xff] }
 0x15f   :  { %v4789_v15 = vrot.slane %v14637_v9, %v9557_v52  ;;  %v1969_v31 = vrot.slane %v11335_v33, 7  ;;  %v11386_v38 = vcombine.high %v11352_v59, %v11352_v59  ;;  %v1968_v0 = vrot.slane %v1966_v11, 2 }
 0x160   :  { %14638 = vst [vmem:[#allocation5_spill] sm:$0xff] %v11379_v13  ;;  %v1972_v54 = vrot.slane %v11363_v57, 7  ;;  %v567_v22 = vsel %vm531_vm2, %v510_v62, %v377_v39  ;;  %v2701_v46 = vcombine.low %v2693_v25, %v2700_v29  ;;  %v2702_v32 = vcombine.low %v1961_v5, %v1964_v17  ;;  %v14642_v5 = vld [vmem:[#allocation12_spill] sm:$0xff]  ;;  %v14643_v25 = vld [vmem:[#allocation10_spill] sm:$0xff] }
 0x161   :  { %14639 = vst [vmem:[#allocation6_spill] sm:$0xff] %v11386_v38  ;;  %v4797_v58 = vcombine.low %v4789_v15, %v4796_v36  ;;  %v11391_v9 = vrot.slane %v1205_v2, %v9557_v52  ;;  %v511_v23 = vsel %vm474_vm1, %v9245_v56, %v207_v48  ;;  %v1967_v15 = vsel %vm9703_vm10, %v1965_v55, %v1966_v11  ;;  %v209_v55 = vpop.permute.xlu0 %208 }
 0x162   :  { %v1970_v39 = vsel %vm9703_vm10, %v1968_v0, %v1969_v31  ;;  %v1587_v2 = vcombine.high %v11379_v13, %v11379_v13  ;;  %8687 = vmatmul.mubr.msk.f32.gmra.mrb[54].mxu1 %vm3059_vm7, %v2701_v46  ;;  %v1971_v48 = vrot.slane %v1969_v31, 2  ;;  %v1982_v17 = vrot.slane %v11386_v38, 7  ;;  %v381_v51 = vpop.permute.xlu1 %380 }
 0x163   :  { %14640 = vst [vmem:[#allocation74_spill] sm:$0xff] %v11391_v9  ;;  %8924 = vmatmul.mubr.msk.f32.gmra.mrb[8].mxu0 %vm3059_vm7, %v4797_v58  ;;  %v2703_v36 = vcombine.low %v1967_v15, %v1970_v39  ;;  %v11411_v11 = vrot.slane %v567_v22, %v9557_v52  ;;  %8689 = vmatprep.mubr.msk.f32.mxu1 %vm9292_vm0, %v14542_v47  ;;  %v1974_v56 = vrot.slane %v1972_v54, 2  ;;  %v8265_v31 = vrot.slane %v11352_v59, 9  ;;  %v14688_v59 = vld [vmem:[#allocation23_spill] sm:$0xff] }
 0x164   :  { %8926 = vmatprep.mubr.msk.f32.mxu0 %vm9292_vm0, %v14542_v47  ;;  %v4799_v29 = vcombine.low %v14643_v25, %v14642_v5  ;;  %v568_v58 = vsel %vm531_vm2, %v511_v23, %v379_v44  ;;  %v2710_v0 = vrot.slane %v2702_v32, %v9557_v52  ;;  %v1985_v15 = vrot.slane %v11391_v9, 7 }
 0x165   :  { %14641 = vst [vmem:[#allocation75_spill] sm:$0xff] %v11411_v11  ;;  %v2717_v46 = vrot.slane %v2703_v36, %v9557_v52  ;;  %v1222_v39 = vcombine.high %v567_v22, %v567_v22  ;;  %v14644_v62 = vcombine.high %v9891_v41, %v9844_v50  ;;  %v1975_v44 = vrot.slane %v11379_v13, 7 }
 0x166   :  { %v4813_v5 = vrot.slane %v4799_v29, %v9557_v52  ;;  %v1978_v32 = vrot.slane %v1587_v2, 7  ;;  %v11430_v23 = vcombine.high %v11411_v11, %v11411_v11  ;;  %v1991_v36 = vrot.slane %v11411_v11, 7 }
 0x167   :  { %v4806_v8 = vrot.slane %v14644_v62, %v9557_v52  ;;  %v2718_v38 = vcombine.low %v2710_v0, %v2717_v46  ;;  %v11434_v22 = vrot.slane %v568_v58, %v9557_v52  ;;  %v1973_v50 = vsel %vm9703_vm10, %v1971_v48, %v1972_v54  ;;  %v211_v54 = vpop.permute.xlu0 %210 }
 0x168   :  { %14645 = vst [vmem:[#allocation12_spill] sm:$0xff] %v11430_v23  ;;  %v1976_v62 = vsel %vm9703_vm10, %v1974_v56, %v1975_v44  ;;  %v1977_v25 = vrot.slane %v1975_v44, 2  ;;  %v1983_v2 = vsel %vm9703_vm10, %v8265_v31, %v1982_v17  ;;  %v11446_v0 = vrot.slane %v1222_v39, %v9557_v52 }
 0x169   :  { %14646 = vst [vmem:[#allocation10_spill] sm:$0xff] %v11434_v22  ;;  %8690 = vmatmul.mubr.msk.f32.gmra.mrb[56].mxu1 %vm3059_vm7, %v2718_v38  ;;  %v4814_v41 = vcombine.low %v4806_v8, %v4813_v5  ;;  %v2719_v48 = vcombine.low %v1973_v50, %v1976_v62  ;;  %v14648_v38 = vld [vmem:[#allocation16_spill] sm:$0xff]  ;;  %v14649_v8 = vld [vmem:[#allocation14_spill] sm:$0xff]  ;;  %v11454_v56 = vcombine.high %v11391_v9, %v11391_v9  ;;  %v1984_v5 = vrot.slane %v1982_v17, 2 }
 0x16a   :  { %14647 = vst [vmem:[#allocation76_spill] sm:$0xff] %v11446_v0  ;;  %8692 = vmatprep.mubr.msk.f32.mxu1 %vm9292_vm0, %v14542_v47  ;;  %v4816_v46 = vcombine.low %v14649_v8, %v14648_v38  ;;  %v1987_v31 = vrot.slane %v1985_v15, 2  ;;  %v1979_v39 = vsel %vm9703_vm10, %v1977_v25, %v1978_v32  ;;  %v1993_v44 = vrot.slane %v1991_v36, 2  ;;  %v9246_v17 = vld [vmem:[%s14278_s0 + $0x150] sm:$0xff]  ;;  %v383_v38 = vpop.permute.xlu1 %382  ;;  %v14652_v32 = vld [vmem:[#allocation8_spill] sm:$0xff] }
 0x16b   :  { %14650 = vst [vmem:[#allocation16_spill] sm:$0xff] %v11454_v56  ;;  %8927 = vmatmul.mubr.msk.f32.gmra.mrb[10].mxu0 %vm3059_vm7, %v4814_v41  ;;  %v1238_v29 = vcombine.high %v568_v58, %v568_v58  ;;  %v11461_v11 = vcombine.high %v11434_v22, %v11434_v22  ;;  %v2720_v50 = vcombine.low %v1979_v39, %v1983_v2  ;;  %v1994_v62 = vrot.slane %v11430_v23, 7  ;;  %v14653_v58 = vld [vmem:[#allocation9_spill] sm:$0xff]  ;;  %v213_v13 = vpop.permute.xlu0 %212 }
 0x16c   :  { %8929 = vmatprep.mubr.msk.f32.mxu0 %vm9292_vm0, %v14542_v47  ;;  %v513_v41 = vsel %vm474_vm1, %v9246_v17, %v211_v54  ;;  %v14654_v25 = vcombine.low %v14652_v32, %v14653_v58  ;;  %v4830_v9 = vrot.slane %v4816_v46, %v9557_v52  ;;  %v11477_v2 = vcombine.high %v11446_v0, %v11446_v0  ;;  %v9247_v54 = vld [vmem:[%s14278_s0 + $0x148] sm:$0xff] }
 0x16d   :  { %14651 = vst [vmem:[#allocation14_spill] sm:$0xff] %v11461_v11  ;;  %v1997_v39 = vrot.slane %v11446_v0, 7  ;;  %v2727_v23 = vrot.slane %v2719_v48, %v9557_v52  ;;  %v2734_v57 = vrot.slane %v2720_v50, %v9557_v52  ;;  %v512_v17 = vsel %vm474_vm1, %v9247_v54, %v209_v55 }
 0x16e   :  { %v4823_v8 = vrot.slane %v14654_v25, %v9557_v52  ;;  %14655 = vst [vmem:[#allocation8_spill] sm:$0xff] %v11477_v2  ;;  %v1986_v46 = vsel %vm9703_vm10, %v1984_v5, %v1985_v15  ;;  %v1988_v58 = vrot.slane %v11454_v56, 7  ;;  %v11490_v25 = vrot.slane %v1238_v29, %v9557_v52  ;;  %v14657_v5 = vld [vmem:[#allocation11_spill] sm:$0xff] }
 0x16f   :  { %v2004_v0 = vrot.slane %v11461_v11, 7  ;;  %v2735_v48 = vcombine.low %v2727_v23, %v2734_v57  ;;  %v570_v50 = vsel %vm531_vm2, %v513_v41, %v383_v38  ;;  %v1995_v15 = vsel %vm9703_vm10, %v1993_v44, %v1994_v62  ;;  %v14659_v38 = vld [vmem:[#allocation13_spill] sm:$0xff] }
 0x170   :  { %v4831_v32 = vcombine.low %v4823_v8, %v4830_v9  ;;  %14656 = vst [vmem:[#allocation9_spill] sm:$0xff] %v11490_v25  ;;  %v1989_v55 = vsel %vm9703_vm10, %v1987_v31, %v1988_v58  ;;  %v1990_v9 = vrot.slane %v1988_v58, 2  ;;  %v14658_v8 = vld [vmem:[#allocation17_spill] sm:$0xff]  ;;  %v1999_v56 = vrot.slane %v1997_v39, 2 }
 0x171   :  { %v4832_v54 = vcombine.low %v14658_v8, %v14657_v5  ;;  %v569_v57 = vsel %vm531_vm2, %v512_v17, %v381_v51  ;;  %8693 = vmatmul.mubr.msk.f32.gmra.mrb[58].mxu1 %vm3059_vm7, %v2735_v48  ;;  %v2736_v23 = vcombine.low %v1986_v46, %v1989_v55  ;;  %v2000_v31 = vrot.slane %v11477_v2, 7  ;;  %v385_v55 = vpop.permute.xlu1 %384 }
 0x172   :  { %8930 = vmatmul.mubr.msk.f32.gmra.mrb[12].mxu0 %vm3059_vm7, %v4831_v32  ;;  %v8266_v41 = vrot.slane %v11434_v22, 9  ;;  %8695 = vmatprep.mubr.msk.f32.mxu1 %vm9292_vm0, %v14542_v47  ;;  %v1992_v44 = vsel %vm9703_vm10, %v1990_v9, %v1991_v36  ;;  %v14660_v32 = vld [vmem:[#allocation15_spill] sm:$0xff]  ;;  %v1271_v58 = vcombine.high %v570_v50, %v570_v50  ;;  %v11518_v46 = vrot.slane %v570_v50, %v9557_v52 }
 0x173   :  { %8932 = vmatprep.mubr.msk.f32.mxu0 %vm9292_vm0, %v14542_v47  ;;  %v14661_v51 = vcombine.low %v14659_v38, %v14660_v32  ;;  %v2737_v48 = vcombine.low %v1992_v44, %v1995_v15  ;;  %v1996_v5 = vrot.slane %v1994_v62, 2  ;;  %v2006_v8 = vrot.slane %v2004_v0, 2  ;;  %v215_v32 = vpop.permute.xlu0 %214  ;;  %v11529_v15 = vpop.f32.mrb[0].mxu1  ;;  %v9248_v62 = vld [vmem:[%s14278_s0 + $0x158] sm:$0xff] }
 0x174   :  { %14662 = vst [vmem:[#allocation11_spill] sm:$0xff] %v11518_v46  ;;  %v2007_v29 = vrot.slane %v11490_v25, 7  ;;  %v1255_v2 = vcombine.high %v569_v57, %v569_v57  ;;  %v4840_v22 = vrot.slane %v4832_v54, %v9557_v52  ;;  %v2005_v36 = vsel %vm9703_vm10, %v8266_v41, %v2004_v0  ;;  %14664 = vst [vmem:[#allocation13_spill] sm:$0xff] %v11529_v15  ;;  %v8607_v41 = vpop.f32.mrb[1].mxu1 }
 0x175   :  { %v4847_v17 = vrot.slane %v14661_v51, %v9557_v52  ;;  %v11525_v9 = vrot.slane %v569_v57, %v9557_v52  ;;  %v2744_v38 = vrot.slane %v2736_v23, %v9557_v52  ;;  %v2751_v50 = vrot.slane %v2737_v48, %v9557_v52  ;;  %v14665_v51 = vld [vmem:[#allocation18_spill] sm:$0xff]  ;;  %v14674_v41 = vld [vmem:[#allocation20_spill] sm:$0xff] }
 0x176   :  { %v514_v44 = vsel %vm474_vm1, %v9248_v62, %v213_v13  ;;  %v4849_v0 = vcombine.low %v14665_v51, %v10113_v53  ;;  %v14666_v57 = vcombine.high %v10113_v53, %v10092_v6  ;;  %v11542_v48 = vrot.slane %v1271_v58, %v9557_v52 }
 0x177   :  { %14663 = vst [vmem:[#allocation17_spill] sm:$0xff] %v11525_v9  ;;  %v4848_v54 = vcombine.low %v4840_v22, %v4847_v17  ;;  %v11546_v15 = vcombine.high %v11518_v46, %v11518_v46  ;;  %v2752_v11 = vcombine.low %v2744_v38, %v2751_v50  ;;  %v1998_v13 = vsel %vm9703_vm10, %v1996_v5, %v1997_v39  ;;  %v387_v39 = vpop.permute.xlu1 %386  ;;  %v11568_v50 = vpop.f32.mrb[2].mxu1 }
 0x178   :  { %v4864_v23 = vrot.slane %v14666_v57, %v9557_v52  ;;  %14667 = vst [vmem:[#allocation15_spill] sm:$0xff] %v11542_v48  ;;  %v11551_v22 = vrot.slane %v1255_v2, %v9557_v52  ;;  %v4857_v6 = vrot.slane %v4849_v0, %v9557_v52  ;;  %v2001_v53 = vsel %vm9703_vm10, %v1999_v56, %v2000_v31  ;;  %v217_v0 = vpop.permute.xlu0 %216  ;;  %v14673_v57 = vld [vmem:[#allocation22_spill] sm:$0xff] }
 0x179   :  { %14668 = vst [vmem:[#allocation18_spill] sm:$0xff] %v11546_v15  ;;  %8933 = vmatmul.mubr.msk.f32.gmra.mrb[14].mxu0 %vm3059_vm7, %v4848_v54  ;;  %v2008_v17 = vsel %vm9703_vm10, %v2006_v8, %v2007_v29  ;;  %v11561_v58 = vcombine.high %v11525_v9, %v11525_v9  ;;  %v2013_v38 = vrot.slane %v11525_v9, 7  ;;  %8696 = vmatmul.mubr.msk.f32.gmra.mrb[60].mxu1 %vm3059_vm7, %v2752_v11  ;;  %14671 = vst [vmem:[#allocation79_spill] sm:$0xff] %v11568_v50  ;;  %v9249_v54 = vld [vmem:[%s14278_s0 + $0x160] sm:$0xff]  ;;  %v14678_v50 = vld [vmem:[#allocation19_spill] sm:$0xff] }
 0x17a   :  { %14669 = vst [vmem:[#allocation77_spill] sm:$0xff] %v11551_v22  ;;  %v571_v2 = vsel %vm531_vm2, %v514_v44, %v385_v55  ;;  %8935 = vmatprep.mubr.msk.f32.mxu0 %vm9292_vm0, %v14542_v47  ;;  %v2753_v5 = vcombine.low %v1998_v13, %v2001_v53  ;;  %v11574_v31 = vcombine.high %v11490_v25, %v11490_v25  ;;  %v8610_v55 = vpop.f32.mrb[3].mxu1  ;;  %v14393_v62 = vrot.slane %v11546_v15, 7  ;;  %v14679_v9 = vld [vmem:[#allocation21_spill] sm:$0xff] }
 0x17b   :  { %14670 = vst [vmem:[#allocation78_spill] sm:$0xff] %v11561_v58  ;;  %8698 = vmatprep.mubr.msk.f32.mxu1 %vm9292_vm0, %v14542_v47  ;;  %v4865_v11 = vcombine.low %v4857_v6, %v4864_v23  ;;  %v2754_v8 = vcombine.low %v2005_v36, %v2008_v17  ;;  %v515_v51 = vsel %vm474_vm1, %v9249_v54, %v215_v32  ;;  %v2009_v6 = vrot.slane %v2007_v29, 2  ;;  %v11597_v54 = vpop.f32.mrb[4].mxu1 }
 0x17c   :  { %14672 = vst [vmem:[#allocation80_spill] sm:$0xff] %v11574_v31  ;;  %v4866_v13 = vcombine.low %v14674_v41, %v14673_v57  ;;  %v1288_v53 = vcombine.high %v571_v2, %v571_v2  ;;  %v11587_v56 = vrot.slane %v571_v2, %v9557_v52  ;;  %v2761_v36 = vrot.slane %v2753_v5, %v9557_v52  ;;  %v389_v41 = vpop.permute.xlu1 %388 }
 0x17d   :  { %8936 = vmatmul.mubr.msk.f32.gmra.mrb[16].mxu0 %vm3059_vm7, %v4865_v11  ;;  %v2768_v23 = vrot.slane %v2754_v8, %v9557_v52  ;;  %v1589_v17 = vcombine.high %v11551_v22, %v11551_v22  ;;  %v2015_v55 = vrot.slane %v2013_v38, 2  ;;  %v2016_v32 = vrot.slane %v11561_v58, 7  ;;  %14676 = vst [vmem:[#allocation20_spill] sm:$0xff] %v11597_v54  ;;  %v8613_v8 = vpop.f32.mrb[5].mxu1 }
 0x17e   :  { %14675 = vst [vmem:[#allocation22_spill] sm:$0xff] %v11587_v56  ;;  %8938 = vmatprep.mubr.msk.f32.mxu0 %vm9292_vm0, %v14542_v47  ;;  %v11601_v2 = vcombine.high %v11542_v48, %v11542_v48  ;;  %v8267_v5 = vrot.slane %v11518_v46, 9  ;;  %v572_v11 = vsel %vm531_vm2, %v515_v51, %v387_v39  ;;  %v2028_v57 = vrot.slane %v14393_v62, 2 }
 0x17f   :  { %v2769_v29 = vcombine.low %v2761_v36, %v2768_v23  ;;  %v4874_v44 = vrot.slane %v4866_v13, %v9557_v52  ;;  %v14680_v54 = vcombine.low %v14678_v50, %v14679_v9  ;;  %v2010_v25 = vrot.slane %v11574_v31, 7  ;;  %v219_v23 = vpop.permute.xlu0 %218  ;;  %v14686_v13 = vld [vmem:[#allocation27_spill] sm:$0xff] }
 0x180   :  { %14677 = vst [vmem:[#allocation81_spill] sm:$0xff] %v11601_v2  ;;  %v14681_v33 = vrot.slane %v11542_v48, 7  ;;  %v11618_v39 = vrot.slane %v1288_v53, %v9557_v52  ;;  %v11622_v51 = vcombine.high %v11587_v56, %v11587_v56  ;;  %v1304_v36 = vcombine.high %v572_v11, %v572_v11  ;;  %v11631_v53 = vpop.f32.mrb[6].mxu1 }
 0x181   :  { %v4881_v58 = vrot.slane %v14680_v54, %v9557_v52  ;;  %8699 = vmatmul.mubr.msk.f32.gmra.mrb[62].mxu1 %vm3059_vm7, %v2769_v29  ;;  %v11627_v9 = vrot.slane %v572_v11, %v9557_v52  ;;  %v2012_v50 = vrot.slane %v2010_v25, 2  ;;  %14685 = vst [vmem:[#allocation83_spill] sm:$0xff] %v11631_v53  ;;  %v9250_v54 = vld [vmem:[%s14278_s0 + $0x168] sm:$0xff]  ;;  %v2018_v62 = vrot.slane %v2016_v32, 2  ;;  %v14687_v11 = vld [vmem:[#allocation24_spill] sm:$0xff]  ;;  %v8616_v35 = vpop.f32.mrb[7].mxu1 }
 0x182   :  { %v11615_v46 = vrot.slane %v14681_v33, 2  ;;  %14682 = vst [vmem:[#allocation19_spill] sm:$0xff] %v11618_v39  ;;  %14683 = vst [vmem:[#allocation21_spill] sm:$0xff] %v11622_v51  ;;  %8701 = vmatprep.mubr.msk.f32.mxu1 %vm9292_vm0, %v14542_v47  ;;  %v516_v8 = vsel %vm474_vm1, %v9250_v54, %v217_v0  ;;  %v2019_v29 = vrot.slane %v11551_v22, 7  ;;  %v4883_v31 = vcombine.low %v14687_v11, %v14686_v13  ;;  %v14689_v0 = vld [vmem:[#allocation28_spill] sm:$0xff]  ;;  %v9251_v35 = vld [vmem:[%s14278_s0 + $0x170] sm:$0xff] }
 0x183   :  { %14684 = vst [vmem:[#allocation82_spill] sm:$0xff] %v11627_v9  ;;  %v4882_v33 = vcombine.low %v4874_v44, %v4881_v58  ;;  %v2011_v58 = vsel %vm9703_vm10, %v2009_v6, %v2010_v25  ;;  %v2014_v44 = vsel %vm9703_vm10, %v2012_v50, %v2013_v38  ;;  %v2017_v53 = vsel %vm9703_vm10, %v2015_v55, %v2016_v32  ;;  %v391_v6 = vpop.permute.xlu1 %390 }
 0x184   :  { %v4884_v54 = vcombine.low %v14689_v0, %v14688_v59  ;;  %v2020_v22 = vsel %vm9703_vm10, %v2018_v62, %v2019_v29  ;;  %v2770_v40 = vcombine.low %v2011_v58, %v2014_v44  ;;  %v517_v13 = vsel %vm474_vm1, %v9251_v35, %v219_v23 }
 0x185   :  { %8939 = vmatmul.mubr.msk.f32.gmra.mrb[18].mxu0 %vm3059_vm7, %v4882_v33  ;;  %v2022_v25 = vrot.slane %v1589_v17, 7  ;;  %v2771_v38 = vcombine.low %v2017_v53, %v2020_v22  ;;  %v4891_v55 = vrot.slane %v4883_v31, %v9557_v52  ;;  %v2021_v32 = vrot.slane %v2019_v29, 2 }
 0x186   :  { %8941 = vmatprep.mubr.msk.f32.mxu0 %vm9292_vm0, %v14542_v47  ;;  %v4898_v59 = vrot.slane %v4884_v54, %v9557_v52  ;;  %v11659_v33 = vpop.f32.mrb[8].mxu1  ;;  %v11663_v62 = vcombine.high %v11618_v39, %v11618_v39  ;;  %v14692_v50 = vrot.slane %v11587_v56, 7  ;;  %v2041_v11 = vrot.slane %v11618_v39, 7 }
 0x187   :  { %14690 = vst [vmem:[#allocation27_spill] sm:$0xff] %v11659_v33  ;;  %v11669_v17 = vrot.slane %v1304_v36, %v9557_v52  ;;  %v8619_v22 = vpop.f32.mrb[9].mxu1  ;;  %v11673_v31 = vcombine.high %v11627_v9, %v11627_v9  ;;  %v2778_v53 = vrot.slane %v2770_v40, %v9557_v52  ;;  %v2785_v29 = vrot.slane %v2771_v38, %v9557_v52 }
 0x188   :  { %14691 = vst [vmem:[#allocation24_spill] sm:$0xff] %v11663_v62  ;;  %v2037_v23 = vrot.slane %v14692_v50, 2  ;;  %v4899_v58 = vcombine.low %v4891_v55, %v4898_v59  ;;  %v2038_v44 = vrot.slane %v11622_v51, 7  ;;  %v573_v0 = vsel %vm531_vm2, %v516_v8, %v389_v41  ;;  %v221_v8 = vpop.permute.xlu0 %220  ;;  %v393_v22 = vpop.permute.xlu1 %392 }
 0x189   :  { %14693 = vst [vmem:[#allocation23_spill] sm:$0xff] %v11669_v17  ;;  %v574_v54 = vsel %vm531_vm2, %v517_v13, %v391_v6  ;;  %v2023_v36 = vsel %vm9703_vm10, %v2021_v32, %v2022_v25  ;;  %v2786_v35 = vcombine.low %v2778_v53, %v2785_v29  ;;  %v14694_v50 = vrot.slane %v11546_v15, 7  ;;  %v14696_v53 = vld [vmem:[#allocation29_spill] sm:$0xff] }
 0x18a   :  { %8942 = vmatmul.mubr.msk.f32.gmra.mrb[20].mxu0 %vm3059_vm7, %v4899_v58  ;;  %v14695_v38 = vrot.slane %v11542_v48, 7  ;;  %v2032_v41 = vrot.slane %v11601_v2, 7  ;;  %v2043_v13 = vrot.slane %v2041_v11, 2  ;;  %v2044_v6 = vrot.slane %v11663_v62, 7 }
 0x18b   :  { %v2027_v40 = vsel %vm9703_vm10, %v8267_v5, %v14694_v50  ;;  %v8268_v25 = vrot.slane %v11627_v9, 9  ;;  %8944 = vmatprep.mubr.msk.f32.mxu0 %vm9292_vm0, %v14542_v47  ;;  %v2048_v32 = vrot.slane %v11673_v31, 7  ;;  %8702 = vmatmul.mubr.msk.f32.gmra.mrb[64].mxu1 %vm3059_vm7, %v2786_v35  ;;  %v4901_v29 = vcombine.low %v14696_v53, %v10372_v21  ;;  %v9252_v35 = vld [vmem:[%s14278_s0 + $0x178] sm:$0xff]  ;;  %v14699_v5 = vld [vmem:[#allocation25_spill] sm:$0xff]  ;;  %v14700_v53 = vld [vmem:[#allocation26_spill] sm:$0xff] }
 0x18c   :  { %v2030_v55 = vsel %vm9703_vm10, %v2028_v57, %v14695_v38  ;;  %v2787_v59 = vcombine.low %v2023_v36, %v2027_v40  ;;  %v2033_v57 = vsel %vm9703_vm10, %v11615_v46, %v2032_v41  ;;  %v11707_v36 = vrot.slane %v573_v0, %v9557_v52  ;;  %8704 = vmatprep.mubr.msk.f32.mxu1 %vm9292_vm0, %v14542_v47 }
 0x18d   :  { %v1337_v50 = vcombine.high %v574_v54, %v574_v54  ;;  %v2788_v40 = vcombine.low %v2030_v55, %v2033_v57  ;;  %v518_v46 = vsel %vm474_vm1, %v9252_v35, %v221_v8  ;;  %v14701_v33 = vcombine.low %v14699_v5, %v14700_v53  ;;  %v223_v5 = vpop.permute.xlu0 %222 }
 0x18e   :  { %v11704_v58 = vpop.f32.mrb[10].mxu1  ;;  %14698 = vst [vmem:[#allocation29_spill] sm:$0xff] %v11707_v36  ;;  %v4915_v15 = vrot.slane %v4901_v29, %v9557_v52  ;;  %v2034_v39 = vrot.slane %v2032_v41, 2  ;;  %v2040_v62 = vrot.slane %v2038_v44, 2  ;;  %v11721_v51 = vrot.slane %v574_v54, %v9557_v52 }
 0x18f   :  { %14697 = vst [vmem:[#allocation28_spill] sm:$0xff] %v11704_v58  ;;  %v8622_v38 = vpop.f32.mrb[11].mxu1  ;;  %v4908_v58 = vrot.slane %v14701_v33, %v9557_v52  ;;  %v2795_v55 = vrot.slane %v2787_v59, %v9557_v52  ;;  %v2802_v57 = vrot.slane %v2788_v40, %v9557_v52  ;;  %v2039_v8 = vsel %vm9703_vm10, %v2037_v23, %v2038_v44  ;;  %v14710_v40 = vld [vmem:[#allocation32_spill] sm:$0xff] }
 0x190   :  { %14702 = vst [vmem:[#allocation25_spill] sm:$0xff] %v11721_v51  ;;  %v1321_v35 = vcombine.high %v573_v0, %v573_v0  ;;  %v14703_v48 = vrot.slane %v11587_v56, 7  ;;  %v2042_v41 = vsel %vm9703_vm10, %v2040_v62, %v2041_v11  ;;  %v11735_v54 = vcombine.high %v11669_v17, %v11669_v17  ;;  %v395_v0 = vpop.permute.xlu1 %394 }
 0x191   :  { %v4916_v38 = vcombine.low %v4908_v58, %v4915_v15  ;;  %v11739_v59 = vcombine.high %v11707_v36, %v11707_v36  ;;  %v2803_v23 = vcombine.low %v2795_v55, %v2802_v57  ;;  %v575_v15 = vsel %vm531_vm2, %v518_v46, %v393_v22 }
 0x192   :  { %v2036_v33 = vsel %vm9703_vm10, %v2034_v39, %v14703_v48  ;;  %14704 = vst [vmem:[#allocation26_spill] sm:$0xff] %v11735_v54  ;;  %v11746_v48 = vsel %vm9703_vm10, %v8268_v25, %v2048_v32  ;;  %v11749_v39 = vrot.slane %v1337_v50, %v9557_v52  ;;  %v2045_v62 = vsel %vm9703_vm10, %v2043_v13, %v2044_v6  ;;  %v14709_v50 = vld [vmem:[#allocation34_spill] sm:$0xff] }
 0x193   :  { %14705 = vst [vmem:[#allocation84_spill] sm:$0xff] %v11739_v59  ;;  %v11742_v44 = vpop.f32.mrb[12].mxu1  ;;  %8945 = vmatmul.mubr.msk.f32.gmra.mrb[22].mxu0 %vm3059_vm7, %v4916_v38  ;;  %v2804_v11 = vcombine.low %v2036_v33, %v2039_v8  ;;  %v2050_v58 = vrot.slane %v2048_v32, 2  ;;  %v11756_v22 = vcombine.high %v11721_v51, %v11721_v51  ;;  %8705 = vmatmul.mubr.msk.f32.gmra.mrb[66].mxu1 %vm3059_vm7, %v2803_v23  ;;  %v14711_v53 = vrot.slane %v11669_v17, 7 }
 0x194   :  { %14706 = vst [vmem:[#allocation85_spill] sm:$0xff] %v11742_v44  ;;  %14707 = vst [vmem:[#allocation86_spill] sm:$0xff] %v11749_v39  ;;  %v8625_v29 = vpop.f32.mrb[13].mxu1  ;;  %v2805_v25 = vcombine.low %v2042_v41, %v2045_v62  ;;  %8947 = vmatprep.mubr.msk.f32.mxu0 %vm9292_vm0, %v14542_v47  ;;  %v4918_v46 = vcombine.low %v14710_v40, %v14709_v50  ;;  %v11766_v6 = vrot.slane %v1321_v35, %v9557_v52  ;;  %v9253_v35 = vld [vmem:[%s14278_s0 + $0x180] sm:$0xff]  ;;  %v225_v50 = vpop.permute.xlu0 %224 }
 0x195   :  { %14708 = vst [vmem:[#allocation87_spill] sm:$0xff] %v11756_v22  ;;  %v2053_v13 = vrot.slane %v14711_v53, 2  ;;  %v2057_v32 = vrot.slane %v11707_v36, 7  ;;  %v1354_v55 = vcombine.high %v575_v15, %v575_v15  ;;  %8707 = vmatprep.mubr.msk.f32.mxu1 %vm9292_vm0, %v14542_v47  ;;  %v2812_v8 = vrot.slane %v2804_v11, %v9557_v52  ;;  %v14718_v40 = vld [vmem:[#allocation36_spill] sm:$0xff] }
 0x196   :  { %14712 = vst [vmem:[#allocation34_spill] sm:$0xff] %v11766_v6  ;;  %v2819_v38 = vrot.slane %v2805_v25, %v9557_v52  ;;  %v4932_v33 = vrot.slane %v4918_v46, %v9557_v52  ;;  %v11776_v41 = vrot.slane %v575_v15, %v9557_v52  ;;  %v519_v23 = vsel %vm474_vm1, %v9253_v35, %v223_v5 }
 0x197   :  { %v14714_v62 = vcombine.high %v10372_v21, %v10347_v16  ;;  %v2054_v11 = vrot.slane %v11735_v54, 7  ;;  %v2070_v25 = vrot.slane %v11756_v22, 7  ;;  %v14715_v46 = vmov %v14711_v53 }
 0x198   :  { %14713 = vst [vmem:[#allocation32_spill] sm:$0xff] %v11776_v41  ;;  %v2820_v15 = vcombine.low %v2812_v8, %v2819_v38  ;;  %v2052_v53 = vsel %vm9703_vm10, %v2050_v58, %v14715_v46  ;;  %v1591_v5 = vcombine.high %v11766_v6, %v11766_v6  ;;  %v11796_v35 = vrot.slane %v1354_v55, %v9557_v52  ;;  %v14717_v38 = vld [vmem:[#allocation38_spill] sm:$0xff] }
 0x199   :  { %v4925_v29 = vrot.slane %v14714_v62, %v9557_v52  ;;  %v2056_v21 = vrot.slane %v2054_v11, 2  ;;  %v397_v62 = vpop.permute.xlu1 %396  ;;  %v2059_v57 = vrot.slane %v2057_v32, 2  ;;  %v8269_v44 = vrot.slane %v11721_v51, 9 }
 0x19a   :  { %14716 = vst [vmem:[#allocation88_spill] sm:$0xff] %v11796_v35  ;;  %8708 = vmatmul.mubr.msk.f32.gmra.mrb[68].mxu1 %vm3059_vm7, %v2820_v15  ;;  %v576_v8 = vsel %vm531_vm2, %v519_v23, %v395_v0  ;;  %v4935_v22 = vcombine.low %v14718_v40, %v14717_v38  ;;  %v11805_v58 = vcombine.high %v11749_v39, %v11749_v39  ;;  %v2072_v23 = vrot.slane %v2070_v25, 2 }
 0x19b   :  { %v4933_v16 = vcombine.low %v4925_v29, %v4932_v33  ;;  %8710 = vmatprep.mubr.msk.f32.mxu1 %vm9292_vm0, %v14542_v47  ;;  %v2058_v33 = vsel %vm9703_vm10, %v2056_v21, %v2057_v32  ;;  %v2821_v29 = vcombine.low %v11746_v48, %v2052_v53  ;;  %v14721_v40 = vrot.slane %v11749_v39, 7 }
 0x19c   :  { %14719 = vst [vmem:[#allocation38_spill] sm:$0xff] %v11805_v58  ;;  %v2055_v46 = vsel %vm9703_vm10, %v2053_v13, %v2054_v11  ;;  %v11826_v32 = vcombine.high %v11776_v41, %v11776_v41  ;;  %v11830_v48 = vcombine.high %v11796_v35, %v11796_v35  ;;  %v11833_v53 = vrot.slane %v576_v8, %v9557_v52  ;;  %v227_v13 = vpop.permute.xlu0 %226  ;;  %v9254_v11 = vld [vmem:[%s14278_s0 + $0x188] sm:$0xff] }
 0x19d   :  { %8948 = vmatmul.mubr.msk.f32.gmra.mrb[24].mxu0 %vm3059_vm7, %v4933_v16  ;;  %v11814_v0 = vpop.f32.mrb[14].mxu1  ;;  %v2075_v15 = vrot.slane %v14721_v40, 2  ;;  %v14722_v16 = vrot.slane %v11739_v59, 7  ;;  %v2822_v21 = vcombine.low %v2055_v46, %v2058_v33  ;;  %v520_v40 = vsel %vm474_vm1, %v9254_v11, %v225_v50  ;;  %v399_v9 = vpop.permute.xlu1 %398 }
 0x19e   :  { %14720 = vst [vmem:[#allocation36_spill] sm:$0xff] %v11814_v0  ;;  %8950 = vmatprep.mubr.msk.f32.mxu0 %vm9292_vm0, %v14542_v47  ;;  %v8628_v55 = vpop.f32.mrb[15].mxu1  ;;  %14723 = vst [vmem:[#allocation89_spill] sm:$0xff] %v11826_v32  ;;  %v4949_v51 = vrot.slane %v4935_v22, %v9557_v52  ;;  %v2063_v54 = vrot.slane %v11766_v6, 7  ;;  %v14729_v36 = vrot.slane %v11776_v41, 7  ;;  %v2829_v46 = vrot.slane %v2821_v29, %v9557_v52 }
 0x19f   :  { %v2062_v38 = vrot.slane %v14722_v16, 2  ;;  %14724 = vst [vmem:[#allocation90_spill] sm:$0xff] %v11830_v48  ;;  %14725 = vst [vmem:[#allocation91_spill] sm:$0xff] %v11833_v53  ;;  %v14726_v55 = vld [vmem:[#allocation30_spill] sm:$0xff]  ;;  %v14727_v16 = vld [vmem:[#allocation31_spill] sm:$0xff]  ;;  %v2836_v56 = vrot.slane %v2822_v21, %v9557_v52  ;;  %v1370_v50 = vcombine.high %v576_v8, %v576_v8  ;;  %v577_v33 = vsel %vm531_vm2, %v520_v40, %v397_v62 }
 0x1a0   :  { %v14728_v0 = vcombine.low %v14726_v55, %v14727_v16  ;;  %v2081_v2 = vrot.slane %v14729_v36, 2  ;;  %v11855_v16 = vcombine.high %v11833_v53, %v11833_v53  ;;  %v9255_v8 = vld [vmem:[%s14278_s0 + $0x190] sm:$0xff]  ;;  %v2066_v29 = vrot.slane %v1591_v5, 7  ;;  %v14732_v62 = vld [vmem:[#allocation33_spill] sm:$0xff]  ;;  %v229_v22 = vpop.permute.xlu0 %228 }
 0x1a1   :  { %v2064_v55 = vsel %vm9703_vm10, %v2062_v38, %v2063_v54  ;;  %v2837_v36 = vcombine.low %v2829_v46, %v2836_v56  ;;  %v2071_v38 = vsel %vm9703_vm10, %v8269_v44, %v2070_v25  ;;  %v14733_v21 = vld [vmem:[#allocation39_spill] sm:$0xff]  ;;  %v14735_v46 = vld [vmem:[#allocation37_spill] sm:$0xff]  ;;  %v14738_v44 = vrot.slane %v11796_v35, 7 }
 0x1a2   :  { %v4942_v17 = vrot.slane %v14728_v0, %v9557_v52  ;;  %v2065_v0 = vrot.slane %v2063_v54, 2  ;;  %14730 = vst [vmem:[#allocation30_spill] sm:$0xff] %v11855_v16  ;;  %v4951_v40 = vcombine.low %v14733_v21, %v14732_v62  ;;  %v2092_v62 = vrot.slane %v11855_v16, 7 }
 0x1a3   :  { %8711 = vmatmul.mubr.msk.f32.gmra.mrb[70].mxu1 %vm3059_vm7, %v2837_v36  ;;  %v11883_v25 = vrot.slane %v14738_v44, 2  ;;  %v11887_v36 = vrot.slane %v1370_v50, %v9557_v52  ;;  %v1387_v21 = vcombine.high %v577_v33, %v577_v33  ;;  %v11896_v44 = vrot.slane %v577_v33, %v9557_v52 }
 0x1a4   :  { %v4950_v11 = vcombine.low %v4942_v17, %v4949_v51  ;;  %v521_v51 = vsel %vm474_vm1, %v9255_v8, %v227_v13  ;;  %v14731_v17 = vrot.slane %v11739_v59, 7  ;;  %v14734_v13 = vld [vmem:[#allocation35_spill] sm:$0xff]  ;;  %v11879_v5 = vpop.f32.mrb[16].mxu1  ;;  %8713 = vmatprep.mubr.msk.f32.mxu1 %vm9292_vm0, %v14542_v47 }
 0x1a5   :  { %14737 = vst [vmem:[#allocation31_spill] sm:$0xff] %v11879_v5  ;;  %14739 = vst [vmem:[#allocation33_spill] sm:$0xff] %v11887_v36  ;;  %v578_v50 = vsel %vm531_vm2, %v521_v51, %v399_v9  ;;  %v11913_v9 = vcombine.high %v11887_v36, %v11887_v36  ;;  %v8270_v51 = vrot.slane %v11833_v53, 9 }
 0x1a6   :  { %8951 = vmatmul.mubr.msk.f32.gmra.mrb[26].mxu0 %vm3059_vm7, %v4950_v11  ;;  %v2061_v54 = vsel %vm9703_vm10, %v2059_v57, %v14731_v17  ;;  %v14736_v11 = vcombine.low %v14734_v13, %v14735_v46  ;;  %v2076_v57 = vrot.slane %v11805_v58, 7  ;;  %v2067_v17 = vsel %vm9703_vm10, %v2065_v0, %v2066_v29  ;;  %14740 = vst [vmem:[#allocation39_spill] sm:$0xff] %v11896_v44 }
 0x1a7   :  { %v2838_v56 = vcombine.low %v2061_v54, %v2064_v55  ;;  %8953 = vmatprep.mubr.msk.f32.mxu0 %vm9292_vm0, %v14542_v47  ;;  %v8631_v54 = vpop.f32.mrb[17].mxu1  ;;  %v2839_v13 = vcombine.low %v2067_v17, %v2071_v38  ;;  %v4959_v46 = vrot.slane %v4951_v40, %v9557_v52  ;;  %v9256_v55 = vld [vmem:[%s14278_s0 + $0x198] sm:$0xff]  ;;  %v14741_v0 = vrot.slane %v11749_v39, 7  ;;  %14742 = vst [vmem:[#allocation35_spill] sm:$0xff] %v11913_v9 }
 0x1a8   :  { %v4966_v8 = vrot.slane %v14736_v11, %v9557_v52  ;;  %v401_v11 = vpop.permute.xlu1 %400  ;;  %v522_v5 = vsel %vm474_vm1, %v9256_v55, %v229_v22  ;;  %v2077_v33 = vsel %vm9703_vm10, %v2075_v15, %v2076_v57  ;;  %v2095_v22 = vrot.slane %v11887_v36, 7 }
 0x1a9   :  { %v2074_v29 = vsel %vm9703_vm10, %v2072_v23, %v14741_v0  ;;  %v2846_v38 = vrot.slane %v2838_v56, %v9557_v52  ;;  %v2853_v40 = vrot.slane %v2839_v13, %v9557_v52  ;;  %v2078_v55 = vrot.slane %v2076_v57, 2  ;;  %v11917_v54 = vpop.f32.mrb[18].mxu1 }
 0x1aa   :  { %v4967_v17 = vcombine.low %v4959_v46, %v4966_v8  ;;  %14743 = vst [vmem:[#allocation37_spill] sm:$0xff] %v11917_v54  ;;  %v14744_v56 = vrot.slane %v11826_v32, 7  ;;  %v2855_v15 = vcombine.low %v2074_v29, %v2077_v33  ;;  %v579_v13 = vsel %vm531_vm2, %v522_v5, %v401_v11  ;;  %v231_v46 = vpop.permute.xlu0 %230  ;;  %v8634_v0 = vpop.f32.mrb[19].mxu1  ;;  %v14749_v29 = vld [vmem:[#allocation40_spill] sm:$0xff]  ;;  %v14753_v54 = vld [vmem:[#allocation42_spill] sm:$0xff] }
 0x1ab   :  { %v2854_v23 = vcombine.low %v2846_v38, %v2853_v40  ;;  %v11927_v39 = vsel %vm9703_vm10, %v8270_v51, %v2092_v62  ;;  %v11930_v57 = vrot.slane %v1387_v21, %v9557_v52  ;;  %v11933_v38 = vrot.slane %v578_v50, %v9557_v52 }
 0x1ac   :  { %8954 = vmatmul.mubr.msk.f32.gmra.mrb[28].mxu0 %vm3059_vm7, %v4967_v17  ;;  %v2083_v8 = vsel %vm9703_vm10, %v2081_v2, %v14744_v56  ;;  %v14747_v40 = vrot.slane %v11776_v41, 7  ;;  %v11943_v5 = vcombine.high %v11896_v44, %v11896_v44  ;;  %v1403_v11 = vcombine.high %v578_v50, %v578_v50  ;;  %v403_v33 = vpop.permute.xlu1 %402  ;;  %v9257_v50 = vld [vmem:[%s14278_s0 + $0x1a0] sm:$0xff] }
 0x1ad   :  { %14745 = vst [vmem:[#allocation92_spill] sm:$0xff] %v11930_v57  ;;  %14746 = vst [vmem:[#allocation93_spill] sm:$0xff] %v11933_v38  ;;  %8956 = vmatprep.mubr.msk.f32.mxu0 %vm9292_vm0, %v14542_v47  ;;  %8714 = vmatmul.mubr.msk.f32.gmra.mrb[72].mxu1 %vm3059_vm7, %v2854_v23  ;;  %v4968_v17 = vcombine.low %v14749_v29, %v10580_v60  ;;  %v14750_v56 = vcombine.high %v10580_v60, %v10564_v14 }
 0x1ae   :  { %v2080_v2 = vsel %vm9703_vm10, %v2078_v55, %v14747_v40  ;;  %14748 = vst [vmem:[#allocation94_spill] sm:$0xff] %v11943_v5  ;;  %8716 = vmatprep.mubr.msk.f32.mxu1 %vm9292_vm0, %v14542_v47  ;;  %v1420_v55 = vcombine.high %v579_v13, %v579_v13  ;;  %v523_v23 = vsel %vm474_vm1, %v9257_v50, %v231_v46  ;;  %v11959_v40 = vrot.slane %v2095_v22, 2 }
 0x1af   :  { %v2856_v21 = vcombine.low %v2080_v2, %v2083_v8  ;;  %v4983_v0 = vrot.slane %v14750_v56, %v9557_v52  ;;  %v2094_v8 = vrot.slane %v2092_v62, 2  ;;  %v2863_v2 = vrot.slane %v2855_v15, %v9557_v52  ;;  %v14752_v56 = vld [vmem:[#allocation44_spill] sm:$0xff] }
 0x1b0   :  { %v11965_v51 = vcombine.high %v11933_v38, %v11933_v38  ;;  %v4976_v14 = vrot.slane %v4968_v17, %v9557_v52  ;;  %v580_v60 = vsel %vm531_vm2, %v523_v23, %v403_v33  ;;  %v4985_v36 = vcombine.low %v14753_v54, %v14752_v56 }
 0x1b1   :  { %v2870_v29 = vrot.slane %v2856_v21, %v9557_v52  ;;  %v11974_v46 = vrot.slane %v1403_v11, %v9557_v52  ;;  %v11977_v21 = vrot.slane %v579_v13, %v9557_v52  ;;  %v14755_v50 = vrot.slane %v11896_v44, 7  ;;  %v14759_v13 = vld [vmem:[#allocation43_spill] sm:$0xff] }
 0x1b2   :  { %14751 = vst [vmem:[#allocation40_spill] sm:$0xff] %v11965_v51  ;;  %v11985_v33 = vrot.slane %v1420_v55, %v9557_v52  ;;  %v4984_v54 = vcombine.low %v4976_v14, %v4983_v0  ;;  %v1436_v23 = vcombine.high %v580_v60, %v580_v60  ;;  %v11989_v11 = vrot.slane %v580_v60, %v9557_v52 }
 0x1b3   :  { %14754 = vst [vmem:[#allocation44_spill] sm:$0xff] %v11974_v46  ;;  %v2871_v15 = vcombine.low %v2863_v2, %v2870_v29  ;;  %v11981_v58 = vrot.slane %v14755_v50, 2  ;;  %v14758_v2 = vld [vmem:[#allocation41_spill] sm:$0xff]  ;;  %v14761_v50 = vrot.slane %v11826_v32, 7  ;;  %v4993_v55 = vrot.slane %v4985_v36, %v9557_v52 }
 0x1b4   :  { %14756 = vst [vmem:[#allocation42_spill] sm:$0xff] %v11985_v33  ;;  %14757 = vst [vmem:[#allocation95_spill] sm:$0xff] %v11989_v11  ;;  %v14760_v29 = vcombine.low %v14758_v2, %v14759_v13  ;;  %8957 = vmatmul.mubr.msk.f32.gmra.mrb[30].mxu0 %vm3059_vm7, %v4984_v54  ;;  %v14762_v0 = vrot.slane %v11830_v48, 7  ;;  %v2096_v60 = vsel %vm9703_vm10, %v2094_v8, %v2095_v22  ;;  %v12009_v2 = vpop.f32.mrb[20].mxu1  ;;  %v2107_v32 = vrot.slane %v11930_v57, 7 }
 0x1b5   :  { %8717 = vmatmul.mubr.msk.f32.gmra.mrb[74].mxu1 %vm3059_vm7, %v2871_v15  ;;  %v2084_v62 = vrot.slane %v14761_v50, 2  ;;  %v233_v15 = vpop.permute.xlu0 %232  ;;  %14763 = vst [vmem:[#allocation41_spill] sm:$0xff] %v12009_v2  ;;  %v12014_v54 = vcombine.high %v11977_v21, %v11977_v21  ;;  %8959 = vmatprep.mubr.msk.f32.mxu0 %vm9292_vm0, %v14542_v47  ;;  %v8637_v22 = vpop.f32.mrb[21].mxu1  ;;  %v12025_v8 = vcombine.high %v11985_v33, %v11985_v33  ;;  %v9258_v2 = vld [vmem:[%s14278_s0 + $0x1a8] sm:$0xff]  ;;  %v14789_v16 = vrot.slane %v11974_v46, 7 }
 0x1b6   :  { %v5000_v56 = vrot.slane %v14760_v29, %v9557_v52  ;;  %8719 = vmatprep.mubr.msk.f32.mxu1 %vm9292_vm0, %v14542_v47  ;;  %v2089_v14 = vsel %vm9703_vm10, %v11883_v25, %v14762_v0  ;;  %v14764_v29 = vrot.slane %v11796_v35, 7  ;;  %v2873_v13 = vcombine.low %v11927_v39, %v2096_v60 }
 0x1b7   :  { %14765 = vst [vmem:[#allocation43_spill] sm:$0xff] %v12025_v8  ;;  %v12030_v36 = vrot.slane %v1436_v23, %v9557_v52  ;;  %v2098_v22 = vrot.slane %v11913_v9, 7  ;;  %v14771_v35 = vrot.slane %v11974_v46, 7  ;;  %v14774_v9 = vld [vmem:[#allocation50_spill] sm:$0xff] }
 0x1b8   :  { %v2086_v25 = vsel %vm9703_vm10, %v2084_v62, %v14764_v29  ;;  %v5001_v50 = vcombine.low %v4993_v55, %v5000_v56  ;;  %v524_v62 = vsel %vm474_vm1, %v9258_v2, %v233_v15  ;;  %v405_v29 = vpop.permute.xlu1 %404  ;;  %v12039_v56 = vcombine.high %v11989_v11, %v11989_v11  ;;  %v14768_v55 = vld [vmem:[#allocation49_spill] sm:$0xff] }
 0x1b9   :  { %v2872_v0 = vcombine.low %v2086_v25, %v2089_v14  ;;  %14766 = vst [vmem:[#allocation96_spill] sm:$0xff] %v12030_v36  ;;  %v2887_v23 = vrot.slane %v2873_v13, %v9557_v52  ;;  %v14769_v14 = vld [vmem:[#allocation46_spill] sm:$0xff]  ;;  %v12048_v25 = vcombine.high %v11974_v46, %v11974_v46  ;;  %v8271_v15 = vrot.slane %v11933_v38, 9 }
 0x1ba   :  { %14767 = vst [vmem:[#allocation97_spill] sm:$0xff] %v12039_v56  ;;  %8960 = vmatmul.mubr.msk.f32.gmra.mrb[32].mxu0 %vm3059_vm7, %v5001_v50  ;;  %v5002_v60 = vcombine.low %v14769_v14, %v14768_v55  ;;  %v14770_v2 = vrot.slane %v11965_v51, 7  ;;  %v12055_v48 = vrot.slane %v14771_v35, 2  ;;  %v14772_v13 = vrot.slane %v11977_v21, 7  ;;  %v14773_v14 = vld [vmem:[#allocation45_spill] sm:$0xff] }
 0x1bb   :  { %v2880_v39 = vrot.slane %v2872_v0, %v9557_v52  ;;  %8962 = vmatprep.mubr.msk.f32.mxu0 %vm9292_vm0, %v14542_v47  ;;  %v581_v55 = vsel %vm531_vm2, %v524_v62, %v405_v29  ;;  %v5003_v38 = vcombine.low %v14774_v9, %v14773_v14  ;;  %v2100_v6 = vrot.slane %v2098_v22, 2  ;;  %v235_v9 = vpop.permute.xlu0 %234 }
 0x1bc   :  { %v2116_v17 = vrot.slane %v14770_v2, 2  ;;  %v12061_v50 = vrot.slane %v14772_v13, 2  ;;  %v14775_v2 = vrot.slane %v11985_v33, 7  ;;  %v2136_v59 = vrot.slane %v12039_v56, 7 }
 0x1bd   :  { %v2888_v0 = vcombine.low %v2880_v39, %v2887_v23  ;;  %v5010_v62 = vrot.slane %v5002_v60, %v9557_v52  ;;  %v5017_v29 = vrot.slane %v5003_v38, %v9557_v52  ;;  %v1453_v39 = vcombine.high %v581_v55, %v581_v55 }
 0x1be   :  { %v12069_v41 = vrot.slane %v14775_v2, 2  ;;  %v14776_v23 = vrot.slane %v11896_v44, 7  ;;  %v14777_v2 = vrot.slane %v11943_v5, 7  ;;  %v12087_v60 = vrot.slane %v581_v55, %v9557_v52  ;;  %v9259_v55 = vld [vmem:[%s14278_s0 + $0x1b0] sm:$0xff] }
 0x1bf   :  { %8720 = vmatmul.mubr.msk.f32.gmra.mrb[76].mxu1 %vm3059_vm7, %v2888_v0  ;;  %v407_v0 = vpop.permute.xlu1 %406  ;;  %v5018_v38 = vcombine.low %v5010_v62, %v5017_v29  ;;  %v2099_v13 = vsel %vm9703_vm10, %v11959_v40, %v2098_v22  ;;  %v525_v62 = vsel %vm474_vm1, %v9259_v55, %v235_v9  ;;  %v14780_v40 = vld [vmem:[#allocation51_spill] sm:$0xff]  ;;  %v12109_v5 = vcombine.high %v12030_v36, %v12030_v36 }
 0x1c0   :  { %8722 = vmatprep.mubr.msk.f32.mxu1 %vm9292_vm0, %v14542_v47  ;;  %v2102_v14 = vsel %vm9703_vm10, %v2100_v6, %v14776_v23  ;;  %v2106_v35 = vrot.slane %v14777_v2, 2  ;;  %v14778_v56 = vmov %v14777_v2  ;;  %v12097_v23 = vpop.f32.mrb[22].mxu1  ;;  %v5020_v22 = vcombine.low %v14780_v40, %v14631_v63 }
 0x1c1   :  { %v2105_v6 = vsel %vm9703_vm10, %v11981_v58, %v14778_v56  ;;  %14779 = vst [vmem:[#allocation49_spill] sm:$0xff] %v12097_v23  ;;  %v2889_v44 = vcombine.low %v2099_v13, %v2102_v14  ;;  %v8640_v29 = vpop.f32.mrb[23].mxu1  ;;  %14781 = vst [vmem:[#allocation46_spill] sm:$0xff] %v12109_v5  ;;  %v8272_v58 = vrot.slane %v11989_v11, 9  ;;  %8963 = vmatmul.mubr.msk.f32.gmra.mrb[34].mxu0 %vm3059_vm7, %v5018_v38  ;;  %v14782_v13 = vrot.slane %v12030_v36, 7 }
 0x1c2   :  { %v2108_v2 = vsel %vm9703_vm10, %v2106_v35, %v2107_v32  ;;  %v582_v35 = vsel %vm531_vm2, %v525_v62, %v407_v0  ;;  %8965 = vmatprep.mubr.msk.f32.mxu0 %vm9292_vm0, %v14542_v47  ;;  %v5034_v55 = vrot.slane %v5020_v22, %v9557_v52  ;;  %v2109_v40 = vrot.slane %v2107_v32, 2  ;;  %v14784_v0 = vld [vmem:[#allocation48_spill] sm:$0xff] }
 0x1c3   :  { %v2890_v56 = vcombine.low %v2105_v6, %v2108_v2  ;;  %v12116_v14 = vrot.slane %v14782_v13, 2  ;;  %v12121_v9 = vrot.slane %v582_v35, %v9557_v52  ;;  %v2897_v29 = vrot.slane %v2889_v44, %v9557_v52  ;;  %v14783_v6 = vld [vmem:[#allocation47_spill] sm:$0xff] }
 0x1c4   :  { %v14785_v2 = vcombine.low %v14783_v6, %v14784_v0  ;;  %v14786_v13 = vcombine.high %v11930_v57, %v11930_v57  ;;  %v12135_v11 = vsel %vm9703_vm10, %v8272_v58, %v2136_v59  ;;  %v12138_v22 = vrot.slane %v1453_v39, %v9557_v52  ;;  %v237_v6 = vpop.permute.xlu0 %236  ;;  %v409_v58 = vpop.permute.xlu1 %408 }
 0x1c5   :  { %v2904_v38 = vrot.slane %v2890_v56, %v9557_v52  ;;  %v12142_v32 = vcombine.high %v12087_v60, %v12087_v60  ;;  %v14787_v44 = vrot.slane %v11965_v51, 7  ;;  %v14460_v0 = vrot.slane %v12087_v60, 7 }
 0x1c6   :  { %v5027_v62 = vrot.slane %v14785_v2, %v9557_v52  ;;  %v2110_v23 = vrot.slane %v14786_v13, 7  ;;  %v1469_v13 = vcombine.high %v582_v35, %v582_v35  ;;  %v12151_v39 = vcombine.high %v12121_v9, %v12121_v9 }
 0x1c7   :  { %v2115_v56 = vsel %vm9703_vm10, %v8271_v15, %v14787_v44  ;;  %v2905_v2 = vcombine.low %v2897_v29, %v2904_v38  ;;  %v2118_v51 = vsel %vm9703_vm10, %v2116_v17, %v14789_v16  ;;  %v2120_v15 = vrot.slane %v12048_v25, 7  ;;  %v12160_v44 = vpop.f32.mrb[24].mxu1 }
 0x1c8   :  { %v5035_v57 = vcombine.low %v5027_v62, %v5034_v55  ;;  %14788 = vst [vmem:[#allocation45_spill] sm:$0xff] %v12151_v39  ;;  %v2111_v53 = vsel %vm9703_vm10, %v2109_v40, %v2110_v23  ;;  %14790 = vst [vmem:[#allocation50_spill] sm:$0xff] %v12160_v44  ;;  %v12162_v29 = vrot.slane %v2136_v59, 2  ;;  %v9260_v23 = vld [vmem:[%s14278_s0 + $0x1b8] sm:$0xff]  ;;  %v8643_v17 = vpop.f32.mrb[25].mxu1 }
 0x1c9   :  { %8723 = vmatmul.mubr.msk.f32.gmra.mrb[78].mxu1 %vm3059_vm7, %v2905_v2  ;;  %v2906_v35 = vcombine.low %v2111_v53, %v2115_v56  ;;  %v526_v55 = vsel %vm474_vm1, %v9260_v23, %v237_v6  ;;  %v14791_v40 = vld [vmem:[#allocation55_spill] sm:$0xff]  ;;  %v2121_v59 = vsel %vm9703_vm10, %v12055_v48, %v2120_v15  ;;  %v12189_v56 = vrot.slane %v1469_v13, %v9557_v52  ;;  %v239_v17 = vpop.permute.xlu0 %238 }
 0x1ca   :  { %8966 = vmatmul.mubr.msk.f32.gmra.mrb[36].mxu0 %vm3059_vm7, %v5035_v57  ;;  %v5037_v16 = vcombine.low %v14791_v40, %v10857_v7  ;;  %8725 = vmatprep.mubr.msk.f32.mxu1 %vm9292_vm0, %v14542_v47  ;;  %v583_v53 = vsel %vm531_vm2, %v526_v55, %v409_v58  ;;  %v14792_v57 = vrot.slane %v12014_v54, 7  ;;  %v12186_v7 = vrot.slane %v14460_v0, 2  ;;  %v14806_v0 = vld [vmem:[#allocation53_spill] sm:$0xff] }
 0x1cb   :  { %8968 = vmatprep.mubr.msk.f32.mxu0 %vm9292_vm0, %v14542_v47  ;;  %14793 = vst [vmem:[#allocation51_spill] sm:$0xff] %v12189_v56  ;;  %v2907_v6 = vcombine.low %v2118_v51, %v2121_v59  ;;  %v1486_v2 = vcombine.high %v583_v53, %v583_v53  ;;  %v12192_v23 = vrot.slane %v583_v53, %v9557_v52  ;;  %v2122_v40 = vrot.slane %v2120_v15, 2  ;;  %v12207_v53 = vpop.f32.mrb[26].mxu1 }
 0x1cc   :  { %v2128_v62 = vrot.slane %v14792_v57, 2  ;;  %v14794_v48 = vcombine.high %v14631_v63, %v10779_v10  ;;  %v5051_v55 = vrot.slane %v5037_v16, %v9557_v52  ;;  %v14461_v57 = vrot.slane %v12151_v39, 7  ;;  %14796 = vst [vmem:[#allocation47_spill] sm:$0xff] %v12207_v53 }
 0x1cd   :  { %v2914_v38 = vrot.slane %v2906_v35, %v9557_v52  ;;  %v2921_v13 = vrot.slane %v2907_v6, %v9557_v52  ;;  %v14795_v51 = vrot.slane %v12014_v54, 7  ;;  %v12210_v10 = vrot.slane %v1486_v2, %v9557_v52  ;;  %v14802_v2 = vld [vmem:[#allocation57_spill] sm:$0xff] }
 0x1ce   :  { %v5044_v58 = vrot.slane %v14794_v48, %v9557_v52  ;;  %v14798_v15 = vrot.slane %v11977_v21, 7  ;;  %v14799_v35 = vrot.slane %v11985_v33, 7  ;;  %v8646_v48 = vpop.f32.mrb[27].mxu1  ;;  %v14815_v33 = vld [vmem:[#allocation60_spill] sm:$0xff] }
 0x1cf   :  { %v2127_v59 = vsel %vm9703_vm10, %v12061_v50, %v14795_v51  ;;  %14797 = vst [vmem:[#allocation48_spill] sm:$0xff] %v12210_v10  ;;  %v12223_v50 = vcombine.high %v12189_v56, %v12189_v56  ;;  %v12239_v48 = vrot.slane %v14461_v57, 2  ;;  %v14805_v57 = vld [vmem:[#allocation52_spill] sm:$0xff]  ;;  %v14816_v46 = vrot.slane %v12210_v10, 7 }
 0x1d0   :  { %v5052_v63 = vcombine.low %v5044_v58, %v5051_v55  ;;  %v2124_v16 = vsel %vm9703_vm10, %v2122_v40, %v14798_v15  ;;  %v2130_v6 = vsel %vm9703_vm10, %v2128_v62, %v14799_v35  ;;  %v2922_v58 = vcombine.low %v2914_v38, %v2921_v13  ;;  %v411_v55 = vpop.permute.xlu1 %410  ;;  %v9261_v13 = vld [vmem:[%s14278_s0 + $0x1c0] sm:$0xff] }
 0x1d1   :  { %14800 = vst [vmem:[#allocation55_spill] sm:$0xff] %v12223_v50  ;;  %v12229_v40 = vcombine.high %v12192_v23, %v12192_v23  ;;  %v14801_v62 = vrot.slane %v12025_v8, 7  ;;  %v2923_v35 = vcombine.low %v2124_v16, %v2127_v59  ;;  %v12252_v59 = vcombine.high %v12210_v10, %v12210_v10 }
 0x1d2   :  { %8969 = vmatmul.mubr.msk.f32.gmra.mrb[38].mxu0 %vm3059_vm7, %v5052_v63  ;;  %8726 = vmatmul.mubr.msk.f32.gmra.mrb[80].mxu1 %vm3059_vm7, %v2922_v58  ;;  %v527_v63 = vsel %vm474_vm1, %v9261_v13, %v239_v17  ;;  %v241_v17 = vpop.permute.xlu0 %240  ;;  %v14807_v16 = vcombine.low %v14805_v57, %v14806_v0  ;;  %v9262_v0 = vld [vmem:[%s14278_s0 + $0x1c8] sm:$0xff] }
 0x1d3   :  { %v2133_v15 = vsel %vm9703_vm10, %v12069_v41, %v14801_v62  ;;  %8971 = vmatprep.mubr.msk.f32.mxu0 %vm9292_vm0, %v14542_v47  ;;  %v5054_v41 = vcombine.low %v14802_v2, %v10892_v24  ;;  %14803 = vst [vmem:[#allocation57_spill] sm:$0xff] %v12252_v59  ;;  %8728 = vmatprep.mubr.msk.f32.mxu1 %vm9292_vm0, %v14542_v47  ;;  %v14811_v2 = vrot.slane %v12189_v56, 7 }
 0x1d4   :  { %v2924_v38 = vcombine.low %v2130_v6, %v2133_v15  ;;  %v2931_v6 = vrot.slane %v2923_v35, %v9557_v52  ;;  %v584_v58 = vsel %vm531_vm2, %v527_v63, %v411_v55  ;;  %v5061_v51 = vrot.slane %v14807_v16, %v9557_v52  ;;  %v413_v16 = vpop.permute.xlu1 %412  ;;  %v12294_v53 = vpop.f32.mrb[28].mxu1 }
 0x1d5   :  { %v1502_v15 = vcombine.high %v584_v58, %v584_v58  ;;  %v12261_v13 = vrot.slane %v584_v58, %v9557_v52  ;;  %v5068_v24 = vrot.slane %v5054_v41, %v9557_v52  ;;  %v14808_v35 = vrot.slane %v12030_v36, 7  ;;  %14813 = vst [vmem:[#allocation99_spill] sm:$0xff] %v12294_v53  ;;  %v8649_v8 = vpop.f32.mrb[29].mxu1 }
 0x1d6   :  { %v2938_v62 = vrot.slane %v2924_v38, %v9557_v52  ;;  %v2142_v38 = vrot.slane %v12109_v5, 7  ;;  %v528_v57 = vsel %vm474_vm1, %v9262_v0, %v241_v17  ;;  %v14814_v0 = vld [vmem:[#allocation56_spill] sm:$0xff]  ;;  %v14825_v5 = vrot.slane %v12142_v32, 7 }
 0x1d7   :  { %14804 = vst [vmem:[#allocation98_spill] sm:$0xff] %v12261_v13  ;;  %v2140_v55 = vsel %vm9703_vm10, %v12162_v29, %v14808_v35  ;;  %v12276_v58 = vrot.slane %v1502_v15, %v9557_v52  ;;  %v12280_v41 = vcombine.high %v12261_v13, %v12261_v13  ;;  %v12288_v29 = vrot.slane %v14811_v2, 2 }
 0x1d8   :  { %v2939_v63 = vcombine.low %v2931_v6, %v2938_v62  ;;  %v14812_v6 = vrot.slane %v12192_v23, 7  ;;  %v5069_v15 = vcombine.low %v5061_v51, %v5068_v24  ;;  %v2144_v35 = vrot.slane %v2142_v38, 2 }
 0x1d9   :  { %14809 = vst [vmem:[#allocation52_spill] sm:$0xff] %v12276_v58  ;;  %14810 = vst [vmem:[#allocation53_spill] sm:$0xff] %v12280_v41  ;;  %v2940_v17 = vcombine.low %v12135_v11, %v2140_v55  ;;  %v5070_v2 = vcombine.low %v14815_v33, %v14814_v0  ;;  %v2180_v51 = vrot.slane %v12280_v41, 7  ;;  %v14817_v24 = vrot.slane %v12087_v60, 7 }
 0x1da   :  { %v12292_v62 = vrot.slane %v14812_v6, 2  ;;  %8729 = vmatmul.mubr.msk.f32.gmra.mrb[82].mxu1 %vm3059_vm7, %v2939_v63  ;;  %v12304_v6 = vrot.slane %v14816_v46, 2  ;;  %8972 = vmatmul.mubr.msk.f32.gmra.mrb[40].mxu0 %vm3059_vm7, %v5069_v15  ;;  %v585_v55 = vsel %vm531_vm2, %v528_v57, %v413_v16  ;;  %v12317_v33 = vcombine.high %v12276_v58, %v12276_v58  ;;  %v243_v63 = vpop.permute.xlu0 %242 }
 0x1db   :  { %8731 = vmatprep.mubr.msk.f32.mxu1 %vm9292_vm0, %v14542_v47  ;;  %v2146_v11 = vsel %vm9703_vm10, %v2144_v35, %v14817_v24  ;;  %v8274_v46 = vrot.slane %v12261_v13, 9  ;;  %v2143_v8 = vsel %vm9703_vm10, %v12116_v14, %v2142_v38  ;;  %8974 = vmatprep.mubr.msk.f32.mxu0 %vm9292_vm0, %v14542_v47  ;;  %v14819_v15 = vrot.slane %v12142_v32, 7  ;;  %v14821_v14 = vld [vmem:[#allocation58_spill] sm:$0xff]  ;;  %v14822_v38 = vld [vmem:[#allocation59_spill] sm:$0xff] }
 0x1dc   :  { %14818 = vst [vmem:[#allocation56_spill] sm:$0xff] %v12317_v33  ;;  %v2941_v57 = vcombine.low %v2143_v8, %v2146_v11  ;;  %v1519_v16 = vcombine.high %v585_v55, %v585_v55  ;;  %v12329_v24 = vrot.slane %v585_v55, %v9557_v52  ;;  %v2948_v36 = vrot.slane %v2940_v17, %v9557_v52  ;;  %v9263_v17 = vld [vmem:[%s14278_s0 + $0x1d0] sm:$0xff] }
 0x1dd   :  { %v2150_v0 = vrot.slane %v14819_v15, 2  ;;  %v5078_v44 = vrot.slane %v5070_v2, %v9557_v52  ;;  %v14823_v53 = vcombine.low %v14821_v14, %v14822_v38  ;;  %v2151_v41 = vrot.slane %v12138_v22, 7 }
 0x1de   :  { %14820 = vst [vmem:[#allocation60_spill] sm:$0xff] %v12329_v24  ;;  %v12340_v15 = vsel %vm9703_vm10, %v8274_v46, %v2180_v51  ;;  %v12342_v11 = vrot.slane %v2180_v51, 2  ;;  %v2955_v55 = vrot.slane %v2941_v57, %v9557_v52  ;;  %v529_v2 = vsel %vm474_vm1, %v9263_v17, %v243_v63  ;;  %v415_v46 = vpop.permute.xlu1 %414 }
 0x1df   :  { %v5085_v13 = vrot.slane %v14823_v53, %v9557_v52  ;;  %v12350_v8 = vrot.slane %v1519_v16, %v9557_v52  ;;  %v2152_v14 = vsel %vm9703_vm10, %v2150_v0, %v2151_v41  ;;  %v2153_v38 = vrot.slane %v2151_v41, 2  ;;  %v12364_v16 = vpop.f32.mrb[30].mxu1 }
 0x1e0   :  { %v2956_v35 = vcombine.low %v2948_v36, %v2955_v55  ;;  %v12356_v51 = vcombine.high %v12329_v24, %v12329_v24  ;;  %v2149_v63 = vsel %vm9703_vm10, %v12186_v7, %v14825_v5  ;;  %14826 = vst [vmem:[#allocation59_spill] sm:$0xff] %v12364_v16  ;;  %v14828_v36 = vcombine.high %v12138_v22, %v12138_v22  ;;  %v8652_v7 = vpop.f32.mrb[31].mxu1 }
 0x1e1   :  { %v5086_v53 = vcombine.low %v5078_v44, %v5085_v13  ;;  %v14827_v44 = vrot.slane %v12276_v58, 7  ;;  %v14829_v0 = vrot.slane %v12151_v39, 7  ;;  %v14830_v55 = vrot.slane %v12121_v9, 9  ;;  %v245_v39 = vpop.permute.xlu0 %244 }
 0x1e2   :  { %14824 = vst [vmem:[#allocation58_spill] sm:$0xff] %v12356_v51  ;;  %v2154_v41 = vrot.slane %v14828_v36, 7  ;;  %v2957_v5 = vcombine.low %v2149_v63, %v2152_v14  ;;  %8732 = vmatmul.mubr.msk.f32.gmra.mrb[84].mxu1 %vm3059_vm7, %v2956_v35  ;;  %v14832_v36 = vcombine.high %v10982_v49, %v10963_v18  ;;  %v14833_v63 = vrot.slane %v12329_v24, 7 }
 0x1e3   :  { %v12368_v13 = vrot.slane %v14827_v44, 2  ;;  %8975 = vmatmul.mubr.msk.f32.gmra.mrb[42].mxu0 %vm3059_vm7, %v5086_v53  ;;  %v2159_v17 = vsel %vm9703_vm10, %v14830_v55, %v14829_v0  ;;  %v586_v53 = vsel %vm531_vm2, %v529_v2, %v415_v46  ;;  %v14831_v44 = vld [vmem:[#allocation61_spill] sm:$0xff]  ;;  %v2164_v0 = vrot.slane %v12223_v50, 7  ;;  %8734 = vmatprep.mubr.msk.f32.mxu1 %vm9292_vm0, %v14542_v47 }
 0x1e4   :  { %8977 = vmatprep.mubr.msk.f32.mxu0 %vm9292_vm0, %v14542_v47  ;;  %v5087_v57 = vcombine.low %v14831_v44, %v10982_v49  ;;  %v5102_v16 = vrot.slane %v14832_v36, %v9557_v52  ;;  %v2155_v35 = vsel %vm9703_vm10, %v2153_v38, %v2154_v41  ;;  %v1535_v2 = vcombine.high %v586_v53, %v586_v53  ;;  %v9264_v38 = vld [vmem:[%s14278_s0 + $0x1d8] sm:$0xff] }
 0x1e5   :  { %v12398_v46 = vrot.slane %v586_v53, %v9557_v52  ;;  %v12402_v18 = vrot.slane %v14833_v63, 2  ;;  %v2958_v55 = vcombine.low %v2155_v35, %v2159_v17  ;;  %v530_v41 = vsel %vm474_vm1, %v9264_v38, %v245_v39  ;;  %v12422_v35 = vpop.f32.mrb[32].mxu1 }
 0x1e6   :  { %v5095_v7 = vrot.slane %v5087_v57, %v9557_v52  ;;  %v12407_v44 = vrot.slane %v1535_v2, %v9557_v52  ;;  %v14836_v53 = vrot.slane %v12189_v56, 7  ;;  %v417_v57 = vpop.permute.xlu1 %416  ;;  %14837 = vst [vmem:[#allocation101_spill] sm:$0xff] %v12422_v35  ;;  %v2965_v2 = vrot.slane %v2957_v5, %v9557_v52  ;;  %v8655_v50 = vpop.f32.mrb[33].mxu1  ;;  %v14913_v56 = vld [vmem:[#allocation89_spill] sm:$0xff] }
 0x1e7   :  { %v12411_v36 = vcombine.high %v12398_v46, %v12398_v46  ;;  %v2972_v63 = vrot.slane %v2958_v55, %v9557_v52  ;;  %v2165_v49 = vsel %vm9703_vm10, %v12288_v29, %v2164_v0  ;;  %v8275_v38 = vrot.slane %v12398_v46, 9 }
 0x1e8   :  { %14834 = vst [vmem:[#allocation61_spill] sm:$0xff] %v12407_v44  ;;  %v2162_v17 = vsel %vm9703_vm10, %v12239_v48, %v14836_v53  ;;  %v5103_v14 = vcombine.low %v5095_v7, %v5102_v16  ;;  %v12431_v39 = vcombine.high %v12407_v44, %v12407_v44  ;;  %v2166_v53 = vrot.slane %v2164_v0, 2 }
 0x1e9   :  { %14835 = vst [vmem:[#allocation100_spill] sm:$0xff] %v12411_v36  ;;  %v2202_v48 = vrot.slane %v12411_v36, 7  ;;  %v2973_v35 = vcombine.low %v2965_v2, %v2972_v63  ;;  %v14839_v5 = vrot.slane %v12229_v40, 7  ;;  %v2974_v29 = vcombine.low %v2162_v17, %v2165_v49  ;;  %v14842_v17 = vld [vmem:[#allocation63_spill] sm:$0xff] }
 0x1ea   :  { %14838 = vst [vmem:[#allocation102_spill] sm:$0xff] %v12431_v39  ;;  %8978 = vmatmul.mubr.msk.f32.gmra.mrb[44].mxu0 %vm3059_vm7, %v5103_v14  ;;  %v587_v50 = vsel %vm531_vm2, %v530_v41, %v417_v57  ;;  %v14477_v7 = vrot.slane %v12407_v44, 7  ;;  %v14840_v0 = vrot.slane %v12192_v23, 7  ;;  %v5104_v57 = vcombine.low %v14842_v17, %v11029_v1 }
 0x1eb   :  { %v2171_v16 = vsel %vm9703_vm10, %v12292_v62, %v14839_v5  ;;  %v12444_v55 = vrot.slane %v2202_v48, 2  ;;  %8980 = vmatprep.mubr.msk.f32.mxu0 %vm9292_vm0, %v14542_v47  ;;  %v1552_v2 = vcombine.high %v587_v50, %v587_v50  ;;  %8735 = vmatmul.mubr.msk.f32.gmra.mrb[86].mxu1 %vm3059_vm7, %v2973_v35  ;;  %v2982_v49 = vrot.slane %v2974_v29, %v9557_v52 }
 0x1ec   :  { %v2168_v14 = vsel %vm9703_vm10, %v2166_v53, %v14840_v0  ;;  %v12456_v41 = vrot.slane %v587_v50, %v9557_v52  ;;  %8737 = vmatprep.mubr.msk.f32.mxu1 %vm9292_vm0, %v14542_v47  ;;  %v14844_v53 = vld [vmem:[#allocation62_spill] sm:$0xff]  ;;  %v5122_v29 = vcombine.low %v11121_v20, %v11045_v19  ;;  %v5112_v20 = vrot.slane %v5104_v57, %v9557_v52  ;;  %v12502_v57 = vpop.f32.mrb[34].mxu1 }
 0x1ed   :  { %v2975_v62 = vcombine.low %v2168_v14, %v2171_v16  ;;  %v12463_v63 = vrot.slane %v1552_v2, %v9557_v52  ;;  %v14845_v5 = vcombine.low %v14844_v53, %v10997_v37  ;;  %v5121_v16 = vcombine.low %v11128_v42, %v11148_v61  ;;  %14848 = vst [vmem:[#allocation105_spill] sm:$0xff] %v12502_v57  ;;  %v14903_v57 = vld [vmem:[#allocation15_spill] sm:$0xff] }
 0x1ee   :  { %14841 = vst [vmem:[#allocation103_spill] sm:$0xff] %v12456_v41  ;;  %v12476_v1 = vcombine.high %v12456_v41, %v12456_v41  ;;  %v14478_v0 = vrot.slane %v12456_v41, 7  ;;  %v2207_v37 = vrot.slane %v14477_v7, 2  ;;  %v5136_v7 = vrot.slane %v5122_v29, %v9557_v52 }
 0x1ef   :  { %14843 = vst [vmem:[#allocation63_spill] sm:$0xff] %v12463_v63  ;;  %v5119_v35 = vrot.slane %v14845_v5, %v9557_v52  ;;  %v2989_v50 = vrot.slane %v2975_v62, %v9557_v52  ;;  %v12485_v42 = vcombine.high %v12463_v63, %v12463_v63  ;;  %v14479_v19 = vrot.slane %v12463_v63, 7 }
 0x1f0   :  { %14846 = vst [vmem:[#allocation62_spill] sm:$0xff] %v12476_v1  ;;  %v12491_v2 = vrot.slane %v14478_v0, 2  ;;  %v5129_v17 = vrot.slane %v5121_v16, %v9557_v52  ;;  %v14850_v62 = vrot.slane %v12252_v59, 7  ;;  %v14851_v0 = vrot.slane %v12276_v58, 7  ;;  %v14917_v58 = vld [vmem:[#allocation94_spill] sm:$0xff] }
 0x1f1   :  { %14847 = vst [vmem:[#allocation104_spill] sm:$0xff] %v12485_v42  ;;  %v2990_v61 = vcombine.low %v2982_v49, %v2989_v50  ;;  %v12499_v5 = vrot.slane %v14479_v19, 2  ;;  %v5120_v14 = vcombine.low %v5112_v20, %v5119_v35  ;;  %v14849_v49 = vrot.slane %v12229_v40, 7  ;;  %v8658_v20 = vpop.f32.mrb[35].mxu1 }
 0x1f2   :  { %v2177_v16 = vsel %vm9703_vm10, %v12304_v6, %v14850_v62  ;;  %v2184_v35 = vsel %vm9703_vm10, %v12342_v11, %v14851_v0  ;;  %v5139_v29 = vcombine.low %v11094_v3, %v11200_v12  ;;  %v2186_v62 = vrot.slane %v12317_v33, 7  ;;  %v14904_v33 = vld [vmem:[#allocation21_spill] sm:$0xff] }
 0x1f3   :  { %8738 = vmatmul.mubr.msk.f32.gmra.mrb[88].mxu1 %vm3059_vm7, %v2990_v61  ;;  %v2172_v50 = vrot.slane %v14849_v49, 2  ;;  %v2220_v61 = vrot.slane %v12485_v42, 7  ;;  %8981 = vmatmul.mubr.msk.f32.gmra.mrb[46].mxu0 %vm3059_vm7, %v5120_v14  ;;  %v5137_v49 = vcombine.low %v5129_v17, %v5136_v7  ;;  %v2992_v6 = vcombine.low %v12340_v15, %v2184_v35  ;;  %v14918_v42 = vld [vmem:[#allocation39_spill] sm:$0xff] }
 0x1f4   :  { %8740 = vmatprep.mubr.msk.f32.mxu1 %vm9292_vm0, %v14542_v47  ;;  %8983 = vmatprep.mubr.msk.f32.mxu0 %vm9292_vm0, %v14542_v47  ;;  %v14852_v11 = vrot.slane %v12210_v10, 7  ;;  %v14853_v0 = vcombine.low %v11063_v34, %v11081_v26  ;;  %v5153_v20 = vrot.slane %v5139_v29, %v9557_v52  ;;  %v14854_v7 = vrot.slane %v12356_v51, 7  ;;  %v14906_v51 = vld [vmem:[#allocation84_spill] sm:$0xff]  ;;  %v14907_v10 = vld [vmem:[#allocation29_spill] sm:$0xff] }
 0x1f5   :  { %v3006_v35 = vrot.slane %v2992_v6, %v9557_v52  ;;  %v2188_v19 = vrot.slane %v2186_v62, 2  ;;  %v2187_v34 = vsel %vm9703_vm10, %v12368_v13, %v2186_v62  ;;  %v2195_v26 = vrot.slane %v12350_v8, 7 }
 0x1f6   :  { %v2174_v3 = vsel %vm9703_vm10, %v2172_v50, %v14852_v11  ;;  %v5146_v14 = vrot.slane %v14853_v0, %v9557_v52  ;;  %v2194_v15 = vrot.slane %v14854_v7, 2  ;;  %v14855_v53 = vmov %v14854_v7 }
 0x1f7   :  { %v2991_v17 = vcombine.low %v2174_v3, %v2177_v16  ;;  %v2193_v50 = vsel %vm9703_vm10, %v12402_v18, %v14855_v53  ;;  %v5156_v29 = vcombine.low %v11212_v30, %v11237_v43  ;;  %8984 = vmatmul.mubr.msk.f32.gmra.mrb[48].mxu0 %vm3059_vm7, %v5137_v49  ;;  %v14856_v6 = vrot.slane %v12329_v24, 7 }
 0x1f8   :  { %v5154_v11 = vcombine.low %v5146_v14, %v5153_v20  ;;  %v14857_v18 = vcombine.high %v12350_v8, %v12350_v8  ;;  %v2203_v13 = vsel %vm9703_vm10, %v8275_v38, %v2202_v48  ;;  %8986 = vmatprep.mubr.msk.f32.mxu0 %vm9292_vm0, %v14542_v47  ;;  %v2196_v49 = vsel %vm9703_vm10, %v2194_v15, %v2195_v26 }
 0x1f9   :  { %v2999_v16 = vrot.slane %v2991_v17, %v9557_v52  ;;  %v2190_v3 = vsel %vm9703_vm10, %v2188_v19, %v14856_v6  ;;  %v5170_v19 = vrot.slane %v5156_v29, %v9557_v52  ;;  %v2197_v0 = vrot.slane %v2195_v26, 2 }
 0x1fa   :  { %v2198_v53 = vrot.slane %v14857_v18, 7  ;;  %v3008_v62 = vcombine.low %v2187_v34, %v2190_v3  ;;  %v3009_v20 = vcombine.low %v2193_v50, %v2196_v49  ;;  %v14858_v7 = vrot.slane %v12407_v44, 7  ;;  %v12590_v3 = vpop.f32.mrb[36].mxu1  ;;  %v14921_v44 = vld [vmem:[#allocation92_spill] sm:$0xff] }
 0x1fb   :  { %v3007_v14 = vcombine.low %v2999_v16, %v3006_v35  ;;  %v2208_v38 = vrot.slane %v12431_v39, 7  ;;  %v14859_v15 = vcombine.high %v11200_v12, %v11179_v4  ;;  %v14860_v35 = vld [vmem:[#allocation67_spill] sm:$0xff]  ;;  %8987 = vmatmul.mubr.msk.f32.gmra.mrb[50].mxu0 %vm3059_vm7, %v5154_v11  ;;  %v14862_v11 = vld [vmem:[#allocation69_spill] sm:$0xff]  ;;  %v4080_v59 = vcombine.low %v14907_v10, %v14906_v51 }
 0x1fc   :  { %v2206_v17 = vsel %vm9703_vm10, %v12444_v55, %v14858_v7  ;;  %v3016_v48 = vrot.slane %v3008_v62, %v9557_v52  ;;  %v2199_v26 = vsel %vm9703_vm10, %v2197_v0, %v2198_v53  ;;  %v5173_v50 = vcombine.low %v14860_v35, %v11280_v45  ;;  %14861 = vst [vmem:[#allocation67_spill] sm:$0xff] %v12590_v3  ;;  %v14901_v3 = vld [vmem:[#allocation91_spill] sm:$0xff] }
 0x1fd   :  { %v5163_v34 = vrot.slane %v14859_v15, %v9557_v52  ;;  %8741 = vmatmul.mubr.msk.f32.gmra.mrb[90].mxu1 %vm3059_vm7, %v3007_v14  ;;  %v3023_v55 = vrot.slane %v3009_v20, %v9557_v52  ;;  %v2209_v29 = vsel %vm9703_vm10, %v2207_v37, %v2208_v38  ;;  %v3025_v16 = vcombine.low %v2199_v26, %v2203_v13  ;;  %v8661_v13 = vpop.f32.mrb[37].mxu1 }
 0x1fe   :  { %v2210_v6 = vrot.slane %v2208_v38, 2  ;;  %8743 = vmatprep.mubr.msk.f32.mxu1 %vm9292_vm0, %v14542_v47  ;;  %8989 = vmatprep.mubr.msk.f32.mxu0 %vm9292_vm0, %v14542_v47  ;;  %v3026_v18 = vcombine.low %v2206_v17, %v2209_v29  ;;  %v14863_v53 = vcombine.low %v11247_v27, %v14862_v11  ;;  %v14864_v62 = vrot.slane %v12476_v1, 7  ;;  %v14869_v29 = vld [vmem:[#allocation70_spill] sm:$0xff]  ;;  %v14919_v1 = vld [vmem:[#allocation35_spill] sm:$0xff] }
 0x1ff   :  { %v5171_v45 = vcombine.low %v5163_v34, %v5170_v19  ;;  %v3024_v0 = vcombine.low %v3016_v48, %v3023_v55  ;;  %v5187_v14 = vrot.slane %v5173_v50, %v9557_v52  ;;  %v14865_v20 = vrot.slane %v12456_v41, 7  ;;  %v14916_v41 = vld [vmem:[#allocation19_spill] sm:$0xff] }
 0x200   :  { %v5180_v49 = vrot.slane %v14863_v53, %v9557_v52  ;;  %v2216_v37 = vrot.slane %v14864_v62, 2  ;;  %v14866_v19 = vmov %v14864_v62  ;;  %v3033_v38 = vrot.slane %v3025_v16, %v9557_v52 }
 0x201   :  { %v2212_v7 = vsel %vm9703_vm10, %v2210_v6, %v14865_v20  ;;  %v2215_v17 = vsel %vm9703_vm10, %v12491_v2, %v14866_v19  ;;  %v3040_v15 = vrot.slane %v3026_v18, %v9557_v52  ;;  %v14867_v34 = vrot.slane %v12463_v63, 7  ;;  %8744 = vmatmul.mubr.msk.f32.gmra.mrb[92].mxu1 %vm3059_vm7, %v3024_v0  ;;  %8990 = vmatmul.mubr.msk.f32.gmra.mrb[52].mxu0 %vm3059_vm7, %v5171_v45  ;;  %v14868_v2 = vld [vmem:[#allocation71_spill] sm:$0xff]  ;;  %v14870_v6 = vld [vmem:[#allocation54_spill] sm:$0xff]  ;;  %v14871_v18 = vld [vmem:[#allocation5_spill] sm:$0xff]  ;;  %v12639_v19 = vpop.f32.mrb[38].mxu1 }
 0x202   :  { %v2221_v26 = vsel %vm9703_vm10, %v12499_v5, %v2220_v61  ;;  %v3042_v50 = vcombine.low %v2212_v7, %v2215_v17  ;;  %v5189_v16 = vcombine.low %v14869_v29, %v14868_v2  ;;  %v8388_v53 = vcombine.high %v14871_v18, %v14870_v6  ;;  %8746 = vmatprep.mubr.msk.f32.mxu1 %vm9292_vm0, %v14542_v47  ;;  %v14872_v45 = vld [vmem:[#allocation72_spill] sm:$0xff]  ;;  %v14875_v20 = vld [vmem:[#allocation7_spill] sm:$0xff] }
 0x203   :  { %v2218_v48 = vsel %vm9703_vm10, %v2216_v37, %v14867_v34  ;;  %v3041_v62 = vcombine.low %v3033_v38, %v3040_v15  ;;  %8992 = vmatprep.mubr.msk.f32.mxu0 %vm9292_vm0, %v14542_v47  ;;  %v5188_v28 = vcombine.low %v5180_v49, %v5187_v14  ;;  %v14873_v37 = vld [vmem:[#allocation73_spill] sm:$0xff]  ;;  %v5206_v7 = vcombine.low %v14875_v20, %v14871_v18  ;;  %v8664_v14 = vpop.f32.mrb[39].mxu1  ;;  %v14877_v38 = vld [vmem:[#allocation12_spill] sm:$0xff]  ;;  %v14878_v15 = vld [vmem:[#allocation75_spill] sm:$0xff] }
 0x204   :  { %v3043_v55 = vcombine.low %v2218_v48, %v2221_v26  ;;  %v3050_v5 = vrot.slane %v3042_v50, %v9557_v52  ;;  %v14874_v13 = vcombine.low %v14872_v45, %v14873_v37  ;;  %14876 = vst [vmem:[#allocation69_spill] sm:$0xff] %v12639_v19  ;;  %v5197_v49 = vrot.slane %v5189_v16, %v9557_v52  ;;  %v14879_v26 = vld [vmem:[#allocation66_spill] sm:$0xff] }
 0x205   :  { %8747 = vmatmul.mubr.msk.f32.gmra.mrb[94].mxu1 %vm3059_vm7, %v3041_v62  ;;  %8993 = vmatmul.mubr.msk.f32.gmra.mrb[54].mxu0 %vm3059_vm7, %v5188_v28  ;;  %v5224_v34 = vcombine.low %v14878_v15, %v14877_v38  ;;  %v5221_v48 = vrot.slane %v8388_v53, %v9557_v52  ;;  %v3911_v50 = vcombine.low %v14879_v26, %v11212_v30  ;;  %v14881_v14 = vld [vmem:[#allocation14_spill] sm:$0xff]  ;;  %v14883_v30 = vld [vmem:[#allocation16_spill] sm:$0xff] }
 0x206   :  { %v3057_v61 = vrot.slane %v3043_v55, %v9557_v52  ;;  %v5204_v0 = vrot.slane %v14874_v13, %v9557_v52  ;;  %8749 = vmatprep.mubr.msk.f32.mxu1 %vm9292_vm0, %v14542_v47  ;;  %8995 = vmatprep.mubr.msk.f32.mxu0 %vm9292_vm0, %v14542_v47  ;;  %v3961_v55 = vcombine.low %v14873_v37, %v14875_v20  ;;  %v14882_v53 = vld [vmem:[#allocation10_spill] sm:$0xff] }
 0x207   :  { %v3962_v16 = vcombine.low %v14871_v18, %v14870_v6  ;;  %v3910_v28 = vcombine.low %v11200_v12, %v11179_v4  ;;  %v5214_v13 = vrot.slane %v5206_v7, %v9557_v52  ;;  %v3996_v19 = vcombine.low %v14882_v53, %v14881_v14  ;;  %v14884_v37 = vld [vmem:[#allocation74_spill] sm:$0xff]  ;;  %v12668_v6 = vpop.f32.mrb[40].mxu1  ;;  %v14886_v7 = vld [vmem:[#allocation9_spill] sm:$0xff] }
 0x208   :  { %v3058_v17 = vcombine.low %v3050_v5, %v3057_v61  ;;  %v5205_v62 = vcombine.low %v5197_v49, %v5204_v0  ;;  %v14880_v5 = vld [vmem:[#allocation68_spill] sm:$0xff]  ;;  %v5223_v20 = vcombine.low %v14884_v37, %v14883_v30  ;;  %14885 = vst [vmem:[#allocation71_spill] sm:$0xff] %v12668_v6  ;;  %v3925_v12 = vrot.slane %v3911_v50, %v9557_v52  ;;  %v8667_v18 = vpop.f32.mrb[41].mxu1  ;;  %v14900_v6 = vld [vmem:[#allocation30_spill] sm:$0xff] }
 0x209   :  { %v3944_v61 = vcombine.low %v14880_v5, %v14869_v29  ;;  %v5222_v4 = vcombine.low %v5214_v13, %v5221_v48  ;;  %v5238_v29 = vrot.slane %v5224_v34, %v9557_v52  ;;  %v3928_v0 = vcombine.low %v14862_v11, %v14860_v35  ;;  %v14887_v35 = vld [vmem:[#allocation64_spill] sm:$0xff]  ;;  %v14888_v11 = vld [vmem:[#allocation65_spill] sm:$0xff]  ;;  %v14897_v34 = vld [vmem:[#allocation82_spill] sm:$0xff] }
 0x20a   :  { %8750 = vmatmul.mubr.msk.f32.gmra.mrb[96].mxu1 %vm3059_vm7, %v3058_v17  ;;  %8996 = vmatmul.mubr.msk.f32.gmra.mrb[56].mxu0 %vm3059_vm7, %v5205_v62  ;;  %v5241_v17 = vcombine.low %v14881_v14, %v14886_v7  ;;  %v12681_v49 = vrot.slane %v3961_v55, %v9557_v52  ;;  %v12684_v26 = vrot.slane %v3962_v16, %v9557_v52  ;;  %v14890_v16 = vld [vmem:[#allocation8_spill] sm:$0xff]  ;;  %v14892_v18 = vld [vmem:[#allocation77_spill] sm:$0xff] }
 0x20b   :  { %8833 = vmatprep.mubr.msk.f32.mxu1 %vm9292_vm0, %v14542_v47  ;;  %8998 = vmatprep.mubr.msk.f32.mxu0 %vm9292_vm0, %v14542_v47  ;;  %v3927_v48 = vcombine.low %v11237_v43, %v11247_v27  ;;  %v3952_v50 = vrot.slane %v3944_v61, %v9557_v52  ;;  %v3918_v62 = vrot.slane %v3910_v28, %v9557_v52  ;;  %v14891_v13 = vld [vmem:[#allocation76_spill] sm:$0xff] }
 0x20c   :  { %v14889_v5 = vcombine.low %v14887_v35, %v14888_v11  ;;  %v5231_v55 = vrot.slane %v5223_v20, %v9557_v52  ;;  %v5240_v14 = vcombine.low %v14891_v13, %v14890_v16  ;;  %v12703_v27 = vrot.slane %v3996_v19, %v9557_v52  ;;  %v14893_v35 = vld [vmem:[#allocation78_spill] sm:$0xff]  ;;  %v14894_v19 = vld [vmem:[#allocation17_spill] sm:$0xff]  ;;  %v14895_v16 = vld [vmem:[#allocation80_spill] sm:$0xff] }
 0x20d   :  { %v3926_v28 = vcombine.low %v3918_v62, %v3925_v12  ;;  %v3945_v61 = vcombine.low %v14868_v2, %v14872_v45  ;;  %v3942_v20 = vrot.slane %v3928_v0, %v9557_v52  ;;  %v5258_v11 = vcombine.low %v14893_v35, %v14892_v18  ;;  %v14896_v62 = vld [vmem:[#allocation11_spill] sm:$0xff] }
 0x20e   :  { %8834 = vmatmul.mubr.msk.f32.vlgmr.msra.gmra.mrb[50].mxu1 %vm3059_vm7, %v14889_v5  ;;  %8999 = vmatmul.mubr.msk.f32.gmra.mrb[58].mxu0 %vm3059_vm7, %v5222_v4  ;;  %v5239_v53 = vcombine.low %v5231_v55, %v5238_v29  ;;  %v5255_v4 = vrot.slane %v5241_v17, %v9557_v52  ;;  %v5257_v12 = vcombine.low %v14895_v16, %v14894_v19  ;;  %v14898_v17 = vld [vmem:[#allocation22_spill] sm:$0xff]  ;;  %v14899_v55 = vld [vmem:[#allocation81_spill] sm:$0xff] }
 0x20f   :  { %8836 = vmatprep.mubr.msk.f32.mxu1 %vm9292_vm0, %v14542_v47  ;;  %9001 = vmatprep.mubr.msk.f32.mxu0 %vm9292_vm0, %v14542_v47  ;;  %v4063_v2 = vcombine.low %v14897_v34, %v11673_v31  ;;  %v8389_v45 = vcombine.high %v14892_v18, %v14896_v62  ;;  %v3935_v29 = vrot.slane %v3927_v48, %v9557_v52 }
 0x210   :  { %v5248_v0 = vrot.slane %v5240_v14, %v9557_v52  ;;  %v4115_v43 = vcombine.low %v14901_v3, %v14900_v6  ;;  %v3959_v34 = vrot.slane %v3945_v61, %v9557_v52  ;;  %v5272_v14 = vrot.slane %v5258_v11, %v9557_v52  ;;  %v14908_v61 = vld [vmem:[#allocation26_spill] sm:$0xff] }
 0x211   :  { %v5275_v5 = vcombine.low %v14903_v57, %v14899_v55  ;;  %v5291_v3 = vcombine.low %v14898_v17, %v14904_v33  ;;  %v12746_v24 = vrot.slane %v4063_v2, %v9557_v52  ;;  %v14911_v2 = vld [vmem:[#allocation32_spill] sm:$0xff]  ;;  %v4199_v39 = vcombine.low %v12087_v60, %v12142_v32 }
 0x212   :  { %8837 = vmatmul.mubr.msk.f32.gmra.mrb[52].mxu1 %vm3059_vm7, %v3926_v28  ;;  %9002 = vmatmul.mubr.msk.f32.gmra.mrb[60].mxu0 %vm3059_vm7, %v5239_v53  ;;  %v12738_v28 = vpop.f32.mrb[42].mxu1  ;;  %v3943_v53 = vcombine.low %v3935_v29, %v3942_v20  ;;  %v5256_v48 = vcombine.low %v5248_v0, %v5255_v4  ;;  %v14909_v20 = vld [vmem:[#allocation25_spill] sm:$0xff]  ;;  %v14910_v4 = vld [vmem:[#allocation34_spill] sm:$0xff] }
 0x213   :  { %8839 = vmatprep.mubr.msk.f32.mxu1 %vm9292_vm0, %v14542_v47  ;;  %9004 = vmatprep.mubr.msk.f32.mxu0 %vm9292_vm0, %v14542_v47  ;;  %14902 = vst [vmem:[#allocation70_spill] sm:$0xff] %v12738_v28  ;;  %v8670_v36 = vpop.f32.mrb[43].mxu1  ;;  %14905 = vst [vmem:[#allocation54_spill] sm:$0xff] %v12746_v24  ;;  %v5309_v28 = vcombine.low %v14908_v61, %v14907_v10  ;;  %v4081_v29 = vcombine.low %v14910_v4, %v14909_v20  ;;  %v14912_v0 = vld [vmem:[#allocation38_spill] sm:$0xff] }
 0x214   :  { %v5265_v36 = vrot.slane %v5257_v12, %v9557_v52  ;;  %v12764_v10 = vrot.slane %v4115_v43, %v9557_v52  ;;  %v14915_v12 = vld [vmem:[#allocation24_spill] sm:$0xff]  ;;  %v5376_v43 = vcombine.low %v14919_v1, %v14918_v42  ;;  %v12807_v24 = vpop.f32.mrb[44].mxu1 }
 0x215   :  { %v5292_v63 = vcombine.low %v14916_v41, %v14915_v12  ;;  %v14923_v12 = vld [vmem:[#allocation46_spill] sm:$0xff] }
 0x216   :  { %8840 = vmatmul.mubr.msk.f32.gmra.mrb[54].mxu1 %vm3059_vm7, %v3943_v53  ;;  %9005 = vmatmul.mubr.msk.f32.gmra.mrb[62].mxu0 %vm3059_vm7, %v5256_v48  ;;  %14914 = vst [vmem:[#allocation5_spill] sm:$0xff] %v12764_v10  ;;  %v3960_v53 = vcombine.low %v3952_v50, %v3959_v34  ;;  %v5273_v11 = vcombine.low %v5265_v36, %v5272_v14  ;;  %v14920_v10 = vld [vmem:[#allocation93_spill] sm:$0xff]  ;;  %v14922_v34 = vld [vmem:[#allocation6_spill] sm:$0xff] }
 0x217   :  { %8842 = vmatprep.mubr.msk.f32.mxu1 %vm9292_vm0, %v14542_v47  ;;  %9007 = vmatprep.mubr.msk.f32.mxu0 %vm9292_vm0, %v14542_v47  ;;  %v5289_v48 = vrot.slane %v5275_v5, %v9557_v52  ;;  %v8391_v17 = vcombine.high %v14921_v44, %v14920_v10  ;;  %v5282_v5 = vrot.slane %v8389_v45, %v9557_v52 }
 0x218   :  { %v3978_v14 = vcombine.low %v14922_v34, %v14884_v37  ;;  %v5306_v37 = vrot.slane %v5292_v63, %v9557_v52  ;;  %v12802_v34 = vrot.slane %v4080_v59, %v9557_v52  ;;  %v12805_v50 = vrot.slane %v4081_v29, %v9557_v52  ;;  %v8673_v63 = vpop.f32.mrb[45].mxu1 }
 0x219   :  { %v4200_v36 = vcombine.low %v12138_v22, %v12121_v9  ;;  %v14925_v59 = vcombine.low %v12681_v49, %v12684_v26  ;;  %v4012_v49 = vcombine.low %v14886_v7, %v14895_v16  ;;  %v4047_v7 = vcombine.low %v14904_v33, %v14916_v41  ;;  %v14930_v41 = vld [vmem:[#allocation86_spill] sm:$0xff] }
 0x21a   :  { %8843 = vmatmul.mubr.msk.f32.gmra.mrb[56].mxu1 %vm3059_vm7, %v3960_v53  ;;  %9008 = vmatmul.mubr.msk.f32.gmra.mrb[64].mxu0 %vm3059_vm7, %v5273_v11  ;;  %v14924_v11 = vcombine.low %v14883_v30, %v14878_v15  ;;  %v5290_v53 = vcombine.low %v5282_v5, %v5289_v48  ;;  %v5299_v15 = vrot.slane %v5291_v3, %v9557_v52  ;;  %v14926_v48 = vld [vmem:[#allocation23_spill] sm:$0xff] }
 0x21b   :  { %8845 = vmatprep.mubr.msk.f32.mxu1 %vm9292_vm0, %v14542_v47  ;;  %9010 = vmatprep.mubr.msk.f32.mxu0 %vm9292_vm0, %v14542_v47  ;;  %v3995_v30 = vcombine.low %v14877_v38, %v14891_v13  ;;  %v3986_v29 = vrot.slane %v3978_v14, %v9557_v52  ;;  %v5308_v5 = vcombine.low %v11673_v31, %v14926_v48 }
 0x21c   :  { %v3993_v45 = vrot.slane %v14924_v11, %v9557_v52  ;;  %v8393_v31 = vcombine.high %v12350_v8, %v12398_v46  ;;  %v5307_v13 = vcombine.low %v5299_v15, %v5306_v37  ;;  %v5323_v14 = vrot.slane %v5309_v28, %v9557_v52  ;;  %v14928_v11 = vld [vmem:[#allocation18_spill] sm:$0xff]  ;;  %v14929_v37 = vld [vmem:[#allocation33_spill] sm:$0xff] }
 0x21d   :  { %v4003_v63 = vrot.slane %v3995_v30, %v9557_v52  ;;  %v4030_v3 = vcombine.low %v14928_v11, %v14903_v57  ;;  %v5316_v28 = vrot.slane %v5308_v5, %v9557_v52  ;;  %v4020_v33 = vrot.slane %v4012_v49, %v9557_v52 }
 0x21e   :  { %8846 = vmatmul.mubr.msk.f32.gmra.mrb[58].mxu1 %vm3059_vm7, %v14925_v59  ;;  %9011 = vmatmul.mubr.msk.f32.gmra.mrb[66].mxu0 %vm3059_vm7, %v5290_v53  ;;  %v3994_v26 = vcombine.low %v3986_v29, %v3993_v45  ;;  %v12839_v53 = vpop.f32.mrb[46].mxu1  ;;  %v14927_v59 = vcombine.low %v14894_v19, %v14893_v35  ;;  %v5325_v45 = vcombine.low %v14906_v51, %v14910_v4  ;;  %v14933_v29 = vld [vmem:[#allocation88_spill] sm:$0xff] }
 0x21f   :  { %8848 = vmatprep.mubr.msk.f32.mxu1 %vm9292_vm0, %v14542_v47  ;;  %9013 = vmatprep.mubr.msk.f32.mxu0 %vm9292_vm0, %v14542_v47  ;;  %v8676_v16 = vpop.f32.mrb[47].mxu1  ;;  %v5360_v35 = vcombine.low %v14900_v6, %v14929_v37  ;;  %v4011_v57 = vcombine.low %v4003_v63, %v12703_v27  ;;  %v5342_v19 = vcombine.low %v14930_v41, %v14912_v0  ;;  %v14932_v6 = vld [vmem:[#allocation90_spill] sm:$0xff] }
 0x220   :  { %v4027_v38 = vrot.slane %v14927_v59, %v9557_v52  ;;  %v5324_v15 = vcombine.low %v5316_v28, %v5323_v14  ;;  %v14931_v51 = vcombine.high %v14910_v4, %v14909_v20  ;;  %v5359_v5 = vcombine.low %v14933_v29, %v14932_v6  ;;  %v14936_v59 = vld [vmem:[#allocation22_spill] sm:$0xff] }
 0x221   :  { %v4064_v27 = vcombine.low %v14926_v48, %v14908_v61  ;;  %v14934_v49 = vcombine.low %v14911_v2, %v14913_v56  ;;  %v4061_v14 = vrot.slane %v4047_v7, %v9557_v52  ;;  %v5333_v20 = vrot.slane %v5325_v45, %v9557_v52  ;;  %v12885_v48 = vpop.f32.mrb[0].mxu0 }
 0x222   :  { %8849 = vmatmul.mubr.msk.f32.gmra.mrb[60].mxu1 %vm3059_vm7, %v3994_v26  ;;  %9014 = vmatmul.mubr.msk.f32.gmra.mrb[68].mxu0 %vm3059_vm7, %v5307_v13  ;;  %v5340_v30 = vrot.slane %v14931_v51, %v9557_v52  ;;  %v4028_v11 = vcombine.low %v4020_v33, %v4027_v38  ;;  %v4044_v26 = vrot.slane %v4030_v3, %v9557_v52  ;;  %v8913_v28 = vpop.f32.mrb[1].mxu0  ;;  %v14938_v33 = vld [vmem:[#allocation44_spill] sm:$0xff] }
 0x223   :  { %8851 = vmatprep.mubr.msk.f32.mxu1 %vm9292_vm0, %v14542_v47  ;;  %9016 = vmatprep.mubr.msk.f32.mxu0 %vm9292_vm0, %v14542_v47  ;;  %v5357_v13 = vrot.slane %v14934_v49, %v9557_v52  ;;  %v5374_v4 = vrot.slane %v5360_v35, %v9557_v52  ;;  %v5377_v61 = vcombine.low %v14917_v58, %v14921_v44  ;;  %v5715_v49 = vpop.f32.mrb[2].mxu0 }
 0x224   :  { %v14935_v3 = vcombine.low %v14892_v18, %v14896_v62  ;;  %v5350_v63 = vrot.slane %v5342_v19, %v9557_v52  ;;  %v14937_v7 = vcombine.low %v14899_v55, %v14936_v59  ;;  %v5341_v45 = vcombine.low %v5333_v20, %v5340_v30  ;;  %v12912_v55 = vpop.f32.mrb[48].mxu1  ;;  %v8916_v20 = vpop.f32.mrb[3].mxu0 }
 0x225   :  { %v5367_v35 = vrot.slane %v5359_v5, %v9557_v52  ;;  %v12910_v19 = vrot.slane %v5376_v43, %v9557_v52  ;;  %v5391_v6 = vrot.slane %v5377_v61, %v9557_v52  ;;  %v14939_v5 = vld [vmem:[#allocation87_spill] sm:$0xff]  ;;  %v12927_v43 = vrot.slane %v4199_v39, %v9557_v52  ;;  %v14952_v20 = vld [vmem:[#allocation96_spill] sm:$0xff] }
 0x226   :  { %8852 = vmatmul.mubr.msk.f32.gmra.mrb[62].mxu1 %vm3059_vm7, %v4011_v57  ;;  %9017 = vmatmul.mubr.msk.f32.gmra.mrb[70].mxu0 %vm3059_vm7, %v5324_v15  ;;  %v4037_v38 = vrot.slane %v14935_v3, %v9557_v52  ;;  %v4054_v16 = vrot.slane %v14937_v7, %v9557_v52  ;;  %v12902_v57 = vrot.slane %v4064_v27, %v9557_v52 }
 0x227   :  { %8854 = vmatprep.mubr.msk.f32.mxu1 %vm9292_vm0, %v14542_v47  ;;  %9019 = vmatprep.mubr.msk.f32.mxu0 %vm9292_vm0, %v14542_v47  ;;  %v5394_v15 = vcombine.low %v14938_v33, %v12048_v25  ;;  %v5358_v18 = vcombine.low %v5350_v63, %v5357_v13  ;;  %v5375_v30 = vcombine.low %v5367_v35, %v5374_v4  ;;  %v14941_v13 = vld [vmem:[#allocation61_spill] sm:$0xff]  ;;  %v14942_v4 = vld [vmem:[#allocation54_spill] sm:$0xff]  ;;  %v14947_v35 = vld [vmem:[#allocation63_spill] sm:$0xff] }
 0x228   :  { %v4045_v51 = vcombine.low %v4037_v38, %v4044_v26  ;;  %v4062_v62 = vcombine.low %v4054_v16, %v4061_v14  ;;  %v4097_v27 = vcombine.low %v14939_v5, %v14930_v41  ;;  %v8679_v26 = vpop.f32.mrb[49].mxu1  ;;  %v14940_v41 = vld [vmem:[#allocation102_spill] sm:$0xff]  ;;  %v4079_v61 = vcombine.low %v14942_v4, %v12902_v57  ;;  %v14943_v38 = vld [vmem:[#allocation43_spill] sm:$0xff]  ;;  %v14953_v4 = vld [vmem:[#allocation97_spill] sm:$0xff] }
 0x229   :  { %v5513_v14 = vcombine.low %v14941_v13, %v14940_v41  ;;  %v12943_v3 = vrot.slane %v8391_v17, %v9557_v52  ;;  %v12946_v39 = vrot.slane %v5394_v15, %v9557_v52  ;;  %v14944_v63 = vld [vmem:[#allocation42_spill] sm:$0xff]  ;;  %v14945_v59 = vcombine.low %v14912_v0, %v14911_v2 }
 0x22a   :  { %8855 = vmatmul.mubr.msk.f32.gmra.mrb[64].mxu1 %vm3059_vm7, %v4028_v11  ;;  %9020 = vmatmul.mubr.msk.f32.gmra.mrb[72].mxu0 %vm3059_vm7, %v5341_v45  ;;  %v12933_v11 = vrot.slane %v4200_v36, %v9557_v52  ;;  %v5411_v36 = vcombine.low %v14944_v63, %v14943_v38  ;;  %v12962_v17 = vrot.slane %v8393_v31, %v9557_v52  ;;  %v14946_v45 = vld [vmem:[#allocation104_spill] sm:$0xff] }
 0x22b   :  { %8857 = vmatprep.mubr.msk.f32.mxu1 %vm9292_vm0, %v14542_v47  ;;  %9022 = vmatprep.mubr.msk.f32.mxu0 %vm9292_vm0, %v14542_v47  ;;  %v12954_v7 = vrot.slane %v14945_v59, %v9557_v52  ;;  %v12965_v28 = vrot.slane %v5513_v14, %v9557_v52  ;;  %v5392_v2 = vcombine.low %v12910_v19, %v5391_v6  ;;  %v14949_v19 = vld [vmem:[#allocation103_spill] sm:$0xff]  ;;  %v14950_v6 = vld [vmem:[#allocation62_spill] sm:$0xff] }
 0x22c   :  { %v4114_v0 = vcombine.low %v14913_v56, %v14933_v29  ;;  %v5530_v57 = vcombine.low %v14947_v35, %v14946_v45  ;;  %v12979_v31 = vrot.slane %v4097_v27, %v9557_v52  ;;  %v14948_v15 = vcombine.low %v11977_v21, %v12014_v54 }
 0x22d   :  { %v5409_v29 = vcombine.low %v12943_v3, %v12946_v39  ;;  %v14951_v5 = vcombine.low %v14949_v19, %v14950_v6  ;;  %v5427_v38 = vcombine.low %v14953_v4, %v14952_v20  ;;  %v14954_v3 = vcombine.low %v14923_v12, %v12087_v60 }
 0x22e   :  { %8858 = vmatmul.mubr.msk.f32.gmra.mrb[66].mxu1 %vm3059_vm7, %v4045_v51  ;;  %9023 = vmatmul.mubr.msk.f32.gmra.mrb[74].mxu0 %vm3059_vm7, %v5358_v18  ;;  %v12985_v51 = vrot.slane %v14948_v15, %v9557_v52  ;;  %v12992_v18 = vrot.slane %v5411_v36, %v9557_v52  ;;  %v13001_v26 = vrot.slane %v5530_v57, %v9557_v52  ;;  %v5720_v57 = vpop.f32.mrb[4].mxu0 }
 0x22f   :  { %8860 = vmatprep.mubr.msk.f32.mxu1 %vm9292_vm0, %v14542_v47  ;;  %9025 = vmatprep.mubr.msk.f32.mxu0 %vm9292_vm0, %v14542_v47  ;;  %v12998_v27 = vrot.slane %v14951_v5, %v9557_v52  ;;  %v4113_v14 = vcombine.low %v12979_v31, %v12954_v7  ;;  %v13011_v39 = vrot.slane %v14954_v3, %v9557_v52  ;;  %v14957_v31 = vld [vmem:[#allocation13_spill] sm:$0xff] }
 0x230   :  { %v4285_v36 = vcombine.low %v14950_v6, %v14947_v35  ;;  %v13018_v59 = vrot.slane %v4114_v0, %v9557_v52  ;;  %v4131_v7 = vcombine.low %v14929_v37, %v14919_v1  ;;  %v14955_v60 = vcombine.low %v14918_v42, %v14917_v58  ;;  %v8919_v0 = vpop.f32.mrb[5].mxu0  ;;  %v14958_v58 = vld [vmem:[#allocation79_spill] sm:$0xff]  ;;  %v14959_v6 = vld [vmem:[#allocation20_spill] sm:$0xff] }
 0x231   :  { %v14956_v1 = vcombine.low %v14940_v41, %v14949_v19  ;;  %v5426_v35 = vcombine.low %v12985_v51, %v12992_v18  ;;  %v13047_v15 = vadd.f32 %v12885_v48, %v14957_v31  ;;  %v13050_v42 = vadd.f32 %v5715_v49, %v14958_v58  ;;  %v14960_v41 = vld [vmem:[#allocation5_spill] sm:$0xff] }
 0x232   :  { %8861 = vmatmul.mubr.msk.f32.gmra.mrb[68].mxu1 %vm3059_vm7, %v4062_v62  ;;  %9026 = vmatmul.mubr.msk.f32.gmra.mrb[76].mxu0 %vm3059_vm7, %v5375_v30  ;;  %v13032_v62 = vrot.slane %v14955_v60, %v9557_v52  ;;  %v13041_v30 = vrot.slane %v4285_v36, %v9557_v52  ;;  %v13053_v5 = vadd.f32 %v5720_v57, %v14959_v6 }
 0x233   :  { %8863 = vmatprep.mubr.msk.f32.mxu1 %vm9292_vm0, %v14542_v47  ;;  %9028 = vmatprep.mubr.msk.f32.mxu0 %vm9292_vm0, %v14542_v47  ;;  %v13038_v37 = vrot.slane %v14956_v1, %v9557_v52  ;;  %v4130_v19 = vcombine.low %v13018_v59, %v14960_v41  ;;  %v13058_v3 = vrot.slane %v5427_v38, %v9557_v52 }
 0x234   :  { %v5444_v36 = vcombine.low %v12142_v32, %v12138_v22  ;;  %v13067_v48 = vrot.slane %v4131_v7, %v9557_v52  ;;  %v6360_v49 = vcombine.high %v13047_v15, %v13047_v15  ;;  %v6367_v18 = vrot.slane %v13047_v15, %v9557_v52 }
 0x235   :  { %v14961_v32 = vcombine.high %v12138_v22, %v12121_v9  ;;  %v6384_v38 = vrot.slane %v13050_v42, %v9557_v52  ;;  %v6394_v57 = vcombine.high %v13053_v5, %v13053_v5  ;;  %v6401_v60 = vrot.slane %v13053_v5, %v9557_v52 }
 0x236   :  { %8864 = vmatmul.mubr.msk.f32.gmra.mrb[70].mxu1 %vm3059_vm7, %v4079_v61  ;;  %9029 = vmatmul.mubr.msk.f32.gmra.mrb[78].mxu0 %vm3059_vm7, %v5392_v2  ;;  %v6377_v2 = vcombine.high %v13050_v42, %v13050_v42  ;;  %v6374_v59 = vrot.slane %v6360_v49, %v9557_v52  ;;  %v6375_v7 = vcombine.high %v6367_v18, %v6367_v18 }
 0x237   :  { %8866 = vmatprep.mubr.msk.f32.mxu1 %vm9292_vm0, %v14542_v47  ;;  %9031 = vmatprep.mubr.msk.f32.mxu0 %vm9292_vm0, %v14542_v47  ;;  %v13081_v61 = vrot.slane %v14961_v32, %v9557_v52  ;;  %v5443_v9 = vcombine.low %v13058_v3, %v13011_v39  ;;  %v13095_v22 = vrot.slane %v5444_v36, %v9557_v52  ;;  %v14963_v39 = vld [vmem:[#allocation40_spill] sm:$0xff]  ;;  %v14965_v32 = vld [vmem:[#allocation51_spill] sm:$0xff] }
 0x238   :  { %v6391_v1 = vrot.slane %v6377_v2, %v9557_v52  ;;  %v6392_v0 = vcombine.high %v6384_v38, %v6384_v38  ;;  %v14962_v31 = vcombine.low %v12802_v34, %v12805_v50  ;;  %v6376_v58 = vcombine.high %v6374_v59, %v6374_v59  ;;  %v5725_v50 = vpop.f32.mrb[6].mxu0  ;;  %v14964_v34 = vld [vmem:[#allocation55_spill] sm:$0xff] }
 0x239   :  { %v7193_v6 = vcombine.low %v6367_v18, %v6375_v7  ;;  %v6408_v41 = vrot.slane %v6394_v57, %v9557_v52  ;;  %v4149_v3 = vcombine.low %v14963_v39, %v14938_v33  ;;  %v5461_v2 = vcombine.low %v14965_v32, %v14964_v34  ;;  %v14966_v18 = vld [vmem:[#allocation83_spill] sm:$0xff]  ;;  %v8922_v57 = vpop.f32.mrb[7].mxu0 }
 0x23a   :  { %8867 = vmatmul.mubr.msk.f32.gmra.mrb[72].mxu1 %vm3059_vm7, %v14962_v31  ;;  %9032 = vmatmul.mubr.msk.f32.gmra.mrb[80].mxu0 %vm3059_vm7, %v5409_v29  ;;  %v7210_v36 = vcombine.low %v6384_v38, %v6392_v0  ;;  %v6393_v49 = vcombine.high %v6391_v1, %v6391_v1  ;;  %v7194_v29 = vcombine.low %v6374_v59, %v6376_v58 }
 0x23b   :  { %8869 = vmatprep.mubr.msk.f32.mxu1 %vm9292_vm0, %v14542_v47  ;;  %9034 = vmatprep.mubr.msk.f32.mxu0 %vm9292_vm0, %v14542_v47  ;;  %v6409_v31 = vcombine.high %v6401_v60, %v6401_v60  ;;  %v13113_v7 = vadd.f32 %v5725_v50, %v14966_v18  ;;  %v7201_v51 = vrot.slane %v7193_v6, %v9557_v52 }
 0x23c   :  { %v7217_v45 = vrot.slane %v7210_v36, %v9557_v52  ;;  %v7224_v56 = vrot.slane %v6391_v1, %v9557_v52  ;;  %v7226_v16 = vcombine.low %v6393_v49, %v6401_v60  ;;  %v7208_v33 = vrot.slane %v7194_v29, %v9557_v52  ;;  %v14970_v29 = vld [vmem:[#allocation52_spill] sm:$0xff] }
 0x23d   :  { %v7227_v38 = vcombine.low %v6409_v31, %v6408_v41  ;;  %v6411_v59 = vcombine.high %v13113_v7, %v13113_v7  ;;  %v6410_v1 = vcombine.high %v6408_v41, %v6408_v41  ;;  %v6418_v58 = vrot.slane %v13113_v7, %v9557_v52  ;;  %v14971_v31 = vld [vmem:[#allocation53_spill] sm:$0xff] }
 0x23e   :  { %8870 = vmatmul.mubr.msk.f32.gmra.mrb[74].mxu1 %vm3059_vm7, %v4113_v14  ;;  %9035 = vmatmul.mubr.msk.f32.gmra.mrb[82].mxu0 %vm3059_vm7, %v5426_v35  ;;  %v7225_v0 = vcombine.low %v7217_v45, %v7224_v56  ;;  %v7234_v60 = vrot.slane %v7226_v16, %v9557_v52  ;;  %v7209_v14 = vcombine.low %v7201_v51, %v7208_v33  ;;  %v5730_v51 = vpop.f32.mrb[8].mxu0 }
 0x23f   :  { %8872 = vmatprep.mubr.msk.f32.mxu1 %vm9292_vm0, %v14542_v47  ;;  %9037 = vmatprep.mubr.msk.f32.mxu0 %vm9292_vm0, %v14542_v47  ;;  %v7241_v35 = vrot.slane %v7227_v38, %v9557_v52  ;;  %v6425_v6 = vrot.slane %v6411_v59, %v9557_v52  ;;  %v4147_v39 = vcombine.low %v13067_v48, %v13032_v62  ;;  %v14973_v38 = vld [vmem:[#allocation48_spill] sm:$0xff] }
 0x240   :  { %v14967_v36 = vcombine.low %v14921_v44, %v14920_v10  ;;  %v14968_v16 = vcombine.low %v12192_v23, %v12229_v40  ;;  %v4166_v45 = vcombine.low %v12014_v54, %v14944_v63  ;;  %8175 = vst.msk [vmem:[%s14280_s2 + $0x8] sm:$0x3f] %vm8174_vm11, %v7225_v0  ;;  %v6426_v10 = vcombine.high %v6418_v58, %v6418_v58 }
 0x241   :  { %8173 = vst.msk [vmem:[%s14280_s2] sm:$0xff] %vm474_vm1, %v7209_v14  ;;  %v7242_v44 = vcombine.low %v7234_v60, %v7241_v35  ;;  %v6427_v62 = vcombine.high %v6425_v6, %v6425_v6  ;;  %v5460_v54 = vcombine.low %v13095_v22, %v13081_v61  ;;  %v7243_v63 = vcombine.low %v6410_v1, %v6418_v58 }
 0x242   :  { %v4156_v49 = vrot.slane %v14967_v36, %v9557_v52  ;;  %v5476_v56 = vrot.slane %v14968_v16, %v9557_v52  ;;  %8873 = vmatmul.mubr.msk.f32.gmra.mrb[76].mxu1 %vm3059_vm7, %v4130_v19  ;;  %9038 = vmatmul.mubr.msk.f32.gmra.mrb[84].mxu0 %vm3059_vm7, %v5443_v9  ;;  %v14969_v19 = vld [vmem:[#allocation27_spill] sm:$0xff]  ;;  %v8925_v9 = vpop.f32.mrb[9].mxu0  ;;  %v4163_v41 = vrot.slane %v4149_v3, %v9557_v52  ;;  %v14974_v16 = vld [vmem:[#allocation58_spill] sm:$0xff] }
 0x243   :  { %8875 = vmatprep.mubr.msk.f32.mxu1 %vm9292_vm0, %v14542_v47  ;;  %9040 = vmatprep.mubr.msk.f32.mxu0 %vm9292_vm0, %v14542_v47  ;;  %v13161_v48 = vadd.f32 %v5730_v51, %v14969_v19  ;;  %v5469_v50 = vrot.slane %v5461_v2, %v9557_v52  ;;  %v5479_v18 = vcombine.low %v14971_v31, %v14970_v29  ;;  %v14972_v2 = vld [vmem:[#allocation57_spill] sm:$0xff] }
 0x244   :  { %8176 = vst.msk [vmem:[%s14280_s2 + $0x10] sm:$0xff] %vm474_vm1, %v7242_v44  ;;  %v7257_v57 = vrot.slane %v6426_v10, %v9557_v52  ;;  %v4180_v61 = vrot.slane %v4166_v45, %v9557_v52  ;;  %v7250_v22 = vrot.slane %v7243_v63, %v9557_v52  ;;  %v5478_v59 = vcombine.low %v14973_v38, %v14972_v2  ;;  %v14977_v44 = vld [vmem:[#allocation56_spill] sm:$0xff] }
 0x245   :  { %v6428_v33 = vcombine.high %v13161_v48, %v13161_v48  ;;  %v6435_v3 = vrot.slane %v13161_v48, %v9557_v52  ;;  %v4183_v0 = vcombine.low %v14952_v20, %v14923_v12  ;;  %v7259_v60 = vcombine.low %v6425_v6, %v6427_v62  ;;  %v14975_v12 = vld [vmem:[#allocation95_spill] sm:$0xff]  ;;  %v14976_v6 = vld [vmem:[#allocation60_spill] sm:$0xff] }
 0x246   :  { %8876 = vmatmul.mubr.msk.f32.gmra.mrb[78].mxu1 %vm3059_vm7, %v4147_v39  ;;  %9041 = vmatmul.mubr.msk.f32.gmra.mrb[86].mxu0 %vm3059_vm7, %v5460_v54  ;;  %v7258_v1 = vcombine.low %v7250_v22, %v7257_v57  ;;  %v4164_v58 = vcombine.low %v4156_v49, %v4163_v41  ;;  %v5477_v39 = vcombine.low %v5469_v50, %v5476_v56  ;;  %v5735_v41 = vpop.f32.mrb[10].mxu0 }
 0x247   :  { %8878 = vmatprep.mubr.msk.f32.mxu1 %vm9292_vm0, %v14542_v47  ;;  %9043 = vmatprep.mubr.msk.f32.mxu0 %vm9292_vm0, %v14542_v47  ;;  %v6442_v14 = vrot.slane %v6428_v33, %v9557_v52  ;;  %v6443_v35 = vcombine.high %v6435_v3, %v6435_v3  ;;  %v5493_v36 = vrot.slane %v5479_v18, %v9557_v52  ;;  %v8928_v22 = vpop.f32.mrb[11].mxu0 }
 0x248   :  { %v5496_v45 = vcombine.low %v14974_v16, %v12350_v8  ;;  %v4182_v20 = vcombine.low %v14975_v12, %v14953_v4  ;;  %v5495_v10 = vcombine.low %v14977_v44, %v14976_v6  ;;  %8177 = vst.msk [vmem:[%s14280_s2 + $0x18] sm:$0x3f] %vm8174_vm11, %v7258_v1  ;;  %v14978_v49 = vcombine.low %v12048_v25, %v11977_v21  ;;  %v14979_v25 = vld [vmem:[#allocation28_spill] sm:$0xff]  ;;  %v14981_v12 = vld [vmem:[#allocation85_spill] sm:$0xff] }
 0x249   :  { %v6444_v62 = vcombine.high %v6442_v14, %v6442_v14  ;;  %v7260_v51 = vcombine.low %v6435_v3, %v6443_v35  ;;  %v5486_v4 = vrot.slane %v5478_v59, %v9557_v52  ;;  %v4197_v54 = vrot.slane %v4183_v0, %v9557_v52 }
 0x24a   :  { %8879 = vmatmul.mubr.msk.f32.gmra.mrb[80].mxu1 %vm3059_vm7, %v4164_v58  ;;  %9044 = vmatmul.mubr.msk.f32.gmra.mrb[88].mxu0 %vm3059_vm7, %v5477_v39  ;;  %v4173_v56 = vrot.slane %v14978_v49, %v9557_v52  ;;  %v7267_v63 = vrot.slane %v7259_v60, %v9557_v52  ;;  %v5510_v21 = vrot.slane %v5496_v45, %v9557_v52 }
 0x24b   :  { %8881 = vmatprep.mubr.msk.f32.mxu1 %vm9292_vm0, %v14542_v47  ;;  %9046 = vmatprep.mubr.msk.f32.mxu0 %vm9292_vm0, %v14542_v47  ;;  %v7274_v19 = vrot.slane %v7260_v51, %v9557_v52  ;;  %v7276_v9 = vcombine.low %v6442_v14, %v6444_v62  ;;  %v5494_v18 = vcombine.low %v5486_v4, %v5493_v36  ;;  %v5740_v36 = vpop.f32.mrb[12].mxu0  ;;  %v14982_v62 = vld [vmem:[#allocation98_spill] sm:$0xff] }
 0x24c   :  { %v4181_v50 = vcombine.low %v4173_v56, %v4180_v61  ;;  %v13216_v57 = vadd.f32 %v5735_v41, %v14979_v25  ;;  %v4190_v33 = vrot.slane %v4182_v20, %v9557_v52  ;;  %v5503_v3 = vrot.slane %v5495_v10, %v9557_v52  ;;  %v8931_v10 = vpop.f32.mrb[13].mxu0 }
 0x24d   :  { %v7275_v2 = vcombine.low %v7267_v63, %v7274_v19  ;;  %v7283_v0 = vrot.slane %v7276_v9, %v9557_v52  ;;  %v4217_v60 = vcombine.low %v14964_v34, %v12192_v23  ;;  %v14980_v23 = vld [vmem:[#allocation45_spill] sm:$0xff]  ;;  %v13244_v20 = vadd.f32 %v5740_v36, %v14981_v12 }
 0x24e   :  { %8882 = vmatmul.mubr.msk.f32.gmra.mrb[82].mxu1 %vm3059_vm7, %v4181_v50  ;;  %9047 = vmatmul.mubr.msk.f32.gmra.mrb[90].mxu0 %vm3059_vm7, %v5494_v18  ;;  %v6445_v59 = vcombine.high %v13216_v57, %v13216_v57  ;;  %v6452_v61 = vrot.slane %v13216_v57, %v9557_v52  ;;  %v4198_v1 = vcombine.low %v4190_v33, %v4197_v54  ;;  %v5745_v33 = vpop.f32.mrb[14].mxu0 }
 0x24f   :  { %8884 = vmatprep.mubr.msk.f32.mxu1 %vm9292_vm0, %v14542_v47  ;;  %9049 = vmatprep.mubr.msk.f32.mxu0 %vm9292_vm0, %v14542_v47  ;;  %8178 = vst.msk [vmem:[%s14280_s2 + $0x20] sm:$0xff] %vm474_vm1, %v7275_v2  ;;  %v5511_v14 = vcombine.low %v5503_v3, %v5510_v21  ;;  %v4216_v34 = vcombine.low %v14980_v23, %v14965_v32 }
 0x250   :  { %v6459_v35 = vrot.slane %v6445_v59, %v9557_v52  ;;  %v6460_v58 = vcombine.high %v6452_v61, %v6452_v61  ;;  %v7290_v39 = vrot.slane %v6452_v61, %v9557_v52  ;;  %v4234_v51 = vcombine.low %v14982_v62, %v14971_v31  ;;  %v8934_v59 = vpop.f32.mrb[15].mxu0  ;;  %v14986_v61 = vld [vmem:[#allocation36_spill] sm:$0xff] }
 0x251   :  { %v4231_v32 = vrot.slane %v4217_v60, %v9557_v52  ;;  %v6462_v4 = vcombine.high %v13244_v20, %v13244_v20  ;;  %v6469_v31 = vrot.slane %v13244_v20, %v9557_v52  ;;  %v4224_v54 = vrot.slane %v4216_v34, %v9557_v52  ;;  %v14987_v60 = vld [vmem:[#allocation100_spill] sm:$0xff] }
 0x252   :  { %8885 = vmatmul.mubr.msk.f32.gmra.mrb[84].mxu1 %vm3059_vm7, %v4198_v1  ;;  %9050 = vmatmul.mubr.msk.f32.gmra.mrb[92].mxu0 %vm3059_vm7, %v5511_v14  ;;  %v7291_v45 = vcombine.low %v7283_v0, %v7290_v39  ;;  %v6461_v49 = vcombine.high %v6459_v35, %v6459_v35  ;;  %v7292_v56 = vcombine.low %v6460_v58, %v6459_v35  ;;  %v5750_v35 = vpop.f32.mrb[16].mxu0  ;;  %v14988_v39 = vld [vmem:[#allocation31_spill] sm:$0xff] }
 0x253   :  { %8887 = vmatprep.mubr.msk.f32.mxu1 %vm9292_vm0, %v14542_v47  ;;  %9052 = vmatprep.mubr.msk.f32.mxu0 %vm9292_vm0, %v14542_v47  ;;  %v4233_v63 = vcombine.low %v12229_v40, %v14973_v38  ;;  %v14983_v19 = vcombine.low %v12927_v43, %v12933_v11  ;;  %v14984_v9 = vcombine.low %v12962_v17, %v12965_v28  ;;  %v8937_v34 = vpop.f32.mrb[17].mxu0 }
 0x254   :  { %8179 = vst.msk [vmem:[%s14280_s2 + $0x28] sm:$0x3f] %vm8174_vm11, %v7291_v45  ;;  %v6476_v41 = vrot.slane %v6462_v4, %v9557_v52  ;;  %v6477_v50 = vcombine.high %v6469_v31, %v6469_v31  ;;  %v7293_v18 = vcombine.low %v6461_v49, %v6469_v31  ;;  %v4248_v21 = vrot.slane %v4234_v51, %v9557_v52  ;;  %v14992_v34 = vld [vmem:[#allocation49_spill] sm:$0xff] }
 0x255   :  { %v4251_v25 = vcombine.low %v14976_v6, %v14974_v16  ;;  %v4232_v40 = vcombine.low %v4224_v54, %v4231_v32  ;;  %v7300_v43 = vrot.slane %v7292_v56, %v9557_v52  ;;  %v4241_v38 = vrot.slane %v4233_v63, %v9557_v52 }
 0x256   :  { %8888 = vmatmul.mubr.msk.f32.gmra.mrb[86].mxu1 %vm3059_vm7, %v14983_v19  ;;  %9053 = vmatmul.mubr.msk.f32.gmra.mrb[94].mxu0 %vm3059_vm7, %v14984_v9  ;;  %v6478_v11 = vcombine.high %v6476_v41, %v6476_v41  ;;  %v7307_v17 = vrot.slane %v7293_v18, %v9557_v52  ;;  %v7309_v28 = vcombine.low %v6477_v50, %v6476_v41  ;;  %v14989_v41 = vld [vmem:[#allocation37_spill] sm:$0xff] }
 0x257   :  { %8890 = vmatprep.mubr.msk.f32.mxu1 %vm9292_vm0, %v14542_v47  ;;  %9055 = vmatprep.mubr.msk.f32.mxu0 %vm9292_vm0, %v14542_v47  ;;  %v4250_v22 = vcombine.low %v14970_v29, %v14977_v44  ;;  %v14985_v16 = vcombine.low %v12998_v27, %v13001_v26  ;;  %v13295_v0 = vadd.f32 %v5745_v33, %v14986_v61 }
 0x258   :  { %v7308_v6 = vcombine.low %v7300_v43, %v7307_v17  ;;  %v7316_v3 = vrot.slane %v7309_v28, %v9557_v52  ;;  %v7323_v2 = vrot.slane %v6478_v11, %v9557_v52  ;;  %v4249_v29 = vcombine.low %v4241_v38, %v4248_v21  ;;  %v5755_v63 = vpop.f32.mrb[18].mxu0 }
 0x259   :  { %v4265_v44 = vrot.slane %v4251_v25, %v9557_v52  ;;  %v4268_v27 = vcombine.low %v14987_v60, %v14941_v13  ;;  %v6479_v1 = vcombine.high %v13295_v0, %v13295_v0  ;;  %v6486_v14 = vrot.slane %v13295_v0, %v9557_v52  ;;  %v8940_v21 = vpop.f32.mrb[19].mxu0 }
 0x25a   :  { %8891 = vmatmul.mubr.msk.f32.gmra.mrb[88].mxu1 %vm3059_vm7, %v4232_v40  ;;  %9056 = vmatmul.mubr.msk.f32.gmra.mrb[96].mxu0 %vm3059_vm7, %v14985_v16  ;;  %v7324_v26 = vcombine.low %v7316_v3, %v7323_v2  ;;  %8180 = vst.msk [vmem:[%s14280_s2 + $0x30] sm:$0xff] %vm474_vm1, %v7308_v6  ;;  %v4267_v58 = vcombine.low %v12350_v8, %v12398_v46  ;;  %v14991_v3 = vld [vmem:[#allocation41_spill] sm:$0xff] }
 0x25b   :  { %8893 = vmatprep.mubr.msk.f32.mxu1 %vm9292_vm0, %v14542_v47  ;;  %v4258_v13 = vrot.slane %v4250_v22, %v9557_v52  ;;  %v13317_v23 = vadd.f32 %v5750_v35, %v14988_v39  ;;  %v6493_v36 = vrot.slane %v6479_v1, %v9557_v52  ;;  %v6494_v45 = vcombine.high %v6486_v14, %v6486_v14 }
 0x25c   :  { %8181 = vst.msk [vmem:[%s14280_s2 + $0x38] sm:$0x3f] %vm8174_vm11, %v7324_v26  ;;  %v4282_v46 = vrot.slane %v4268_v27, %v9557_v52  ;;  %v4275_v32 = vrot.slane %v4267_v58, %v9557_v52  ;;  %v13335_v50 = vadd.f32 %v5755_v63, %v14989_v41 }
 0x25d   :  { %v4266_v8 = vcombine.low %v4258_v13, %v4265_v44  ;;  %v6496_v12 = vcombine.high %v13317_v23, %v13317_v23  ;;  %v6503_v10 = vrot.slane %v13317_v23, %v9557_v52  ;;  %v6495_v62 = vcombine.high %v6493_v36, %v6493_v36  ;;  %v5760_v16 = vpop.f32.mrb[20].mxu0 }
 0x25e   :  { %8894 = vmatmul.mubr.msk.f32.gmra.mrb[90].mxu1 %vm3059_vm7, %v4249_v29  ;;  %v7325_v51 = vcombine.low %v6486_v14, %v6494_v45  ;;  %v4283_v31 = vcombine.low %v4275_v32, %v4282_v46  ;;  %v6513_v11 = vcombine.high %v13335_v50, %v13335_v50  ;;  %v6520_v17 = vrot.slane %v13335_v50, %v9557_v52  ;;  %v8943_v61 = vpop.f32.mrb[21].mxu0 }
 0x25f   :  { %8896 = vmatprep.mubr.msk.f32.mxu1 %vm9292_vm0, %v14542_v47  ;;  %v6510_v49 = vrot.slane %v6496_v12, %v9557_v52  ;;  %v6511_v56 = vcombine.high %v6503_v10, %v6503_v10  ;;  %v7326_v4 = vcombine.low %v6493_v36, %v6495_v62  ;;  %v13360_v2 = vadd.f32 %v5760_v16, %v14991_v3 }
 0x260   :  { %v7333_v19 = vrot.slane %v7325_v51, %v9557_v52  ;;  %v6527_v38 = vrot.slane %v6513_v11, %v9557_v52  ;;  %v6528_v22 = vcombine.high %v6520_v17, %v6520_v17 }
 0x261   :  { %v7342_v54 = vcombine.low %v6503_v10, %v6511_v56  ;;  %v7340_v9 = vrot.slane %v7326_v4, %v9557_v52  ;;  %v6512_v18 = vcombine.high %v6510_v49, %v6510_v49  ;;  %v7356_v40 = vrot.slane %v6510_v49, %v9557_v52 }
 0x262   :  { %8897 = vmatmul.mubr.msk.f32.gmra.mrb[92].mxu1 %vm3059_vm7, %v4266_v8  ;;  %v7359_v6 = vcombine.low %v6528_v22, %v6527_v38  ;;  %v6529_v59 = vcombine.high %v6527_v38, %v6527_v38 }
 0x263   :  { %8899 = vmatprep.mubr.msk.f32.mxu1 %vm9292_vm0, %v14542_v47  ;;  %v7349_v25 = vrot.slane %v7342_v54, %v9557_v52  ;;  %v7341_v43 = vcombine.low %v7333_v19, %v7340_v9  ;;  %v7358_v33 = vcombine.low %v6512_v18, %v6520_v17  ;;  %v14993_v54 = vld [vmem:[#allocation50_spill] sm:$0xff] }
 0x264   :  { %v7373_v44 = vrot.slane %v7359_v6, %v9557_v52 }
 0x265   :  { %v7357_v28 = vcombine.low %v7349_v25, %v7356_v40  ;;  %8182 = vst.msk [vmem:[%s14280_s2 + $0x40] sm:$0xff] %vm474_vm1, %v7341_v43  ;;  %v7366_v29 = vrot.slane %v7358_v33, %v9557_v52 }
 0x266   :  { %8900 = vmatmul.mubr.msk.f32.gmra.mrb[94].mxu1 %vm3059_vm7, %v4283_v31  ;;  %v5765_v58 = vpop.f32.mrb[22].mxu0 }
 0x267   :  { %8902 = vmatprep.mubr.msk.f32.mxu1 %vm9292_vm0, %v14542_v47  ;;  %v14990_v47 = vcombine.low %v13038_v37, %v13041_v30  ;;  %8183 = vst.msk [vmem:[%s14280_s2 + $0x48] sm:$0x3f] %vm8174_vm11, %v7357_v28  ;;  %v6530_v37 = vcombine.high %v13360_v2, %v13360_v2  ;;  %v6537_v30 = vrot.slane %v13360_v2, %v9557_v52  ;;  %v8946_v45 = vpop.f32.mrb[23].mxu0  ;;  %v14994_v28 = vld [vmem:[#allocation47_spill] sm:$0xff] }
 0x268   :  { %v7374_v60 = vcombine.low %v7366_v29, %v7373_v44  ;;  %v13376_v36 = vadd.f32 %v5765_v58, %v14992_v34 }
 0x269   :  { %v6544_v27 = vrot.slane %v6530_v37, %v9557_v52  ;;  %v6545_v26 = vcombine.high %v6537_v30, %v6537_v30  ;;  %v7375_v1 = vcombine.low %v6529_v59, %v6537_v30 }
 0x26a   :  { %8903 = vmatmul.mubr.msk.f32.gmra.mrb[96].mxu1 %vm3059_vm7, %v14990_v47  ;;  %8184 = vst.msk [vmem:[%s14280_s2 + $0x50] sm:$0xff] %vm474_vm1, %v7374_v60  ;;  %v6547_v8 = vcombine.high %v13376_v36, %v13376_v36  ;;  %v6554_v46 = vrot.slane %v13376_v36, %v9557_v52 }
 0x26b   :  { %v7382_v14 = vrot.slane %v7375_v1, %v9557_v52  ;;  %v7389_v35 = vrot.slane %v6545_v26, %v9557_v52  ;;  %v6546_v13 = vcombine.high %v6544_v27, %v6544_v27 }
 0x26c   :  { %v6561_v10 = vrot.slane %v6547_v8, %v9557_v52  ;;  %v6562_v62 = vcombine.high %v6554_v46, %v6554_v46 }
 0x26d   :  { %v7390_v39 = vcombine.low %v7382_v14, %v7389_v35  ;;  %v7391_v12 = vcombine.low %v6544_v27, %v6546_v13  ;;  %v14995_v27 = vld [vmem:[#allocation99_spill] sm:$0xff] }
 0x26e   :  { %v6563_v51 = vcombine.high %v6561_v10, %v6561_v10  ;;  %v7392_v32 = vcombine.low %v6554_v46, %v6562_v62 }
 0x26f   :  { %8185 = vst.msk [vmem:[%s14280_s2 + $0x58] sm:$0x3f] %vm8174_vm11, %v7390_v39  ;;  %v7399_v56 = vrot.slane %v7391_v12, %v9557_v52 }
 0x270   :  { %v5770_v49 = vpop.f32.mrb[24].mxu0  ;;  %v7406_v4 = vrot.slane %v7392_v32, %v9557_v52  ;;  %v7408_v31 = vcombine.low %v6561_v10, %v6563_v51  ;;  %v14996_v51 = vld [vmem:[#allocation59_spill] sm:$0xff] }
 0x271   :  { %v13390_v63 = vadd.f32 %v5770_v49, %v14993_v54  ;;  %v8949_v19 = vpop.f32.mrb[25].mxu0 }
 0x272   :  { %v7407_v9 = vcombine.low %v7399_v56, %v7406_v4  ;;  %v7415_v21 = vrot.slane %v7408_v31, %v9557_v52 }
 0x273   :  { %v6564_v41 = vcombine.high %v13390_v63, %v13390_v63  ;;  %v6571_v18 = vrot.slane %v13390_v63, %v9557_v52 }
 0x274   :  { %8186 = vst.msk [vmem:[%s14280_s2 + $0x60] sm:$0xff] %vm474_vm1, %v7407_v9 }
 0x275   :  { %v6578_v25 = vrot.slane %v6564_v41, %v9557_v52  ;;  %v7422_v40 = vrot.slane %v6571_v18, %v9557_v52  ;;  %v6579_v43 = vcombine.high %v6571_v18, %v6571_v18 }
 0x277   :  { %v7423_v11 = vcombine.low %v7415_v21, %v7422_v40  ;;  %v6580_v22 = vcombine.high %v6578_v25, %v6578_v25  ;;  %v7424_v47 = vcombine.low %v6579_v43, %v6578_v25  ;;  %v14997_v21 = vld [vmem:[#allocation101_spill] sm:$0xff] }
 0x279   :  { %v5775_v17 = vpop.f32.mrb[26].mxu0  ;;  %8187 = vst.msk [vmem:[%s14280_s2 + $0x68] sm:$0x3f] %vm8174_vm11, %v7423_v11  ;;  %v7432_v29 = vrot.slane %v7424_v47, %v9557_v52 }
 0x27a   :  { %v13404_v38 = vadd.f32 %v5775_v17, %v14994_v28  ;;  %v8952_v33 = vpop.f32.mrb[27].mxu0 }
 0x27c   :  { %v6581_v16 = vcombine.high %v13404_v38, %v13404_v38  ;;  %v6588_v6 = vrot.slane %v13404_v38, %v9557_v52 }
 0x27e   :  { %v6595_v3 = vrot.slane %v6581_v16, %v9557_v52  ;;  %v6596_v59 = vcombine.high %v6588_v6, %v6588_v6  ;;  %v7425_v61 = vcombine.low %v6580_v22, %v6588_v6 }
 0x27f   :  { %v5780_v60 = vpop.f32.mrb[28].mxu0 }
 0x280   :  { %v6597_v44 = vcombine.high %v6595_v3, %v6595_v3  ;;  %v7439_v37 = vrot.slane %v7425_v61, %v9557_v52  ;;  %v7441_v30 = vcombine.low %v6596_v59, %v6595_v3  ;;  %v13418_v26 = vadd.f32 %v5780_v60, %v14995_v27  ;;  %v8955_v1 = vpop.f32.mrb[29].mxu0 }
 0x282   :  { %v7440_v14 = vcombine.low %v7432_v29, %v7439_v37  ;;  %v7448_v35 = vrot.slane %v7441_v30, %v9557_v52  ;;  %v7455_v58 = vrot.slane %v6597_v44, %v9557_v52  ;;  %v6598_v13 = vcombine.high %v13418_v26, %v13418_v26  ;;  %v14998_v29 = vld [vmem:[#allocation105_spill] sm:$0xff] }
 0x283   :  { %v6605_v39 = vrot.slane %v13418_v26, %v9557_v52 }
 0x284   :  { %v7456_v34 = vcombine.low %v7448_v35, %v7455_v58  ;;  %8188 = vst.msk [vmem:[%s14280_s2 + $0x70] sm:$0xff] %vm474_vm1, %v7440_v14  ;;  %v6612_v45 = vrot.slane %v6598_v13, %v9557_v52 }
 0x285   :  { %v6613_v8 = vcombine.high %v6605_v39, %v6605_v39 }
 0x286   :  { %8189 = vst.msk [vmem:[%s14280_s2 + $0x78] sm:$0x3f] %vm8174_vm11, %v7456_v34  ;;  %v6614_v46 = vcombine.high %v6612_v45, %v6612_v45 }
 0x287   :  { %v7457_v12 = vcombine.low %v6605_v39, %v6613_v8  ;;  %v5785_v62 = vpop.f32.mrb[30].mxu0 }
 0x288   :  { %v7458_v10 = vcombine.low %v6612_v45, %v6614_v46  ;;  %v13436_v32 = vadd.f32 %v5785_v62, %v14996_v51  ;;  %v8958_v49 = vpop.f32.mrb[31].mxu0  ;;  %v14999_v46 = vld [vmem:[#allocation67_spill] sm:$0xff] }
 0x289   :  { %v7465_v56 = vrot.slane %v7457_v12, %v9557_v52 }
 0x28a   :  { %v7472_v4 = vrot.slane %v7458_v10, %v9557_v52  ;;  %v6615_v31 = vcombine.high %v13436_v32, %v13436_v32  ;;  %v6622_v54 = vrot.slane %v13436_v32, %v9557_v52 }
 0x28c   :  { %v7473_v19 = vcombine.low %v7465_v56, %v7472_v4  ;;  %v6629_v41 = vrot.slane %v6615_v31, %v9557_v52  ;;  %v6630_v18 = vcombine.high %v6622_v54, %v6622_v54 }
 0x28d   :  { %v5790_v9 = vpop.f32.mrb[32].mxu0 }
 0x28e   :  { %v13446_v25 = vadd.f32 %v5790_v9, %v14997_v21  ;;  %v8961_v40 = vpop.f32.mrb[33].mxu0  ;;  %8190 = vst.msk [vmem:[%s14280_s2 + $0x80] sm:$0xff] %vm474_vm1, %v7473_v19  ;;  %v7474_v43 = vcombine.low %v6622_v54, %v6630_v18  ;;  %v6631_v11 = vcombine.high %v6629_v41, %v6629_v41  ;;  %v7488_v33 = vrot.slane %v6629_v41, %v9557_v52  ;;  %v15000_v18 = vld [vmem:[#allocation69_spill] sm:$0xff] }
 0x290   :  { %v6632_v17 = vcombine.high %v13446_v25, %v13446_v25  ;;  %v6639_v28 = vrot.slane %v13446_v25, %v9557_v52  ;;  %v7481_v22 = vrot.slane %v7474_v43, %v9557_v52 }
 0x292   :  { %v6646_v47 = vrot.slane %v6632_v17, %v9557_v52  ;;  %v6647_v16 = vcombine.high %v6639_v28, %v6639_v28  ;;  %v7490_v6 = vcombine.low %v6631_v11, %v6639_v28  ;;  %v7489_v3 = vcombine.low %v7481_v22, %v7488_v33 }
 0x294   :  { %v7491_v59 = vcombine.low %v6647_v16, %v6646_v47  ;;  %v5795_v61 = vpop.f32.mrb[34].mxu0  ;;  %8191 = vst.msk [vmem:[%s14280_s2 + $0x88] sm:$0x3f] %vm8174_vm11, %v7489_v3  ;;  %v6648_v37 = vcombine.high %v6646_v47, %v6646_v47  ;;  %v7498_v60 = vrot.slane %v7490_v6, %v9557_v52 }
 0x295   :  { %v13464_v44 = vadd.f32 %v5795_v61, %v14998_v29  ;;  %v8964_v30 = vpop.f32.mrb[35].mxu0  ;;  %v15001_v29 = vld [vmem:[#allocation71_spill] sm:$0xff] }
 0x296   :  { %v7505_v27 = vrot.slane %v7491_v59, %v9557_v52 }
 0x297   :  { %v6649_v1 = vcombine.high %v13464_v44, %v13464_v44  ;;  %v6656_v14 = vrot.slane %v13464_v44, %v9557_v52 }
 0x298   :  { %v7506_v35 = vcombine.low %v7498_v60, %v7505_v27 }
 0x299   :  { %v6663_v58 = vrot.slane %v6649_v1, %v9557_v52  ;;  %v6664_v13 = vcombine.high %v6656_v14, %v6656_v14  ;;  %v7507_v39 = vcombine.low %v6648_v37, %v6656_v14 }
 0x29a   :  { %8192 = vst.msk [vmem:[%s14280_s2 + $0x90] sm:$0xff] %vm474_vm1, %v7506_v35 }
 0x29b   :  { %v7514_v45 = vrot.slane %v7507_v39, %v9557_v52  ;;  %v7521_v8 = vrot.slane %v6664_v13, %v9557_v52  ;;  %v6665_v62 = vcombine.high %v6663_v58, %v6663_v58 }
 0x29d   :  { %v5800_v34 = vpop.f32.mrb[36].mxu0  ;;  %v7522_v51 = vcombine.low %v7514_v45, %v7521_v8  ;;  %v7523_v31 = vcombine.low %v6663_v58, %v6665_v62 }
 0x29e   :  { %v13480_v12 = vadd.f32 %v5800_v34, %v14999_v46  ;;  %v8967_v10 = vpop.f32.mrb[37].mxu0 }
 0x29f   :  { %8193 = vst.msk [vmem:[%s14280_s2 + $0x98] sm:$0x3f] %vm8174_vm11, %v7522_v51  ;;  %v7531_v11 = vrot.slane %v7523_v31, %v9557_v52  ;;  %v15002_v10 = vld [vmem:[#allocation70_spill] sm:$0xff] }
 0x2a0   :  { %v6666_v49 = vcombine.high %v13480_v12, %v13480_v12  ;;  %v6673_v56 = vrot.slane %v13480_v12, %v9557_v52 }
 0x2a2   :  { %v6680_v4 = vrot.slane %v6666_v49, %v9557_v52  ;;  %v6681_v54 = vcombine.high %v6673_v56, %v6673_v56 }
 0x2a4   :  { %v6682_v19 = vcombine.high %v6680_v4, %v6680_v4  ;;  %v7524_v41 = vcombine.low %v6673_v56, %v6681_v54 }
 0x2a5   :  { %v5805_v9 = vpop.f32.mrb[38].mxu0 }
 0x2a6   :  { %v13492_v21 = vadd.f32 %v5805_v9, %v15000_v18  ;;  %v8970_v40 = vpop.f32.mrb[39].mxu0  ;;  %v7540_v43 = vcombine.low %v6680_v4, %v6682_v19  ;;  %v7538_v17 = vrot.slane %v7524_v41, %v9557_v52 }
 0x2a8   :  { %v6683_v28 = vcombine.high %v13492_v21, %v13492_v21  ;;  %v6690_v22 = vrot.slane %v13492_v21, %v9557_v52  ;;  %v7547_v33 = vrot.slane %v7540_v43, %v9557_v52  ;;  %v7539_v47 = vcombine.low %v7531_v11, %v7538_v17 }
 0x2aa   :  { %v6697_v16 = vrot.slane %v6683_v28, %v9557_v52  ;;  %v7554_v6 = vrot.slane %v6690_v22, %v9557_v52  ;;  %8194 = vst.msk [vmem:[%s14280_s2 + $0xa0] sm:$0xff] %vm474_vm1, %v7539_v47  ;;  %v6698_v3 = vcombine.high %v6690_v22, %v6690_v22  ;;  %v6004_v47 = vsel %vm474_vm1, %v13050_v42, 0.0 }
 0x2ac   :  { %v7555_v59 = vcombine.low %v7547_v33, %v7554_v6  ;;  %v6699_v30 = vcombine.high %v6697_v16, %v6697_v16  ;;  %v7556_v27 = vcombine.low %v6698_v3, %v6697_v16 }
 0x2ad   :  { %v5810_v61 = vpop.f32.mrb[40].mxu0 }
 0x2ae   :  { %8195 = vst.msk [vmem:[%s14280_s2 + $0xa8] sm:$0x3f] %vm8174_vm11, %v7555_v59  ;;  %v13512_v37 = vadd.f32 %v5810_v61, %v15001_v29  ;;  %v8973_v60 = vpop.f32.mrb[41].mxu0  ;;  %v7564_v39 = vrot.slane %v7556_v27, %v9557_v52  ;;  %v6006_v61 = vsel %vm474_vm1, %v13053_v5, 0.0  ;;  %v6008_v27 = vsel %vm474_vm1, %v13113_v7, 0.0 }
 0x2b0   :  { %v6700_v1 = vcombine.high %v13512_v37, %v13512_v37  ;;  %v6707_v14 = vrot.slane %v13512_v37, %v9557_v52 }
 0x2b2   :  { %v6714_v35 = vrot.slane %v6700_v1, %v9557_v52  ;;  %v6715_v58 = vcombine.high %v6707_v14, %v6707_v14  ;;  %v7557_v13 = vcombine.low %v6699_v30, %v6707_v14 }
 0x2b4   :  { %v6716_v34 = vcombine.high %v6714_v35, %v6714_v35  ;;  %v7571_v45 = vrot.slane %v7557_v13, %v9557_v52  ;;  %v7573_v8 = vcombine.low %v6715_v58, %v6714_v35  ;;  %v6010_v13 = vsel %vm474_vm1, %v13161_v48, 0.0 }
 0x2b6   :  { %v5815_v46 = vpop.f32.mrb[42].mxu0  ;;  %v7572_v49 = vcombine.low %v7564_v39, %v7571_v45  ;;  %v7580_v56 = vrot.slane %v7573_v8, %v9557_v52  ;;  %v7587_v4 = vrot.slane %v6716_v34, %v9557_v52 }
 0x2b7   :  { %v13522_v62 = vadd.f32 %v5815_v46, %v15002_v10  ;;  %v8976_v51 = vpop.f32.mrb[43].mxu0  ;;  %v6012_v10 = vsel %vm474_vm1, %v13216_v57, 0.0 }
 0x2b8   :  { %v7588_v19 = vcombine.low %v7580_v56, %v7587_v4  ;;  %8196 = vst.msk [vmem:[%s14280_s2 + $0xb0] sm:$0xff] %vm474_vm1, %v7572_v49  ;;  %v6014_v4 = vsel %vm474_vm1, %v13244_v20, 0.0 }
 0x2b9   :  { %v6717_v31 = vcombine.high %v13522_v62, %v13522_v62  ;;  %v6724_v54 = vrot.slane %v13522_v62, %v9557_v52 }
 0x2ba   :  { %8197 = vst.msk [vmem:[%s14280_s2 + $0xb8] sm:$0x3f] %vm8174_vm11, %v7588_v19 }
 0x2bb   :  { %v6731_v9 = vrot.slane %v6717_v31, %v9557_v52  ;;  %v6732_v41 = vcombine.high %v6724_v54, %v6724_v54 }
 0x2bd   :  { %v6733_v18 = vcombine.high %v6731_v9, %v6731_v9  ;;  %v7589_v40 = vcombine.low %v6724_v54, %v6732_v41  ;;  %v5820_v43 = vpop.f32.mrb[44].mxu0 }
 0x2be   :  { %v13540_v11 = vadd.f32 %v5820_v43, %v12807_v24  ;;  %v8979_v17 = vpop.f32.mrb[45].mxu0  ;;  %v6003_v24 = vsel %vm474_vm1, %v13047_v15, 0.0 }
 0x2bf   :  { %v7590_v28 = vcombine.low %v6731_v9, %v6733_v18  ;;  %v7597_v16 = vrot.slane %v7589_v40, %v9557_v52  ;;  %v6005_v30 = vadd.f32 %v6004_v47, %v6003_v24  ;;  %v6016_v40 = vsel %vm474_vm1, %v13295_v0, 0.0 }
 0x2c0   :  { %v6734_v22 = vcombine.high %v13540_v11, %v13540_v11  ;;  %v6741_v33 = vrot.slane %v13540_v11, %v9557_v52  ;;  %v6018_v47 = vsel %vm474_vm1, %v13317_v23, 0.0 }
 0x2c1   :  { %v7604_v6 = vrot.slane %v7590_v28, %v9557_v52  ;;  %v6007_v1 = vadd.f32 %v6006_v61, %v6005_v30  ;;  %v6020_v61 = vsel %vm474_vm1, %v13335_v50, 0.0 }
 0x2c2   :  { %v6748_v3 = vrot.slane %v6734_v22, %v9557_v52  ;;  %v6749_v59 = vcombine.high %v6741_v33, %v6741_v33 }
 0x2c3   :  { %v7605_v29 = vcombine.low %v7597_v16, %v7604_v6  ;;  %v6009_v8 = vadd.f32 %v6008_v27, %v6007_v1 }
 0x2c4   :  { %v7606_v60 = vcombine.low %v6741_v33, %v6749_v59  ;;  %v7620_v35 = vrot.slane %v6748_v3, %v9557_v52  ;;  %v6750_v34 = vcombine.high %v6748_v3, %v6748_v3 }
 0x2c5   :  { %8198 = vst.msk [vmem:[%s14280_s2 + $0xc0] sm:$0xff] %vm474_vm1, %v7605_v29  ;;  %v6011_v56 = vadd.f32 %v6010_v13, %v6009_v8 }
 0x2c6   :  { %v7613_v14 = vrot.slane %v7606_v60, %v9557_v52  ;;  %v5825_v58 = vpop.f32.mrb[46].mxu0 }
 0x2c7   :  { %v13566_v39 = vadd.f32 %v5825_v58, %v12839_v53  ;;  %v8982_v45 = vpop.f32.mrb[47].mxu0  ;;  %v6013_v18 = vadd.f32 %v6012_v10, %v6011_v56  ;;  %v6026_v10 = vsel %vm474_vm1, %v13390_v63, 0.0  ;;  %v6028_v56 = vsel %vm474_vm1, %v13404_v38, 0.0 }
 0x2c8   :  { %v7621_v46 = vcombine.low %v7613_v14, %v7620_v35  ;;  %v6022_v14 = vsel %vm474_vm1, %v13360_v2, 0.0 }
 0x2c9   :  { %v6751_v51 = vcombine.high %v13566_v39, %v13566_v39  ;;  %v6758_v49 = vrot.slane %v13566_v39, %v9557_v52  ;;  %v6015_v28 = vadd.f32 %v6014_v4, %v6013_v18  ;;  %v6032_v18 = vsel %vm474_vm1, %v13436_v32, 0.0 }
 0x2ca   :  { %8199 = vst.msk [vmem:[%s14280_s2 + $0xc8] sm:$0x3f] %vm8174_vm11, %v7621_v46  ;;  %v5830_v53 = vpop.f32.mrb[48].mxu0 }
 0x2cb   :  { %v6765_v31 = vrot.slane %v6751_v51, %v9557_v52  ;;  %v6766_v54 = vcombine.high %v6758_v49, %v6758_v49  ;;  %v7622_v19 = vcombine.low %v6750_v34, %v6758_v49  ;;  %v13582_v9 = vadd.f32 %v5830_v53, %v12912_v55  ;;  %v8985_v41 = vpop.f32.mrb[49].mxu0 }
 0x2cc   :  { %v6017_v3 = vadd.f32 %v6016_v40, %v6015_v28  ;;  %v6024_v34 = vsel %vm474_vm1, %v13376_v36, 0.0 }
 0x2cd   :  { %v7623_v43 = vcombine.low %v6766_v54, %v6765_v31  ;;  %v6767_v17 = vcombine.high %v6765_v31, %v6765_v31  ;;  %v6775_v22 = vrot.slane %v13582_v9, %v9557_v52  ;;  %v7630_v16 = vrot.slane %v7622_v19, %v9557_v52 }
 0x2ce   :  { %v5835_v33 = vpop.f32.mrb[50].mxu0  ;;  %v6019_v30 = vadd.f32 %v6018_v47, %v6017_v3  ;;  %v6768_v8 = vcombine.high %v13582_v9, %v13582_v9  ;;  %v6030_v54 = vsel %vm474_vm1, %v13418_v26, 0.0  ;;  %v6036_v3 = vsel %vm474_vm1, %v13464_v44, 0.0 }
 0x2cf   :  { %v7637_v55 = vrot.slane %v7623_v43, %v9557_v52  ;;  %v8988_v6 = vpop.f32.mrb[51].mxu0  ;;  %v6783_v59 = vcombine.high %v6775_v22, %v6775_v22  ;;  %v7639_v24 = vcombine.low %v6767_v17, %v6775_v22  ;;  %v6034_v22 = vsel %vm474_vm1, %v13446_v25, 0.0 }
 0x2d0   :  { %v6021_v58 = vadd.f32 %v6020_v61, %v6019_v30  ;;  %v6782_v53 = vrot.slane %v6768_v8, %v9557_v52 }
 0x2d1   :  { %v7638_v29 = vcombine.low %v7630_v16, %v7637_v55  ;;  %v7646_v60 = vrot.slane %v7639_v24, %v9557_v52  ;;  %v7653_v27 = vrot.slane %v6783_v59, %v9557_v52 }
 0x2d2   :  { %v6023_v45 = vadd.f32 %v6022_v14, %v6021_v58  ;;  %v6784_v43 = vcombine.high %v6782_v53, %v6782_v53 }
 0x2d3   :  { %8200 = vst.msk [vmem:[%s14280_s2 + $0xd0] sm:$0xff] %vm474_vm1, %v7638_v29  ;;  %v7654_v13 = vcombine.low %v7646_v60, %v7653_v27 }
 0x2d4   :  { %v5840_v1 = vpop.f32.mrb[52].mxu0  ;;  %v6025_v49 = vadd.f32 %v6024_v34, %v6023_v45  ;;  %v7655_v29 = vcombine.low %v6782_v53, %v6784_v43  ;;  %v6040_v45 = vsel %vm474_vm1, %v13492_v21, 0.0 }
 0x2d5   :  { %v8991_v35 = vpop.f32.mrb[53].mxu0  ;;  %8201 = vst.msk [vmem:[%s14280_s2 + $0xd8] sm:$0x3f] %vm8174_vm11, %v7654_v13 }
 0x2d6   :  { %v6027_v4 = vadd.f32 %v6026_v10, %v6025_v49 }
 0x2d8   :  { %v5845_v46 = vpop.f32.mrb[54].mxu0  ;;  %v6029_v41 = vadd.f32 %v6028_v56, %v6027_v4  ;;  %v7663_v56 = vrot.slane %v7655_v29, %v9557_v52 }
 0x2d9   :  { %v8994_v51 = vpop.f32.mrb[55].mxu0 }
 0x2da   :  { %v6031_v40 = vadd.f32 %v6030_v54, %v6029_v41 }
 0x2dc   :  { %v6033_v6 = vadd.f32 %v6032_v18, %v6031_v40 }
 0x2dd   :  { %v5850_v31 = vpop.f32.mrb[56].mxu0 }
 0x2de   :  { %v8997_v19 = vpop.f32.mrb[57].mxu0  ;;  %v6035_v61 = vadd.f32 %v6034_v22, %v6033_v6  ;;  %v6042_v22 = vsel %vm474_vm1, %v13512_v37, 0.0 }
 0x2e0   :  { %v6037_v34 = vadd.f32 %v6036_v3, %v6035_v61 }
 0x2e1   :  { %v4590_v17 = vpop.f32.mrb[50].mxu1  ;;  %v13619_v28 = vpop.f32.mrb[58].mxu0 }
 0x2e2   :  { %v13623_v47 = vadd.f32 %v5835_v33, %v4590_v17  ;;  %v8835_v16 = vpop.f32.mrb[51].mxu1  ;;  %v9000_v55 = vpop.f32.mrb[59].mxu0  ;;  %v6038_v33 = vsel %vm474_vm1, %v13480_v12, 0.0 }
 0x2e3   :  { %v6039_v49 = vadd.f32 %v6038_v33, %v6037_v34 }
 0x2e4   :  { %v6785_v59 = vcombine.high %v13623_v47, %v13623_v47  ;;  %v6792_v24 = vrot.slane %v13623_v47, %v9557_v52 }
 0x2e5   :  { %v4595_v30 = vpop.f32.mrb[52].mxu1  ;;  %v13631_v60 = vpop.f32.mrb[60].mxu0  ;;  %v6041_v17 = vadd.f32 %v6040_v45, %v6039_v49  ;;  %v6046_v49 = vsel %vm474_vm1, %v13540_v11, 0.0 }
 0x2e6   :  { %v6799_v27 = vrot.slane %v6785_v59, %v9557_v52  ;;  %v6800_v14 = vcombine.high %v6792_v24, %v6792_v24  ;;  %v13636_v35 = vadd.f32 %v5840_v1, %v4595_v30  ;;  %v8838_v58 = vpop.f32.mrb[53].mxu1  ;;  %v9003_v13 = vpop.f32.mrb[61].mxu0 }
 0x2e8   :  { %v6801_v8 = vcombine.high %v6799_v27, %v6799_v27  ;;  %v7656_v10 = vcombine.low %v6792_v24, %v6800_v14  ;;  %v6802_v51 = vcombine.high %v13636_v35, %v13636_v35  ;;  %v6809_v4 = vrot.slane %v13636_v35, %v9557_v52 }
 0x2e9   :  { %v4600_v53 = vpop.f32.mrb[54].mxu1  ;;  %v13645_v1 = vpop.f32.mrb[62].mxu0  ;;  %v6044_v24 = vsel %vm474_vm1, %v13522_v62, 0.0 }
 0x2ea   :  { %v7670_v54 = vrot.slane %v7656_v10, %v9557_v52  ;;  %v7672_v19 = vcombine.low %v6799_v27, %v6801_v8  ;;  %v6816_v41 = vrot.slane %v6802_v51, %v9557_v52  ;;  %v13649_v18 = vadd.f32 %v5845_v46, %v4600_v53  ;;  %v8841_v40 = vpop.f32.mrb[55].mxu1  ;;  %v9006_v43 = vpop.f32.mrb[63].mxu0 }
 0x2eb   :  { %v6817_v16 = vcombine.high %v6809_v4, %v6809_v4  ;;  %v7686_v3 = vrot.slane %v6809_v4, %v9557_v52  ;;  %v6043_v27 = vadd.f32 %v6042_v22, %v6041_v17  ;;  %v6048_v43 = vsel %vm474_vm1, %v13566_v39, 0.0 }
 0x2ec   :  { %v7671_v55 = vcombine.low %v7663_v56, %v7670_v54  ;;  %v7679_v6 = vrot.slane %v7672_v19, %v9557_v52  ;;  %v6818_v59 = vcombine.high %v6816_v41, %v6816_v41  ;;  %v6819_v46 = vcombine.high %v13649_v18, %v13649_v18 }
 0x2ed   :  { %v7688_v61 = vcombine.low %v6817_v16, %v6816_v41  ;;  %v6826_v29 = vrot.slane %v13649_v18, %v9557_v52  ;;  %v4605_v30 = vpop.f32.mrb[56].mxu1  ;;  %v13661_v33 = vpop.f32.mrb[64].mxu0  ;;  %v6045_v51 = vadd.f32 %v6044_v24, %v6043_v27 }
 0x2ee   :  { %8202 = vst.msk [vmem:[%s14280_s2 + $0xe0] sm:$0xff] %vm474_vm1, %v7671_v55  ;;  %v7687_v14 = vcombine.low %v7679_v6, %v7686_v3  ;;  %v13667_v58 = vadd.f32 %v5850_v31, %v4605_v30  ;;  %v8844_v13 = vpop.f32.mrb[57].mxu1  ;;  %v9009_v34 = vpop.f32.mrb[65].mxu0  ;;  %v6833_v45 = vrot.slane %v6819_v46, %v9557_v52  ;;  %v6050_v46 = vsel %vm474_vm1, %v13582_v9, 0.0 }
 0x2ef   :  { %v6834_v8 = vcombine.high %v6826_v29, %v6826_v29  ;;  %v7689_v10 = vcombine.low %v6818_v59, %v6826_v29  ;;  %v7696_v4 = vrot.slane %v7688_v61, %v9557_v52  ;;  %v6047_v3 = vadd.f32 %v6046_v49, %v6045_v51 }
 0x2f0   :  { %8203 = vst.msk [vmem:[%s14280_s2 + $0xe8] sm:$0x3f] %vm8174_vm11, %v7687_v14  ;;  %v6836_v56 = vcombine.high %v13667_v58, %v13667_v58  ;;  %v6843_v31 = vrot.slane %v13667_v58, %v9557_v52  ;;  %v6835_v53 = vcombine.high %v6833_v45, %v6833_v45 }
 0x2f1   :  { %v7703_v54 = vrot.slane %v7689_v10, %v9557_v52  ;;  %v7705_v19 = vcombine.low %v6834_v8, %v6833_v45  ;;  %v4610_v41 = vpop.f32.mrb[58].mxu1  ;;  %v13682_v40 = vpop.f32.mrb[66].mxu0  ;;  %v6049_v14 = vadd.f32 %v6048_v43, %v6047_v3  ;;  %v6052_v8 = vsel %vm474_vm1, %v13623_v47, 0.0 }
 0x2f2   :  { %v6850_v17 = vrot.slane %v6836_v56, %v9557_v52  ;;  %v6851_v22 = vcombine.high %v6843_v31, %v6843_v31  ;;  %v13688_v16 = vadd.f32 %v13619_v28, %v4610_v41  ;;  %v8847_v55 = vpop.f32.mrb[59].mxu1  ;;  %v9012_v6 = vpop.f32.mrb[67].mxu0  ;;  %v7719_v61 = vrot.slane %v6835_v53, %v9557_v52 }
 0x2f3   :  { %v7704_v59 = vcombine.low %v7696_v4, %v7703_v54  ;;  %v7712_v24 = vrot.slane %v7705_v19, %v9557_v52  ;;  %v6051_v4 = vadd.f32 %v6050_v46, %v6049_v14  ;;  %v6054_v3 = vsel %vm474_vm1, %v13636_v35, 0.0 }
 0x2f4   :  { %v6852_v29 = vcombine.high %v6850_v17, %v6850_v17  ;;  %v7721_v30 = vcombine.low %v6843_v31, %v6851_v22  ;;  %v6853_v27 = vcombine.high %v13688_v16, %v13688_v16  ;;  %v6860_v28 = vrot.slane %v13688_v16, %v9557_v52 }
 0x2f5   :  { %v7720_v13 = vcombine.low %v7712_v24, %v7719_v61  ;;  %8204 = vst.msk [vmem:[%s14280_s2 + $0xf0] sm:$0xff] %vm474_vm1, %v7704_v59  ;;  %v4615_v34 = vpop.f32.mrb[60].mxu1  ;;  %v13702_v45 = vpop.f32.mrb[68].mxu0  ;;  %v6053_v43 = vadd.f32 %v6052_v8, %v6051_v4  ;;  %v6056_v8 = vsel %vm474_vm1, %v13649_v18, 0.0 }
 0x2f6   :  { %v7722_v10 = vcombine.low %v6850_v17, %v6852_v29  ;;  %v6867_v51 = vrot.slane %v6853_v27, %v9557_v52  ;;  %v13708_v49 = vadd.f32 %v13631_v60, %v4615_v34  ;;  %v8850_v56 = vpop.f32.mrb[61].mxu1  ;;  %v9015_v31 = vpop.f32.mrb[69].mxu0  ;;  %v6868_v53 = vcombine.high %v6860_v28, %v6860_v28 }
 0x2f7   :  { %8205 = vst.msk [vmem:[%s14280_s2 + $0xf8] sm:$0x3f] %vm8174_vm11, %v7720_v13  ;;  %v7729_v54 = vrot.slane %v7721_v30, %v9557_v52  ;;  %v6055_v34 = vadd.f32 %v6054_v3, %v6053_v43  ;;  %v6058_v43 = vsel %vm474_vm1, %v13667_v58, 0.0 }
 0x2f8   :  { %v7736_v19 = vrot.slane %v7722_v10, %v9557_v52  ;;  %v6869_v41 = vcombine.high %v6867_v51, %v6867_v51  ;;  %v7738_v17 = vcombine.low %v6860_v28, %v6868_v53  ;;  %v6870_v60 = vcombine.high %v13708_v49, %v13708_v49 }
 0x2f9   :  { %v6877_v22 = vrot.slane %v13708_v49, %v9557_v52  ;;  %v4620_v55 = vpop.f32.mrb[62].mxu1  ;;  %v13720_v6 = vpop.f32.mrb[70].mxu0  ;;  %v7752_v24 = vrot.slane %v6867_v51, %v9557_v52 }
 0x2fa   :  { %v7737_v59 = vcombine.low %v7729_v54, %v7736_v19  ;;  %v13726_v61 = vadd.f32 %v13645_v1, %v4620_v55  ;;  %v8853_v46 = vpop.f32.mrb[63].mxu1  ;;  %v9018_v29 = vpop.f32.mrb[71].mxu0  ;;  %v7745_v30 = vrot.slane %v7738_v17, %v9557_v52  ;;  %v6884_v27 = vrot.slane %v6870_v60, %v9557_v52 }
 0x2fb   :  { %v6885_v14 = vcombine.high %v6877_v22, %v6877_v22  ;;  %v7754_v13 = vcombine.low %v6869_v41, %v6877_v22  ;;  %v6057_v55 = vadd.f32 %v6056_v8, %v6055_v34 }
 0x2fc   :  { %15003 = vst [vmem:[#allocation72_spill] sm:$0xff] %v13726_v61  ;;  %8206 = vst.msk [vmem:[%s14280_s2 + $0x100] sm:$0xff] %vm474_vm1, %v7737_v59  ;;  %v6887_v28 = vcombine.high %v13726_v61, %v13726_v61  ;;  %v6894_v1 = vrot.slane %v13726_v61, %v9557_v52  ;;  %v7753_v10 = vcombine.low %v7745_v30, %v7752_v24  ;;  %v6060_v24 = vsel %vm474_vm1, %v13688_v16, 0.0 }
 0x2fd   :  { %v7755_v51 = vcombine.low %v6885_v14, %v6884_v27  ;;  %v4625_v56 = vpop.f32.mrb[64].mxu1  ;;  %v13740_v31 = vpop.f32.mrb[72].mxu0  ;;  %v6886_v4 = vcombine.high %v6884_v27, %v6884_v27  ;;  %v7762_v60 = vrot.slane %v7754_v13, %v9557_v52  ;;  %v6059_v13 = vadd.f32 %v6058_v43, %v6057_v55 }
 0x2fe   :  { %v6901_v53 = vrot.slane %v6887_v28, %v9557_v52  ;;  %v6902_v54 = vcombine.high %v6894_v1, %v6894_v1  ;;  %v13744_v19 = vadd.f32 %v13661_v33, %v4625_v56  ;;  %v8856_v41 = vpop.f32.mrb[65].mxu1  ;;  %v9021_v17 = vpop.f32.mrb[73].mxu0  ;;  %8207 = vst.msk [vmem:[%s14280_s2 + $0x108] sm:$0x3f] %vm8174_vm11, %v7753_v10  ;;  %v6062_v10 = vsel %vm474_vm1, %v13708_v49, 0.0 }
 0x2ff   :  { %v7769_v22 = vrot.slane %v7755_v51, %v9557_v52  ;;  %v7771_v59 = vcombine.low %v6886_v4, %v6894_v1 }
 0x300   :  { %15004 = vst [vmem:[#allocation73_spill] sm:$0xff] %v13744_v19  ;;  %v6903_v3 = vcombine.high %v6901_v53, %v6901_v53  ;;  %v7785_v33 = vrot.slane %v6902_v54, %v9557_v52  ;;  %v6904_v29 = vcombine.high %v13744_v19, %v13744_v19  ;;  %v6911_v30 = vrot.slane %v13744_v19, %v9557_v52 }
 0x301   :  { %v7770_v46 = vcombine.low %v7762_v60, %v7769_v22  ;;  %v4630_v27 = vpop.f32.mrb[66].mxu1  ;;  %v13761_v14 = vpop.f32.mrb[74].mxu0  ;;  %v7778_v28 = vrot.slane %v7771_v59, %v9557_v52  ;;  %v6061_v54 = vadd.f32 %v6060_v24, %v6059_v13 }
 0x302   :  { %v13765_v1 = vadd.f32 %v13682_v40, %v4630_v27  ;;  %v8859_v34 = vpop.f32.mrb[67].mxu1  ;;  %v9024_v8 = vpop.f32.mrb[75].mxu0  ;;  %v7787_v51 = vcombine.low %v6901_v53, %v6903_v3  ;;  %v6918_v56 = vrot.slane %v6904_v29, %v9557_v52  ;;  %v6919_v4 = vcombine.high %v6911_v30, %v6911_v30 }
 0x303   :  { %8208 = vst.msk [vmem:[%s14280_s2 + $0x110] sm:$0xff] %vm474_vm1, %v7770_v46  ;;  %v7786_v41 = vcombine.low %v7778_v28, %v7785_v33  ;;  %v6063_v59 = vadd.f32 %v6062_v10, %v6061_v54  ;;  %v6064_v53 = vsel %vm474_vm1, %v13726_v61, 0.0  ;;  %v6066_v28 = vsel %vm474_vm1, %v13744_v19, 0.0 }
 0x304   :  { %15005 = vst [vmem:[#allocation7_spill] sm:$0xff] %v13765_v1  ;;  %v6921_v40 = vcombine.high %v13765_v1, %v13765_v1  ;;  %v6920_v17 = vcombine.high %v6918_v56, %v6918_v56  ;;  %v7788_v43 = vcombine.low %v6911_v30, %v6919_v4  ;;  %v6928_v60 = vrot.slane %v13765_v1, %v9557_v52 }
 0x305   :  { %v4635_v22 = vpop.f32.mrb[68].mxu1  ;;  %v13778_v55 = vpop.f32.mrb[76].mxu0  ;;  %8209 = vst.msk [vmem:[%s14280_s2 + $0x118] sm:$0x3f] %vm8174_vm11, %v7786_v41  ;;  %v7795_v29 = vrot.slane %v7787_v51, %v9557_v52  ;;  %v6065_v19 = vadd.f32 %v6064_v53, %v6063_v59 }
 0x306   :  { %v6935_v3 = vrot.slane %v6921_v40, %v9557_v52  ;;  %v13788_v33 = vadd.f32 %v13702_v45, %v4635_v22  ;;  %v8862_v24 = vpop.f32.mrb[69].mxu1  ;;  %v9027_v46 = vpop.f32.mrb[77].mxu0  ;;  %v7802_v30 = vrot.slane %v7788_v43, %v9557_v52  ;;  %v7804_v27 = vcombine.low %v6918_v56, %v6920_v17 }
 0x307   :  { %v6936_v13 = vcombine.high %v6928_v60, %v6928_v60  ;;  %v7818_v54 = vrot.slane %v6928_v60, %v9557_v52 }
 0x308   :  { %15006 = vst [vmem:[#allocation12_spill] sm:$0xff] %v13788_v33  ;;  %v6937_v34 = vcombine.high %v6935_v3, %v6935_v3  ;;  %v6938_v8 = vcombine.high %v13788_v33, %v13788_v33  ;;  %v6945_v10 = vrot.slane %v13788_v33, %v9557_v52  ;;  %v7803_v45 = vcombine.low %v7795_v29, %v7802_v30 }
 0x309   :  { %v7811_v4 = vrot.slane %v7804_v27, %v9557_v52  ;;  %v7820_v51 = vcombine.low %v6936_v13, %v6935_v3  ;;  %v4640_v41 = vpop.f32.mrb[70].mxu1  ;;  %v13800_v40 = vpop.f32.mrb[78].mxu0  ;;  %v6067_v13 = vadd.f32 %v6066_v28, %v6065_v19 }
 0x30a   :  { %v6952_v56 = vrot.slane %v6938_v8, %v9557_v52  ;;  %v6953_v17 = vcombine.high %v6945_v10, %v6945_v10  ;;  %v7821_v43 = vcombine.low %v6937_v34, %v6945_v10  ;;  %v13804_v22 = vadd.f32 %v13720_v6, %v4640_v41  ;;  %v8865_v24 = vpop.f32.mrb[71].mxu1  ;;  %v9030_v46 = vpop.f32.mrb[79].mxu0  ;;  %8210 = vst.msk [vmem:[%s14280_s2 + $0x120] sm:$0xff] %vm474_vm1, %v7803_v45 }
 0x30b   :  { %v7819_v60 = vcombine.low %v7811_v4, %v7818_v54  ;;  %v7828_v3 = vrot.slane %v7820_v51, %v9557_v52  ;;  %v6068_v6 = vsel %vm474_vm1, %v13765_v1, 0.0  ;;  %v6070_v51 = vsel %vm474_vm1, %v13788_v33, 0.0 }
 0x30c   :  { %15007 = vst [vmem:[#allocation75_spill] sm:$0xff] %v13804_v22  ;;  %v6954_v29 = vcombine.high %v6952_v56, %v6952_v56  ;;  %v7835_v30 = vrot.slane %v7821_v43, %v9557_v52  ;;  %v7837_v27 = vcombine.low %v6953_v17, %v6952_v56  ;;  %v6955_v59 = vcombine.high %v13804_v22, %v13804_v22 }
 0x30d   :  { %8211 = vst.msk [vmem:[%s14280_s2 + $0x128] sm:$0x3f] %vm8174_vm11, %v7819_v60  ;;  %v6962_v53 = vrot.slane %v13804_v22, %v9557_v52  ;;  %v4645_v34 = vpop.f32.mrb[72].mxu1  ;;  %v13822_v8 = vpop.f32.mrb[80].mxu0  ;;  %v6069_v17 = vadd.f32 %v6068_v6, %v6067_v13  ;;  %v6072_v46 = vsel %vm474_vm1, %v13804_v22, 0.0 }
 0x30e   :  { %v7836_v10 = vcombine.low %v7828_v3, %v7835_v30  ;;  %v7844_v19 = vrot.slane %v7837_v27, %v9557_v52  ;;  %v7851_v28 = vrot.slane %v6954_v29, %v9557_v52  ;;  %v13827_v45 = vadd.f32 %v13740_v31, %v4645_v34  ;;  %v8868_v4 = vpop.f32.mrb[73].mxu1  ;;  %v9033_v54 = vpop.f32.mrb[81].mxu0 }
 0x30f   :  { %v6969_v41 = vrot.slane %v6955_v59, %v9557_v52  ;;  %v6970_v56 = vcombine.high %v6962_v53, %v6962_v53  ;;  %v6071_v27 = vadd.f32 %v6070_v51, %v6069_v17 }
 0x310   :  { %15008 = vst [vmem:[#allocation66_spill] sm:$0xff] %v13827_v45  ;;  %v7852_v43 = vcombine.low %v7844_v19, %v7851_v28  ;;  %8212 = vst.msk [vmem:[%s14280_s2 + $0x130] sm:$0xff] %vm474_vm1, %v7836_v10  ;;  %v6972_v24 = vcombine.high %v13827_v45, %v13827_v45  ;;  %v6979_v31 = vrot.slane %v13827_v45, %v9557_v52 }
 0x311   :  { %v6971_v60 = vcombine.high %v6969_v41, %v6969_v41  ;;  %v7853_v3 = vcombine.low %v6962_v53, %v6970_v56  ;;  %v4650_v29 = vpop.f32.mrb[74].mxu1  ;;  %v13842_v30 = vpop.f32.mrb[82].mxu0  ;;  %v6073_v28 = vadd.f32 %v6072_v46, %v6071_v27 }
 0x312   :  { %8213 = vst.msk [vmem:[%s14280_s2 + $0x138] sm:$0x3f] %vm8174_vm11, %v7852_v43  ;;  %v6986_v13 = vrot.slane %v6972_v24, %v9557_v52  ;;  %v6987_v6 = vcombine.high %v6979_v31, %v6979_v31  ;;  %v13850_v59 = vadd.f32 %v13761_v14, %v4650_v29  ;;  %v8871_v34 = vpop.f32.mrb[75].mxu1  ;;  %v9036_v10 = vpop.f32.mrb[83].mxu0  ;;  %v6074_v14 = vsel %vm474_vm1, %v13827_v45, 0.0 }
 0x313   :  { %v7854_v19 = vcombine.low %v6969_v41, %v6971_v60  ;;  %v7861_v54 = vrot.slane %v7853_v3, %v9557_v52 }
 0x314   :  { %15009 = vst [vmem:[#allocation68_spill] sm:$0xff] %v13850_v59  ;;  %v7870_v53 = vcombine.low %v6979_v31, %v6987_v6  ;;  %v6988_v4 = vcombine.high %v6986_v13, %v6986_v13  ;;  %v6989_v56 = vcombine.high %v13850_v59, %v13850_v59  ;;  %v6996_v17 = vrot.slane %v13850_v59, %v9557_v52 }
 0x315   :  { %v7868_v51 = vrot.slane %v7854_v19, %v9557_v52  ;;  %v4655_v43 = vpop.f32.mrb[76].mxu1  ;;  %v13858_v24 = vpop.f32.mrb[84].mxu0  ;;  %v7884_v31 = vrot.slane %v6986_v13, %v9557_v52  ;;  %v6076_v19 = vsel %vm474_vm1, %v13850_v59, 0.0 }
 0x316   :  { %v7877_v41 = vrot.slane %v7870_v53, %v9557_v52  ;;  %v13865_v46 = vadd.f32 %v13778_v55, %v4655_v43  ;;  %v8874_v60 = vpop.f32.mrb[77].mxu1  ;;  %v9039_v3 = vpop.f32.mrb[85].mxu0  ;;  %v7003_v27 = vrot.slane %v6989_v56, %v9557_v52  ;;  %v7004_v6 = vcombine.high %v6996_v17, %v6996_v17 }
 0x317   :  { %v7869_v29 = vcombine.low %v7861_v54, %v7868_v51  ;;  %v7886_v34 = vcombine.low %v6988_v4, %v6996_v17  ;;  %v6075_v55 = vadd.f32 %v6074_v14, %v6073_v28 }
 0x318   :  { %15010 = vst [vmem:[#allocation14_spill] sm:$0xff] %v13865_v46  ;;  %v7885_v10 = vcombine.low %v7877_v41, %v7884_v31  ;;  %v7006_v45 = vcombine.high %v13865_v46, %v13865_v46  ;;  %v7013_v13 = vrot.slane %v13865_v46, %v9557_v52  ;;  %v7887_v53 = vcombine.low %v7004_v6, %v7003_v27 }
 0x319   :  { %8214 = vst.msk [vmem:[%s14280_s2 + $0x140] sm:$0xff] %vm474_vm1, %v7869_v29  ;;  %v7005_v54 = vcombine.high %v7003_v27, %v7003_v27  ;;  %v4660_v51 = vpop.f32.mrb[78].mxu1  ;;  %v13878_v4 = vpop.f32.mrb[86].mxu0  ;;  %v6078_v56 = vsel %vm474_vm1, %v13865_v46, 0.0  ;;  %v6077_v31 = vadd.f32 %v6076_v19, %v6075_v55  ;;  %v7894_v60 = vrot.slane %v7886_v34, %v9557_v52 }
 0x31a   :  { %8215 = vst.msk [vmem:[%s14280_s2 + $0x148] sm:$0x3f] %vm8174_vm11, %v7885_v10  ;;  %v7020_v17 = vrot.slane %v7006_v45, %v9557_v52  ;;  %v7021_v43 = vcombine.high %v7013_v13, %v7013_v13  ;;  %v13888_v41 = vadd.f32 %v13800_v40, %v4660_v51  ;;  %v8877_v28 = vpop.f32.mrb[79].mxu1  ;;  %v9042_v14 = vpop.f32.mrb[87].mxu0  ;;  %v7901_v3 = vrot.slane %v7887_v53, %v9557_v52 }
 0x31b   :  { %v7903_v29 = vcombine.low %v7005_v54, %v7013_v13  ;;  %v6079_v40 = vadd.f32 %v6078_v56, %v6077_v31 }
 0x31c   :  { %v7022_v27 = vcombine.high %v7020_v17, %v7020_v17  ;;  %v7917_v6 = vrot.slane %v7021_v43, %v9557_v52  ;;  %v6080_v10 = vsel %vm474_vm1, %v13888_v41, 0.0  ;;  %v7023_v45 = vcombine.high %v13888_v41, %v13888_v41 }
 0x31d   :  { %v7902_v46 = vcombine.low %v7894_v60, %v7901_v3  ;;  %v7910_v51 = vrot.slane %v7903_v29, %v9557_v52  ;;  %v7030_v19 = vrot.slane %v13888_v41, %v9557_v52  ;;  %v4665_v34 = vpop.f32.mrb[80].mxu1  ;;  %v13900_v55 = vpop.f32.mrb[88].mxu0  ;;  %v6081_v14 = vadd.f32 %v6080_v10, %v6079_v40 }
 0x31e   :  { %v7037_v13 = vrot.slane %v7023_v45, %v9557_v52  ;;  %v13904_v53 = vadd.f32 %v13822_v8, %v4665_v34  ;;  %v8880_v54 = vpop.f32.mrb[81].mxu1  ;;  %v9045_v43 = vpop.f32.mrb[89].mxu0  ;;  %v7919_v28 = vcombine.low %v7020_v17, %v7022_v27 }
 0x31f   :  { %8216 = vst.msk [vmem:[%s14280_s2 + $0x150] sm:$0xff] %vm474_vm1, %v7902_v46  ;;  %v7918_v56 = vcombine.low %v7910_v51, %v7917_v6  ;;  %v7038_v31 = vcombine.high %v7030_v19, %v7030_v19 }
 0x320   :  { %v7039_v60 = vcombine.high %v7037_v13, %v7037_v13  ;;  %v6082_v3 = vsel %vm474_vm1, %v13904_v53, 0.0  ;;  %v7040_v29 = vcombine.high %v13904_v53, %v13904_v53  ;;  %v7047_v46 = vrot.slane %v13904_v53, %v9557_v52 }
 0x321   :  { %8217 = vst.msk [vmem:[%s14280_s2 + $0x158] sm:$0x3f] %vm8174_vm11, %v7918_v56  ;;  %v7920_v8 = vcombine.low %v7030_v19, %v7038_v31  ;;  %v6083_v45 = vadd.f32 %v6082_v3, %v6081_v14  ;;  %v4670_v17 = vpop.f32.mrb[82].mxu1  ;;  %v13920_v27 = vpop.f32.mrb[90].mxu0  ;;  %v7927_v54 = vrot.slane %v7919_v28, %v9557_v52 }
 0x322   :  { %v7936_v6 = vcombine.low %v7037_v13, %v7039_v60  ;;  %v7054_v10 = vrot.slane %v7040_v29, %v9557_v52  ;;  %v13924_v40 = vadd.f32 %v13842_v30, %v4670_v17  ;;  %v8883_v51 = vpop.f32.mrb[83].mxu1  ;;  %v9048_v34 = vpop.f32.mrb[91].mxu0  ;;  %v7055_v19 = vcombine.high %v7047_v46, %v7047_v46 }
 0x323   :  { %v7934_v43 = vrot.slane %v7920_v8, %v9557_v52  ;;  %v7950_v56 = vrot.slane %v7047_v46, %v9557_v52 }
 0x324   :  { %v7943_v14 = vrot.slane %v7936_v6, %v9557_v52  ;;  %v6084_v31 = vsel %vm474_vm1, %v13924_v40, 0.0  ;;  %v7056_v13 = vcombine.high %v7054_v10, %v7054_v10  ;;  %v7057_v60 = vcombine.high %v13924_v40, %v13924_v40 }
 0x325   :  { %v7935_v30 = vcombine.low %v7927_v54, %v7934_v43  ;;  %v7952_v3 = vcombine.low %v7055_v19, %v7054_v10  ;;  %v6085_v29 = vadd.f32 %v6084_v31, %v6083_v45  ;;  %v7064_v28 = vrot.slane %v13924_v40, %v9557_v52  ;;  %v4675_v17 = vpop.f32.mrb[84].mxu1  ;;  %v13936_v8 = vpop.f32.mrb[92].mxu0 }
 0x326   :  { %v7951_v51 = vcombine.low %v7943_v14, %v7950_v56  ;;  %v7071_v46 = vrot.slane %v7057_v60, %v9557_v52  ;;  %v13940_v6 = vadd.f32 %v13858_v24, %v4675_v17  ;;  %v8886_v34 = vpop.f32.mrb[85].mxu1  ;;  %v9051_v59 = vpop.f32.mrb[93].mxu0 }
 0x327   :  { %8218 = vst.msk [vmem:[%s14280_s2 + $0x160] sm:$0xff] %vm474_vm1, %v7935_v30  ;;  %v7072_v45 = vcombine.high %v7064_v28, %v7064_v28  ;;  %v7953_v10 = vcombine.low %v7056_v13, %v7064_v28  ;;  %v7960_v19 = vrot.slane %v7952_v3, %v9557_v52 }
 0x328   :  { %8219 = vst.msk [vmem:[%s14280_s2 + $0x168] sm:$0x3f] %vm8174_vm11, %v7951_v51  ;;  %v7073_v54 = vcombine.high %v7071_v46, %v7071_v46  ;;  %v6086_v43 = vsel %vm474_vm1, %v13940_v6, 0.0  ;;  %v7074_v24 = vcombine.high %v13940_v6, %v13940_v6  ;;  %v7081_v59 = vrot.slane %v13940_v6, %v9557_v52 }
 0x329   :  { %v7967_v56 = vrot.slane %v7953_v10, %v9557_v52  ;;  %v7969_v14 = vcombine.low %v7072_v45, %v7071_v46  ;;  %v6087_v31 = vadd.f32 %v6086_v43, %v6085_v29  ;;  %v4680_v13 = vpop.f32.mrb[86].mxu1  ;;  %v13958_v60 = vpop.f32.mrb[94].mxu0 }
 0x32a   :  { %v7983_v30 = vrot.slane %v7073_v54, %v9557_v52  ;;  %v7088_v28 = vrot.slane %v7074_v24, %v9557_v52  ;;  %v7089_v17 = vcombine.high %v7081_v59, %v7081_v59  ;;  %v13963_v51 = vadd.f32 %v13878_v4, %v4680_v13  ;;  %v8889_v34 = vpop.f32.mrb[87].mxu1  ;;  %v9054_v22 = vpop.f32.mrb[95].mxu0 }
 0x32b   :  { %v7968_v33 = vcombine.low %v7960_v19, %v7967_v56  ;;  %v7976_v3 = vrot.slane %v7969_v14, %v9557_v52 }
 0x32c   :  { %v7090_v1 = vcombine.high %v7088_v28, %v7088_v28  ;;  %v7985_v10 = vcombine.low %v7081_v59, %v7089_v17  ;;  %v6088_v29 = vsel %vm474_vm1, %v13963_v51, 0.0  ;;  %v7091_v46 = vcombine.high %v13963_v51, %v13963_v51 }
 0x32d   :  { %v7984_v45 = vcombine.low %v7976_v3, %v7983_v30  ;;  %8220 = vst.msk [vmem:[%s14280_s2 + $0x170] sm:$0xff] %vm474_vm1, %v7968_v33  ;;  %v6089_v4 = vadd.f32 %v6088_v29, %v6087_v31  ;;  %v7098_v22 = vrot.slane %v13963_v51, %v9557_v52  ;;  %v4685_v54 = vpop.f32.mrb[88].mxu1  ;;  %v13976_v43 = vpop.f32.mrb[96].mxu0 }
 0x32e   :  { %v7986_v24 = vcombine.low %v7088_v28, %v7090_v1  ;;  %v7105_v59 = vrot.slane %v7091_v46, %v9557_v52  ;;  %v13980_v19 = vadd.f32 %v13900_v55, %v4685_v54  ;;  %v8892_v56 = vpop.f32.mrb[89].mxu1  ;;  %v9057_v14 = vpop.f32.mrb[97].mxu0  ;;  %v7993_v31 = vrot.slane %v7985_v10, %v9557_v52 }
 0x32f   :  { %8221 = vst.msk [vmem:[%s14280_s2 + $0x178] sm:$0x3f] %vm8174_vm11, %v7984_v45  ;;  %v7106_v33 = vcombine.high %v7098_v22, %v7098_v22 }
 0x330   :  { %v8000_v13 = vrot.slane %v7986_v24, %v9557_v52  ;;  %v6090_v1 = vsel %vm474_vm1, %v13980_v19, 0.0  ;;  %v7107_v30 = vcombine.high %v7105_v59, %v7105_v59  ;;  %v7108_v55 = vcombine.high %v13980_v19, %v13980_v19 }
 0x331   :  { %v8002_v28 = vcombine.low %v7098_v22, %v7106_v33  ;;  %v6091_v17 = vadd.f32 %v6090_v1, %v6089_v4  ;;  %v7115_v34 = vrot.slane %v13980_v19, %v9557_v52  ;;  %v4690_v3 = vpop.f32.mrb[90].mxu1  ;;  %v8016_v46 = vrot.slane %v7105_v59, %v9557_v52 }
 0x332   :  { %v8001_v29 = vcombine.low %v7993_v31, %v8000_v13  ;;  %v13996_v10 = vadd.f32 %v13920_v27, %v4690_v3  ;;  %v8895_v45 = vpop.f32.mrb[91].mxu1  ;;  %v7122_v24 = vrot.slane %v7108_v55, %v9557_v52 }
 0x333   :  { %v8009_v54 = vrot.slane %v8002_v28, %v9557_v52  ;;  %v7123_v22 = vcombine.high %v7115_v34, %v7115_v34  ;;  %v8018_v4 = vcombine.low %v7107_v30, %v7115_v34 }
 0x334   :  { %8222 = vst.msk [vmem:[%s14280_s2 + $0x180] sm:$0xff] %vm474_vm1, %v8001_v29  ;;  %v6092_v56 = vsel %vm474_vm1, %v13996_v10, 0.0  ;;  %v7125_v59 = vcombine.high %v13996_v10, %v13996_v10  ;;  %v7132_v27 = vrot.slane %v13996_v10, %v9557_v52  ;;  %v7124_v1 = vcombine.high %v7122_v24, %v7122_v24 }
 0x335   :  { %v8017_v14 = vcombine.low %v8009_v54, %v8016_v46  ;;  %v8019_v33 = vcombine.low %v7123_v22, %v7122_v24  ;;  %v6093_v31 = vadd.f32 %v6092_v56, %v6091_v17  ;;  %v4695_v13 = vpop.f32.mrb[92].mxu1  ;;  %v8026_v3 = vrot.slane %v8018_v4, %v9557_v52 }
 0x336   :  { %v7139_v30 = vrot.slane %v7125_v59, %v9557_v52  ;;  %v7140_v28 = vcombine.high %v7132_v27, %v7132_v27  ;;  %v14012_v55 = vadd.f32 %v13936_v8, %v4695_v13  ;;  %v8898_v34 = vpop.f32.mrb[93].mxu1  ;;  %v8035_v17 = vcombine.low %v7124_v1, %v7132_v27 }
 0x337   :  { %8223 = vst.msk [vmem:[%s14280_s2 + $0x188] sm:$0x3f] %vm8174_vm11, %v8017_v14  ;;  %v8033_v29 = vrot.slane %v8019_v33, %v9557_v52 }
 0x338   :  { %v7141_v46 = vcombine.high %v7139_v30, %v7139_v30  ;;  %v8049_v45 = vrot.slane %v7140_v28, %v9557_v52  ;;  %v6094_v54 = vsel %vm474_vm1, %v14012_v55, 0.0  ;;  %v7142_v22 = vcombine.high %v14012_v55, %v14012_v55 }
 0x339   :  { %v8034_v24 = vcombine.low %v8026_v3, %v8033_v29  ;;  %v6095_v8 = vadd.f32 %v6094_v54, %v6093_v31  ;;  %v7149_v56 = vrot.slane %v14012_v55, %v9557_v52  ;;  %v4700_v59 = vpop.f32.mrb[94].mxu1  ;;  %v8042_v4 = vrot.slane %v8035_v17, %v9557_v52 }
 0x33a   :  { %v8051_v14 = vcombine.low %v7139_v30, %v7141_v46  ;;  %v14029_v33 = vadd.f32 %v13958_v60, %v4700_v59  ;;  %v8901_v27 = vpop.f32.mrb[95].mxu1  ;;  %v7156_v31 = vrot.slane %v7142_v22, %v9557_v52 }
 0x33b   :  { %8224 = vst.msk [vmem:[%s14280_s2 + $0x190] sm:$0xff] %vm474_vm1, %v8034_v24  ;;  %v7157_v13 = vcombine.high %v7149_v56, %v7149_v56  ;;  %v8050_v1 = vcombine.low %v8042_v4, %v8049_v45 }
 0x33c   :  { %v6096_v28 = vsel %vm474_vm1, %v14029_v33, 0.0  ;;  %v7159_v34 = vcombine.high %v14029_v33, %v14029_v33  ;;  %v7158_v30 = vcombine.high %v7156_v31, %v7156_v31  ;;  %v7166_v29 = vrot.slane %v14029_v33, %v9557_v52 }
 0x33d   :  { %v8052_v3 = vcombine.low %v7149_v56, %v7157_v13  ;;  %v6097_v60 = vadd.f32 %v6096_v28, %v6095_v8  ;;  %v4705_v46 = vpop.f32.mrb[96].mxu1  ;;  %v8059_v17 = vrot.slane %v8051_v14, %v9557_v52  ;;  %8225 = vst.msk [vmem:[%s14280_s2 + $0x198] sm:$0x3f] %vm8174_vm11, %v8050_v1 }
 0x33e   :  { %v7173_v45 = vrot.slane %v7159_v34, %v9557_v52  ;;  %v9119_v54 = vadd.f32 %v13976_v43, %v4705_v46  ;;  %v8904_v24 = vpop.f32.mrb[97].mxu1  ;;  %v8068_v56 = vcombine.low %v7156_v31, %v7158_v30  ;;  %v7174_v8 = vcombine.high %v7166_v29, %v7166_v29 }
 0x33f   :  { %v8066_v22 = vrot.slane %v8052_v3, %v9557_v52  ;;  %v8082_v59 = vrot.slane %v7166_v29, %v9557_v52 }
 0x340   :  { %v6098_v4 = vsel %vm474_vm1, %v9119_v54, 0.0  ;;  %v7175_v27 = vcombine.high %v7173_v45, %v7173_v45  ;;  %v7176_v14 = vcombine.high %v9119_v54, %v9119_v54  ;;  %v7183_v13 = vrot.slane %v9119_v54, %v9557_v52 }
 0x341   :  { %v8067_v28 = vcombine.low %v8059_v17, %v8066_v22  ;;  %v8075_v1 = vrot.slane %v8068_v56, %v9557_v52  ;;  %v8084_v61 = vcombine.low %v7174_v8, %v7173_v45  ;;  %v6099_v34 = vadd.f32 %v6098_v4, %v6097_v60 }
 0x342   :  { %v7190_v43 = vrot.slane %v7176_v14, %v9557_v52  ;;  %v7191_v46 = vcombine.high %v7183_v13, %v7183_v13  ;;  %v8085_v24 = vcombine.low %v7175_v27, %v7183_v13 }
 0x343   :  { %8226 = vst.msk [vmem:[%s14280_s2 + $0x1a0] sm:$0xff] %vm474_vm1, %v8067_v28  ;;  %v8083_v31 = vcombine.low %v8075_v1, %v8082_v59  ;;  %v6100_v30 = vrot.slane %v6099_v34, 4  ;;  %v8092_v3 = vrot.slane %v8084_v61, %v9557_v52 }
 0x344   :  { %v7192_v29 = vcombine.high %v7190_v43, %v7190_v43  ;;  %v8099_v17 = vrot.slane %v8085_v24, %v9557_v52  ;;  %v8101_v22 = vcombine.low %v7191_v46, %v7190_v43 }
 0x345   :  { %8227 = vst.msk [vmem:[%s14280_s2 + $0x1a8] sm:$0x3f] %vm8174_vm11, %v8083_v31  ;;  %v6101_v60 = vadd.f32 %v6100_v30, %v6099_v34 }
 0x346   :  { %v8100_v45 = vcombine.low %v8092_v3, %v8099_v17  ;;  %v8108_v56 = vrot.slane %v8101_v22, %v9557_v52  ;;  %v8115_v8 = vrot.slane %v7192_v29, %v9557_v52 }
 0x347   :  { %v6102_v4 = vrot.slane %v6101_v60, 2 }
 0x348   :  { %v8116_v59 = vcombine.low %v8108_v56, %v8115_v8  ;;  %8228 = vst.msk [vmem:[%s14280_s2 + $0x1b0] sm:$0xff] %vm474_vm1, %v8100_v45 }
 0x349   :  { %v6103_v61 = vadd.f32 %v6102_v4, %v6101_v60 }
 0x34a   :  { %8229 = vst.msk [vmem:[%s14280_s2 + $0x1b8] sm:$0x3f] %vm8174_vm11, %v8116_v59  ;;  %s9295_s2 = smov [#allocation2]  }
 0x34b   :  { %v6104_v27 = vrot.slane %v6103_v61, 1  ;;  %s8238_s25 = sshll.u32 %s9295_s2, 4  ;;  %s8239_s25 = int_to_ptr.vmem [resolvable:$true] %s8238_s25 }
 0x34c   :  { %s9265_s26 = scalar_lea.vmem %s8239_s25, 32  ;;  %p9270_p1 = scmp.lt.s32.totalorder %s8239_s25, %s8239_s25 }
 0x34d   :  { %v6105_v14 = vadd.f32 %v6104_v27, %v6103_v61  ;;  %p9266_p0 = scmp.ne.s32.totalorder %s8239_s25, %s9265_s26  ;;  %p9271_p2 = scmp.lt.s32.totalorder %s9265_s26, %s9265_s26 }
 0x34f   :  { %v14075_v13 = vmul.f32 0.0025510204, %v6105_v14  ;;  %p9272_p3 = por %p9271_p2, %p9270_p1 }
 0x351   :  { %v14078_v52 = vsub.f32 %v9119_v54, %v14075_v13  ;;  %6157 = vst.msk [vmem:[#allocation2] sm:$0x1] %vm6156_vm12, %v14075_v13  ;;  %v14084_v28 = vsub.f32 %v13888_v41, %v14075_v13  ;;  %v14088_v1 = vsub.f32 %v13904_v53, %v14075_v13  ;;  %v14092_v34 = vsub.f32 %v13924_v40, %v14075_v13  ;;  %p9273_p4 = pnand %p9272_p3, %p9266_p0 }
 0x352   :  { %v14096_v43 = vsub.f32 %v13940_v6, %v14075_v13  ;;  %v14100_v54 = vsub.f32 %v13963_v51, %v14075_v13  ;;  %v14104_v41 = vsub.f32 %v13980_v19, %v14075_v13  ;;  %v14108_v53 = vsub.f32 %v13996_v10, %v14075_v13 }
 0x353   :  { %v14112_v40 = vsub.f32 %v14012_v55, %v14075_v13  ;;  %v14116_v6 = vsub.f32 %v14029_v33, %v14075_v13  ;;  %v6107_v51 = vsub.f32 %v13047_v15, %v14075_v13  ;;  %v6108_v46 = vsub.f32 %v13050_v42, %v14075_v13 }
 0x354   :  { %v6109_v19 = vsub.f32 %v13053_v5, %v14075_v13  ;;  %v6110_v10 = vsub.f32 %v13113_v7, %v14075_v13  ;;  %v6111_v55 = vsub.f32 %v13161_v48, %v14075_v13  ;;  %v6112_v15 = vsub.f32 %v13216_v57, %v14075_v13 }
 0x355   :  { %v6158_v24 = vmul.f32 %v6107_v51, %v6107_v51  ;;  %v6159_v31 = vmul.f32 %v6108_v46, %v6108_v46  ;;  %v6113_v5 = vsub.f32 %v13244_v20, %v14075_v13  ;;  %v6114_v48 = vsub.f32 %v13295_v0, %v14075_v13 }
 0x356   :  { %v6160_v30 = vmul.f32 %v6109_v19, %v6109_v19  ;;  %v6161_v3 = vmul.f32 %v6110_v10, %v6110_v10  ;;  %v6162_v17 = vmul.f32 %v6111_v55, %v6111_v55  ;;  %v6163_v60 = vmul.f32 %v6112_v15, %v6112_v15 }
 0x357   :  { %v6207_v33 = vsel %vm474_vm1, %v6158_v24, 0.0  ;;  %v6208_v42 = vsel %vm474_vm1, %v6159_v31, 0.0  ;;  %v6115_v57 = vsub.f32 %v13317_v23, %v14075_v13  ;;  %v6164_v8 = vmul.f32 %v6113_v5, %v6113_v5 }
 0x358   :  { %v6209_v29 = vadd.f32 %v6208_v42, %v6207_v33  ;;  %v6210_v7 = vsel %vm474_vm1, %v6160_v30, 0.0  ;;  %v6212_v45 = vsel %vm474_vm1, %v6161_v3, 0.0  ;;  %v6214_v4 = vsel %vm474_vm1, %v6162_v17, 0.0 }
 0x359   :  { %v6116_v20 = vsub.f32 %v13335_v50, %v14075_v13  ;;  %v6165_v61 = vmul.f32 %v6114_v48, %v6114_v48  ;;  %v6216_v27 = vsel %vm474_vm1, %v6163_v60, 0.0  ;;  %v6117_v0 = vsub.f32 %v13360_v2, %v14075_v13 }
 0x35a   :  { %v6211_v22 = vadd.f32 %v6210_v7, %v6209_v29  ;;  %v6166_v51 = vmul.f32 %v6115_v57, %v6115_v57  ;;  %v6218_v46 = vsel %vm474_vm1, %v6164_v8, 0.0  ;;  %v6118_v23 = vsub.f32 %v13376_v36, %v14075_v13 }
 0x35b   :  { %v6167_v24 = vmul.f32 %v6116_v20, %v6116_v20  ;;  %v6220_v10 = vsel %vm474_vm1, %v6165_v61, 0.0  ;;  %v6119_v50 = vsub.f32 %v13390_v63, %v14075_v13  ;;  %v6168_v55 = vmul.f32 %v6117_v0, %v6117_v0 }
 0x35c   :  { %v6213_v56 = vadd.f32 %v6212_v45, %v6211_v22  ;;  %v6222_v30 = vsel %vm474_vm1, %v6166_v51, 0.0  ;;  %v6120_v2 = vsub.f32 %v13404_v38, %v14075_v13  ;;  %v6169_v15 = vmul.f32 %v6118_v23, %v6118_v23 }
 0x35d   :  { %v6224_v3 = vsel %vm474_vm1, %v6167_v24, 0.0  ;;  %v6121_v36 = vsub.f32 %v13418_v26, %v14075_v13  ;;  %v6170_v29 = vmul.f32 %v6119_v50, %v6119_v50  ;;  %v6226_v5 = vsel %vm474_vm1, %v6168_v55, 0.0 }
 0x35e   :  { %v6215_v59 = vadd.f32 %v6214_v4, %v6213_v56  ;;  %v6122_v63 = vsub.f32 %v13436_v32, %v14075_v13  ;;  %v6171_v7 = vmul.f32 %v6120_v2, %v6120_v2  ;;  %v6228_v22 = vsel %vm474_vm1, %v6169_v15, 0.0 }
 0x35f   :  { %v6123_v38 = vsub.f32 %v13446_v25, %v14075_v13  ;;  %v6172_v60 = vmul.f32 %v6121_v36, %v6121_v36  ;;  %v6230_v45 = vsel %vm474_vm1, %v6170_v29, 0.0  ;;  %v6124_v26 = vsub.f32 %v13464_v44, %v14075_v13 }
 0x360   :  { %v6217_v14 = vadd.f32 %v6216_v27, %v6215_v59  ;;  %v6173_v57 = vmul.f32 %v6122_v63, %v6122_v63  ;;  %v6232_v8 = vsel %vm474_vm1, %v6171_v7, 0.0  ;;  %v6125_v32 = vsub.f32 %v13480_v12, %v14075_v13 }
 0x361   :  { %v6174_v59 = vmul.f32 %v6123_v38, %v6123_v38  ;;  %v6234_v20 = vsel %vm474_vm1, %v6172_v60, 0.0  ;;  %v6126_v25 = vsub.f32 %v13492_v21, %v14075_v13  ;;  %v6175_v27 = vmul.f32 %v6124_v26, %v6124_v26 }
 0x362   :  { %v6219_v19 = vadd.f32 %v6218_v46, %v6217_v14  ;;  %v6236_v14 = vsel %vm474_vm1, %v6173_v57, 0.0  ;;  %v6127_v44 = vsub.f32 %v13512_v37, %v14075_v13  ;;  %v6176_v51 = vmul.f32 %v6125_v32, %v6125_v32 }
 0x363   :  { %v6238_v46 = vsel %vm474_vm1, %v6174_v59, 0.0  ;;  %v6128_v12 = vsub.f32 %v13522_v62, %v14075_v13  ;;  %v6177_v23 = vmul.f32 %v6126_v25, %v6126_v25  ;;  %v6240_v24 = vsel %vm474_vm1, %v6175_v27, 0.0 }
 0x364   :  { %v6221_v31 = vadd.f32 %v6220_v10, %v6219_v19  ;;  %v6129_v21 = vsub.f32 %v13540_v11, %v14075_v13  ;;  %v6242_v50 = vsel %vm474_vm1, %v6176_v51, 0.0  ;;  %v6130_v37 = vsub.f32 %v13566_v39, %v14075_v13 }
 0x365   :  { %v6131_v62 = vsub.f32 %v13582_v9, %v14075_v13  ;;  %v6132_v11 = vsub.f32 %v13623_v47, %v14075_v13  ;;  %v6133_v39 = vsub.f32 %v13636_v35, %v14075_v13  ;;  %v6134_v9 = vsub.f32 %v13649_v18, %v14075_v13 }
 0x366   :  { %v6223_v33 = vadd.f32 %v6222_v30, %v6221_v31  ;;  %v6178_v31 = vmul.f32 %v6127_v44, %v6127_v44  ;;  %v6179_v30 = vmul.f32 %v6128_v12, %v6128_v12  ;;  %v6180_v15 = vmul.f32 %v6129_v21, %v6129_v21 }
 0x367   :  { %v6181_v36 = vmul.f32 %v6130_v37, %v6130_v37  ;;  %v6135_v47 = vsub.f32 %v13667_v58, %v14075_v13  ;;  %v6184_v60 = vmul.f32 %v6133_v39, %v6133_v39  ;;  %v6136_v35 = vsub.f32 %v13688_v16, %v14075_v13  ;;  %v15011_v58 = vld [vmem:[#allocation72_spill] sm:$0xff]  ;;  %v15012_v16 = vld [vmem:[#allocation73_spill] sm:$0xff] }
 0x368   :  { %v6225_v42 = vadd.f32 %v6224_v3, %v6223_v33  ;;  %v6244_v33 = vsel %vm474_vm1, %v6177_v23, 0.0  ;;  %v6246_v3 = vsel %vm474_vm1, %v6178_v31, 0.0  ;;  %v6248_v29 = vsel %vm474_vm1, %v6179_v30, 0.0 }
 0x369   :  { %v6250_v63 = vsel %vm474_vm1, %v6180_v15, 0.0  ;;  %v6185_v26 = vmul.f32 %v6134_v9, %v6134_v9  ;;  %v6137_v18 = vsub.f32 %v13708_v49, %v14075_v13  ;;  %v6258_v32 = vsel %vm474_vm1, %v6184_v60, 0.0  ;;  %v15013_v49 = vld [vmem:[#allocation7_spill] sm:$0xff] }
 0x36a   :  { %v6227_v17 = vadd.f32 %v6226_v5, %v6225_v42 }
 0x36b   :  { %v6260_v25 = vsel %vm474_vm1, %v6185_v26, 0.0  ;;  %v6197_v26 = vmul.f32 %v14084_v28, %v14084_v28 }
 0x36c   :  { %v6229_v48 = vadd.f32 %v6228_v22, %v6227_v17  ;;  %v6182_v17 = vmul.f32 %v6131_v62, %v6131_v62  ;;  %v6183_v22 = vmul.f32 %v6132_v11, %v6132_v11  ;;  %v15016_v62 = vld [vmem:[#allocation66_spill] sm:$0xff] }
 0x36d   :  { %v6143_v15 = vsub.f32 %v15016_v62, %v14075_v13 }
 0x36e   :  { %v6231_v56 = vadd.f32 %v6230_v45, %v6229_v48  ;;  %v6252_v48 = vsel %vm474_vm1, %v6181_v36, 0.0  ;;  %v6254_v45 = vsel %vm474_vm1, %v6182_v17, 0.0  ;;  %v6256_v57 = vsel %vm474_vm1, %v6183_v22, 0.0  ;;  %v15017_v36 = vld [vmem:[#allocation68_spill] sm:$0xff] }
 0x36f   :  { %v6194_v9 = vmul.f32 %v6143_v15, %v6143_v15 }
 0x370   :  { %v6233_v4 = vadd.f32 %v6232_v8, %v6231_v56 }
 0x372   :  { %v6235_v61 = vadd.f32 %v6234_v20, %v6233_v4  ;;  %v6186_v4 = vmul.f32 %v6135_v47, %v6135_v47  ;;  %v6138_v20 = vsub.f32 %v15011_v58, %v14075_v13 }
 0x374   :  { %v6237_v0 = vadd.f32 %v6236_v14, %v6235_v61  ;;  %v6187_v61 = vmul.f32 %v6136_v35, %v6136_v35  ;;  %v6139_v14 = vsub.f32 %v15012_v16, %v14075_v13  ;;  %v6262_v44 = vsel %vm474_vm1, %v6186_v4, 0.0 }
 0x375   :  { %v6202_v16 = vmul.f32 %v14104_v41, %v14104_v41 }
 0x376   :  { %v6239_v19 = vadd.f32 %v6238_v46, %v6237_v0  ;;  %v6188_v0 = vmul.f32 %v6137_v18, %v6137_v18  ;;  %v6140_v46 = vsub.f32 %v15013_v49, %v14075_v13  ;;  %v6264_v12 = vsel %vm474_vm1, %v6187_v61, 0.0 }
 0x377   :  { %v6190_v21 = vmul.f32 %v6139_v14, %v6139_v14 }
 0x378   :  { %v6241_v10 = vadd.f32 %v6240_v24, %v6239_v19  ;;  %v6189_v19 = vmul.f32 %v6138_v20, %v6138_v20  ;;  %v15014_v24 = vld [vmem:[#allocation12_spill] sm:$0xff]  ;;  %v6266_v31 = vsel %vm474_vm1, %v6188_v0, 0.0  ;;  %v6191_v30 = vmul.f32 %v6140_v46, %v6140_v46 }
 0x379   :  { %v6200_v20 = vmul.f32 %v14096_v43, %v14096_v43  ;;  %v6203_v0 = vmul.f32 %v14108_v53, %v14108_v53  ;;  %v6205_v46 = vmul.f32 %v14116_v6, %v14116_v6 }
 0x37a   :  { %v6243_v55 = vadd.f32 %v6242_v50, %v6241_v10  ;;  %v6141_v10 = vsub.f32 %v15014_v24, %v14075_v13  ;;  %v6272_v39 = vsel %vm474_vm1, %v6191_v30, 0.0 }
 0x37b   :  { %v6296_v41 = vsel %vm474_vm1, %v6203_v0, 0.0  ;;  %v6300_v24 = vsel %vm474_vm1, %v6205_v46, 0.0 }
 0x37c   :  { %v6245_v2 = vadd.f32 %v6244_v33, %v6243_v55  ;;  %v15015_v55 = vld [vmem:[#allocation75_spill] sm:$0xff]  ;;  %v6268_v33 = vsel %vm474_vm1, %v6189_v19, 0.0 }
 0x37d   :  { %v6142_v37 = vsub.f32 %v15015_v55, %v14075_v13 }
 0x37e   :  { %v6247_v42 = vadd.f32 %v6246_v3, %v6245_v2  ;;  %v6192_v3 = vmul.f32 %v6141_v10, %v6141_v10 }
 0x380   :  { %v6249_v5 = vadd.f32 %v6248_v29, %v6247_v42  ;;  %v6270_v42 = vsel %vm474_vm1, %v6190_v21, 0.0  ;;  %v6144_v29 = vsub.f32 %v15017_v36, %v14075_v13  ;;  %v6274_v22 = vsel %vm474_vm1, %v6192_v3, 0.0 }
 0x382   :  { %v6251_v7 = vadd.f32 %v6250_v63, %v6249_v5  ;;  %v6193_v5 = vmul.f32 %v6142_v37, %v6142_v37  ;;  %v15018_v63 = vld [vmem:[#allocation14_spill] sm:$0xff] }
 0x384   :  { %v6253_v38 = vadd.f32 %v6252_v48, %v6251_v7  ;;  %v6145_v7 = vsub.f32 %v15018_v63, %v14075_v13  ;;  %v6276_v47 = vsel %vm474_vm1, %v6193_v5, 0.0  ;;  %v6198_v13 = vmul.f32 %v14088_v1, %v14088_v1 }
 0x386   :  { %v6255_v56 = vadd.f32 %v6254_v45, %v6253_v38  ;;  %v6195_v38 = vmul.f32 %v6144_v29, %v6144_v29  ;;  %v6196_v45 = vmul.f32 %v6145_v7, %v6145_v7  ;;  %v6286_v28 = vsel %vm474_vm1, %v6198_v13, 0.0 }
 0x388   :  { %v6257_v8 = vadd.f32 %v6256_v57, %v6255_v56  ;;  %v6278_v56 = vsel %vm474_vm1, %v6194_v9, 0.0  ;;  %v6280_v57 = vsel %vm474_vm1, %v6195_v38, 0.0  ;;  %v6282_v18 = vsel %vm474_vm1, %v6196_v45, 0.0 }
 0x38a   :  { %v6259_v59 = vadd.f32 %v6258_v32, %v6257_v8  ;;  %v6199_v32 = vmul.f32 %v14092_v34, %v14092_v34  ;;  %v6290_v34 = vsel %vm474_vm1, %v6200_v20, 0.0 }
 0x38c   :  { %v6261_v27 = vadd.f32 %v6260_v25, %v6259_v59  ;;  %v6284_v59 = vsel %vm474_vm1, %v6197_v26, 0.0  ;;  %v6201_v25 = vmul.f32 %v14100_v54, %v14100_v54  ;;  %v6288_v1 = vsel %vm474_vm1, %v6199_v32, 0.0 }
 0x38d   :  { %v6294_v54 = vsel %vm474_vm1, %v6202_v16, 0.0 }
 0x38e   :  { %v6263_v51 = vadd.f32 %v6262_v44, %v6261_v27  ;;  %v6292_v43 = vsel %vm474_vm1, %v6201_v25, 0.0 }
 0x390   :  { %v6265_v23 = vadd.f32 %v6264_v12, %v6263_v51  ;;  %v6204_v51 = vmul.f32 %v14112_v40, %v14112_v40  ;;  %v6206_v12 = vmul.f32 %v14078_v52, %v14078_v52 }
 0x392   :  { %v6267_v50 = vadd.f32 %v6266_v31, %v6265_v23  ;;  %v6298_v53 = vsel %vm474_vm1, %v6204_v51, 0.0  ;;  %v6302_v40 = vsel %vm474_vm1, %v6206_v12, 0.0 }
 0x394   :  { %v6269_v2 = vadd.f32 %v6268_v33, %v6267_v50 }
 0x396   :  { %v6271_v11 = vadd.f32 %v6270_v42, %v6269_v2 }
 0x398   :  { %v6273_v17 = vadd.f32 %v6272_v39, %v6271_v11 }
 0x39a   :  { %v6275_v48 = vadd.f32 %v6274_v22, %v6273_v17 }
 0x39c   :  { %v6277_v60 = vadd.f32 %v6276_v47, %v6275_v48 }
 0x39e   :  { %v6279_v35 = vadd.f32 %v6278_v56, %v6277_v60 }
 0x3a0   :  { %v6281_v8 = vadd.f32 %v6280_v57, %v6279_v35 }
 0x3a2   :  { %v6283_v4 = vadd.f32 %v6282_v18, %v6281_v8 }
 0x3a4   :  { %v6285_v58 = vadd.f32 %v6284_v59, %v6283_v4 }
 0x3a6   :  { %v6287_v61 = vadd.f32 %v6286_v28, %v6285_v58 }
 0x3a8   :  { %v6289_v27 = vadd.f32 %v6288_v1, %v6287_v61 }
 0x3aa   :  { %v6291_v14 = vadd.f32 %v6290_v34, %v6289_v27 }
 0x3ac   :  { %v6293_v44 = vadd.f32 %v6292_v43, %v6291_v14 }
 0x3ae   :  { %v6295_v49 = vadd.f32 %v6294_v54, %v6293_v44 }
 0x3b0   :  { %v6297_v19 = vadd.f32 %v6296_v41, %v6295_v49 }
 0x3b2   :  { %v6299_v23 = vadd.f32 %v6298_v53, %v6297_v19 }
 0x3b4   :  { %v6301_v10 = vadd.f32 %v6300_v24, %v6299_v23 }
 0x3b6   :  { %v6303_v21 = vadd.f32 %v6302_v40, %v6301_v10 }
 0x3b8   :  { %v6304_v31 = vrot.slane %v6303_v21, 4 }
 0x3ba   :  { %v6305_v50 = vadd.f32 %v6304_v31, %v6303_v21 }
 0x3bc   :  { %v6306_v55 = vrot.slane %v6305_v50, 2 }
 0x3be   :  { %v6307_v37 = vadd.f32 %v6306_v55, %v6305_v50 }
 0x3c0   :  { %v6308_v6 = vrot.slane %v6307_v37, 1 }
 0x3c2   :  { %v6309_v30 = vadd.f32 %v6308_v6, %v6307_v37 }
 0x3c4   :  { %6310 = vst.msk [vmem:[#allocation2 + $0x1] sm:$0x1] %vm6156_vm12, %v6309_v30 }
 0x3c5   :  { %9276 = shalt.err (!%p9273_p4)
}
 0x3c6   :  { %s9277_s0 = scalar_lea.hbm %s14281_s3, 32 }
 0x3c7   :  { %p9278_p5 = scmp.ne.s32.totalorder %s14281_s3, %s9277_s0  ;;  %p9281_p6 = scmp.lt.u32.totalorder %s9277_s0, %s14281_s3 }
 0x3c9   :  { %p9283_p7 = pnand %p9281_p6, %p9278_p5 }
 0x3cb   :  { %9286 = shalt.err (!%p9283_p7)
}
 0x3cc   :  { %8241 = dma.vmem_to_hbm [thread:$0]  %s8239_s25, 32, %s14281_s3, [#allocation3]  }
 0x3cd   :  { %9287 = dma.done.wait [#allocation3], 32  }
 0x3ce   :  { %9288 = vsyncadd [#allocation3], 4294967264 }
 0x3cf   :  { %8247 = vsyncpa [#allocation3], 1 }

</bundles_post_ra>
